<compile_context>
chip_gen: v7x
topology: tpu7x:2x2x1
jax: 0.10.0
libtpu: 0.0.40
codegen_flags: <defaults>
</compile_context>

<pallas_src>
import functools

import jax
import jax.numpy as jnp
from jax.experimental import pallas as pl
from jax.experimental.pallas import tpu as pltpu

BN_EPS = 1e-5
LANE = 128


def _round_up(v, m):
    return (v + m - 1) // m * m


def _pad_last(a, target):
    pad = target - a.shape[-1]
    if pad == 0:
        return a
    return jnp.pad(a, [(0, 0)] * (a.ndim - 1) + [(0, pad)])


# --------------------------------------------------------------------------------------
# Kernels
# --------------------------------------------------------------------------------------

def _conv1x1_stats_kernel(x_ref, w_ref, y_ref, ssum_ref, ssq_ref, *,
                          rows_total, tile_rows, mask_rows):
    """y = x @ w (1x1 conv, bf16 operands / f32 acc); per-tile channel sum / sum_sq for BN."""
    y = jnp.dot(x_ref[...], w_ref[...], preferred_element_type=jnp.float32)
    y_ref[...] = y.astype(y_ref.dtype)
    if mask_rows:
        rid = (jax.lax.broadcasted_iota(jnp.int32, (tile_rows, 1), 0)
               + pl.program_id(0) * tile_rows)
        ym = jnp.where(rid < rows_total, y, 0.0)
    else:
        ym = y
    ssum_ref[...] = jnp.sum(ym, axis=0, keepdims=True)[None]
    ssq_ref[...] = jnp.sum(ym * ym, axis=0, keepdims=True)[None]


def _bn_relu_conv1x1_stats_kernel(x_ref, s_ref, t_ref, w_ref, ssum_ref, ssq_ref, *,
                                  rows_total, tile_rows, mask_rows):
    """Stats-only: partial BN stats of relu(bn(x)) @ w (the full y3 is never written to HBM)."""
    a = jnp.maximum(x_ref[...].astype(jnp.float32) * s_ref[...] + t_ref[...], 0.0)
    y = jnp.dot(a.astype(jnp.bfloat16), w_ref[...], preferred_element_type=jnp.float32)
    if mask_rows:
        rid = (jax.lax.broadcasted_iota(jnp.int32, (tile_rows, 1), 0)
               + pl.program_id(0) * tile_rows)
        y = jnp.where(rid < rows_total, y, 0.0)
    ssum_ref[...] = jnp.sum(y, axis=0, keepdims=True)[None]
    ssq_ref[...] = jnp.sum(y * y, axis=0, keepdims=True)[None]


def _bn_relu_conv3x3_stats_kernel(x_ref, s_ref, t_ref, w_ref,
                                  y_ref, ssum_ref, ssq_ref, patch_ref, *, H, W, SH):
    """One image per grid step: a = relu(bn1(x)); y = conv3x3(a, pad=1) via im2col-lite.

    Everything is processed in row strips of SH image rows so no value exceeds a few vregs.
    The bf16 patch scratch holds, per spatial position, the 3 horizontal taps concatenated
    along lanes; it is built with value-level concatenation (all scratch stores are aligned,
    no sublane-offset slicing of packed bf16 memory).
    """
    f32, bf16 = jnp.float32, jnp.bfloat16
    CP = y_ref.shape[-1]
    K3 = patch_ref.shape[-1]          # 3 * CP
    s = s_ref[...]
    t = t_ref[...]

    # Phase 1: BN1 + ReLU per strip, build the (H+2, W, 3*CP) bf16 patch buffer.
    zrow = jnp.zeros((1, W, K3), bf16)
    patch_ref[0:1] = zrow                       # top halo row
    patch_ref[H + 1:H + 2] = zrow               # bottom halo row
    for h0 in range(0, H, SH):
        sh = min(SH, H - h0)
        a = jnp.maximum(
            x_ref[pl.ds(h0 * W, sh * W), :].astype(f32) * s + t, 0.0)
        a3 = a.reshape(sh, W, CP)
        zcol = jnp.zeros((sh, 1, CP), f32)
        left = jnp.concatenate([zcol, a3[:, :W - 1, :]], axis=1)    # tap kw=0
        right = jnp.concatenate([a3[:, 1:, :], zcol], axis=1)       # tap kw=2
        patch_ref[1 + h0:1 + h0 + sh] = jnp.concatenate(
            [left, a3, right], axis=2).astype(bf16)

    # Phase 2: per strip, 3 MXU matmuls (one per vertical tap), f32 accumulation.
    ssum = jnp.zeros((1, CP), f32)
    ssq = jnp.zeros((1, CP), f32)
    for h0 in range(0, H, SH):
        sh = min(SH, H - h0)
        acc = jnp.zeros((sh * W, CP), f32)
        for kh in range(3):
            p = patch_ref[h0 + kh:h0 + kh + sh].reshape(sh * W, K3)
            acc = acc + jnp.dot(p, w_ref[kh], preferred_element_type=f32)
        y_ref[pl.ds(h0 * W, sh * W), :] = acc.astype(y_ref.dtype)
        ssum = ssum + jnp.sum(acc, axis=0, keepdims=True)
        ssq = ssq + jnp.sum(acc * acc, axis=0, keepdims=True)
    ssum_ref[...] = ssum[None]
    ssq_ref[...] = ssq[None]


def _bn_conv3_bn_residual_relu_kernel(y2_ref, x_ref, s2_ref, t2_ref, w_ref,
                                      s3_ref, t3_ref, o_ref):
    """out = relu(bn3(relu(bn2(y2)) @ w3) + identity); conv3 is recomputed here instead of
    round-tripping an f32 y3 through HBM."""
    a = jnp.maximum(y2_ref[...].astype(jnp.float32) * s2_ref[...] + t2_ref[...], 0.0)
    y3 = jnp.dot(a.astype(jnp.bfloat16), w_ref[...], preferred_element_type=jnp.float32)
    o_ref[...] = jnp.maximum(
        y3 * s3_ref[...] + t3_ref[...] + x_ref[...].astype(jnp.float32),
        0.0).astype(o_ref.dtype)


# --------------------------------------------------------------------------------------
# Wrapper
# --------------------------------------------------------------------------------------

def _bn_scale_shift(ssum, ssq, count, gamma_p, beta_p):
    """Fold biased batch stats into per-channel scale/shift (tiny (C,)-sized math)."""
    mean = jnp.sum(ssum, axis=(0, 1)) / count
    # E[x^2] - mean^2 can go slightly negative via cancellation; clamp before rsqrt.
    var = jnp.maximum(jnp.sum(ssq, axis=(0, 1)) / count - mean * mean, 0.0)
    inv = jax.lax.rsqrt(var + BN_EPS)
    scale = gamma_p.reshape(-1) * inv
    shift = beta_p.reshape(-1) - mean * scale
    return scale.reshape(1, -1), shift.reshape(1, -1)


@jax.jit
def bottleneck_forward(x_nchw, w1, g1, b1, w2, g2, b2, w3, g3, b3):
    N, Cin, H, W = x_nchw.shape
    width = w1.shape[1]
    Cout = w3.shape[1]
    assert Cout == Cin, "residual add requires inplanes == planes * expansion"
    assert W >= 2 and (H * W) % 16 == 0
    R = N * H * W

    CI = _round_up(Cin, LANE)     # padded input / output channels (Cin == Cout)
    CM = _round_up(width, LANE)   # padded bottleneck width
    f32, bf16 = jnp.float32, jnp.bfloat16

    # ---------------- layout plumbing (wrapper side) ----------------
    # NCHW -> lane-dense (N*H*W, C_pad) bf16; x2d is read twice (conv1 + identity) so bf16
    # halves its HBM bytes; the matmul path downcast anyway and the residual is upcast in-kernel.
    x2d = _pad_last(jnp.transpose(x_nchw, (0, 2, 3, 1)).reshape(R, Cin), CI).astype(bf16)

    w1p = _pad_last(jnp.pad(w1, ((0, CI - Cin), (0, 0))), CM).astype(bf16)      # (CI, CM)
    w3p = _pad_last(jnp.pad(w3, ((0, CM - width), (0, 0))), CI).astype(bf16)    # (CM, CI)
    # conv2 weights (kh, kw, ci, co) -> (3, 3*CM, CM): horizontal taps stacked along K.
    w2p = jnp.zeros((3, 3 * CM, CM), f32)
    for kh in range(3):
        for kw in range(3):
            w2p = w2p.at[kh, kw * CM:kw * CM + width, :width].set(w2[kh, kw])
    w2p = w2p.astype(bf16)

    # BN affine params zero-padded (so the padded channels stay exactly zero end-to-end).
    g1p, b1p = _pad_last(g1.reshape(1, -1), CM), _pad_last(b1.reshape(1, -1), CM)
    g2p, b2p = _pad_last(g2.reshape(1, -1), CM), _pad_last(b2.reshape(1, -1), CM)
    g3p, b3p = _pad_last(g3.reshape(1, -1), CI), _pad_last(b3.reshape(1, -1), CI)

    # Row tile for the pointwise kernels: sized from a ~2 MiB/buffer VMEM budget (cap 4096);
    # remainder handled by a cdiv grid + in-kernel row masking, so TR never collapses.
    TR = max(256, min(4096, (2 * 1024 * 1024) // (max(CI, CM) * 4)))
    TR = _round_up(min(TR, _round_up(R, 8)), 8)
    nt = pl.cdiv(R, TR)
    mask_rows = (R % TR) != 0

    params = pltpu.CompilerParams(
        dimension_semantics=("parallel",),          # no cross-step state -> megacore OK
        vmem_limit_bytes=32 * 1024 * 1024,          # within v7x's 64 MiB physical VMEM
    )

    def full_spec(shape):
        nd = len(shape)
        return pl.BlockSpec(shape, lambda *_: (0,) * nd)

    def row_spec(cols):
        return pl.BlockSpec((TR, cols), lambda i: (i, 0))

    def stats_spec(cols):
        return pl.BlockSpec((1, 1, cols), lambda i: (i, 0, 0))

    # ---------------- conv1 (1x1) + BN1 partial stats ----------------
    k1 = functools.partial(_conv1x1_stats_kernel,
                           rows_total=R, tile_rows=TR, mask_rows=mask_rows)
    y1, s1sum, s1sq = pl.pallas_call(
        k1,
        grid=(nt,),
        in_specs=[row_spec(CI), full_spec((CI, CM))],
        out_specs=[row_spec(CM), stats_spec(CM), stats_spec(CM)],
        out_shape=[jax.ShapeDtypeStruct((R, CM), bf16),
                   jax.ShapeDtypeStruct((nt, 1, CM), f32),
                   jax.ShapeDtypeStruct((nt, 1, CM), f32)],
        compiler_params=params,
    )(x2d, w1p)
    sc1, sh1 = _bn_scale_shift(s1sum, s1sq, R, g1p, b1p)

    # ---------------- BN1 + ReLU + conv2 (3x3, pad=1) + BN2 partial stats ----------------
    SH = max(1, min(H, 128 // max(1, W)))           # ~128 output rows per in-kernel strip
    k2 = functools.partial(_bn_relu_conv3x3_stats_kernel, H=H, W=W, SH=SH)
    y2, s2sum, s2sq = pl.pallas_call(
        k2,
        grid=(N,),
        in_specs=[pl.BlockSpec((H * W, CM), lambda n: (n, 0)),
                  full_spec((1, CM)), full_spec((1, CM)),
                  full_spec((3, 3 * CM, CM))],
        out_specs=[pl.BlockSpec((H * W, CM), lambda n: (n, 0)),
                   stats_spec(CM), stats_spec(CM)],
        out_shape=[jax.ShapeDtypeStruct((R, CM), bf16),
                   jax.ShapeDtypeStruct((N, 1, CM), f32),
                   jax.ShapeDtypeStruct((N, 1, CM), f32)],
        scratch_shapes=[pltpu.VMEM((H + 2, W, 3 * CM), bf16)],   # lane-concat patch buffer
        compiler_params=params,
    )(y1, sc1, sh1, w2p)
    sc2, sh2 = _bn_scale_shift(s2sum, s2sq, R, g2p, b2p)

    # ---------------- BN2 + ReLU + conv3 (1x1): BN3 partial stats ONLY (no y3 writeback) ----
    k3 = functools.partial(_bn_relu_conv1x1_stats_kernel,
                           rows_total=R, tile_rows=TR, mask_rows=mask_rows)
    s3sum, s3sq = pl.pallas_call(
        k3,
        grid=(nt,),
        in_specs=[row_spec(CM), full_spec((1, CM)), full_spec((1, CM)),
                  full_spec((CM, CI))],
        out_specs=[stats_spec(CI), stats_spec(CI)],
        out_shape=[jax.ShapeDtypeStruct((nt, 1, CI), f32),
                   jax.ShapeDtypeStruct((nt, 1, CI), f32)],
        compiler_params=params,
    )(y2, sc2, sh2, w3p)
    sc3, sh3 = _bn_scale_shift(s3sum, s3sq, R, g3p, b3p)

    # ---------------- recompute conv3 + BN3 + residual add + ReLU ----------------
    outp = pl.pallas_call(
        _bn_conv3_bn_residual_relu_kernel,
        grid=(nt,),
        in_specs=[row_spec(CM), row_spec(CI),
                  full_spec((1, CM)), full_spec((1, CM)),
                  full_spec((CM, CI)),
                  full_spec((1, CI)), full_spec((1, CI))],
        out_specs=row_spec(CI),
        out_shape=jax.ShapeDtypeStruct((R, CI), f32),
        compiler_params=params,
    )(y2, x2d, sc2, sh2, w3p, sc3, sh3)

    out = outp[:, :Cout].reshape(N, H, W, Cout).astype(x_nchw.dtype)
    return jnp.transpose(out, (0, 3, 1, 2))     # back to NCHW


# --------------------------------------------------------------------------------------
# Pure-JAX reference (NCHW, lax conv, same training-mode BN semantics)
# --------------------------------------------------------------------------------------

def bottleneck_ref(x_nchw, w1, g1, b1, w2, g2, b2, w3, g3, b3):
    def bn(x, gamma, beta):
        mean = jnp.mean(x, axis=(0, 2, 3), keepdims=True)
        var = jnp.var(x, axis=(0, 2, 3), keepdims=True)
        g = gamma.reshape(1, -1, 1, 1)
        b = beta.reshape(1, -1, 1, 1)
        return (x - mean) / jnp.sqrt(var + BN_EPS) * g + b

    def conv(x, w_oihw, pad):
        return jax.lax.conv_general_dilated(
            x, w_oihw, window_strides=(1, 1), padding=pad,
            dimension_numbers=("NCHW", "OIHW", "NCHW"))

    w1_oihw = w1.T[:, :, None, None]                 # (width, Cin, 1, 1)
    w2_oihw = jnp.transpose(w2, (3, 2, 0, 1))        # (out, in, kh, kw)
    w3_oihw = w3.T[:, :, None, None]                 # (Cout, width, 1, 1)

    h = jax.nn.relu(bn(conv(x_nchw, w1_oihw, "VALID"), g1, b1))
    h = jax.nn.relu(bn(conv(h, w2_oihw, [(1, 1), (1, 1)]), g2, b2))
    h = bn(conv(h, w3_oihw, "VALID"), g3, b3)
    return jax.nn.relu(h + x_nchw)


if __name__ == "__main__":
    # Bottleneck(inplanes=16, planes=4): width=4, out channels = planes*expansion = 16,
    # so the identity add is valid with downsample=None.
    N, H, W = 2, 16, 16
    inplanes, planes, expansion = 16, 4, 4
    width = planes                # base_width=64, groups=1
    cout = planes * expansion     # == inplanes

    key = jax.random.PRNGKey(0)
    ks = jax.random.split(key, 10)

    x = jax.random.normal(ks[0], (N, inplanes, H, W), jnp.float32)

    # Conv weights channels-last: (Cin, Cout) / (kh, kw, Cin, Cout).
    w1 = 0.2 * jax.random.normal(ks[1], (inplanes, width), jnp.float32)
    w2 = 0.1 * jax.random.normal(ks[2], (3, 3, width, width), jnp.float32)
    w3 = 0.2 * jax.random.normal(ks[3], (width, cout), jnp.float32)

    # BN affine params (gamma, beta).
    g1 = 1.0 + 0.1 * jax.random.normal(ks[4], (1, width), jnp.float32)
    b1 = 0.1 * jax.random.normal(ks[5], (1, width), jnp.float32)
    g2 = 1.0 + 0.1 * jax.random.normal(ks[6], (1, width), jnp.float32)
    b2 = 0.1 * jax.random.normal(ks[7], (1, width), jnp.float32)
    g3 = 1.0 + 0.1 * jax.random.normal(ks[8], (1, cout), jnp.float32)
    b3 = 0.1 * jax.random.normal(ks[9], (1, cout), jnp.float32)

    out = bottleneck_forward(x, w1, g1, b1, w2, g2, b2, w3, g3, b3)
    out = jax.block_until_ready(out)

    ref = bottleneck_ref(x, w1, g1, b1, w2, g2, b2, w3, g3, b3)
    assert out.shape == (N, cout, H, W), out.shape
    err_max = float(jnp.max(jnp.abs(out - ref)))
    err_mean = float(jnp.mean(jnp.abs(out - ref)))
    # bf16 activations / MXU operands (f32 accumulation) vs f32 reference.
    assert err_max < 1.5e-1, f"max abs error too large: {err_max}"
    assert err_mean < 1.5e-2, f"mean abs error too large: {err_mean}"

    print("KERNEL_OK")
</pallas_src>

<mosaic_0001>
module attributes {stable_mosaic.version = 11 : i64} {
  func.func @_bn_relu_conv1x1_stats_kernel(%arg0: i32, %arg1: memref<512x128xbf16, #tpu.memory_space<vmem>>, %arg2: memref<1x128xf32, #tpu.memory_space<vmem>>, %arg3: memref<1x128xf32, #tpu.memory_space<vmem>>, %arg4: memref<128x128xbf16, #tpu.memory_space<vmem>>, %arg5: memref<1x1x128xf32, #tpu.memory_space<vmem>>, %arg6: memref<1x1x128xf32, #tpu.memory_space<vmem>>) attributes {dimension_semantics = [#tpu.dimension_semantics<parallel>], iteration_bounds = array<i64: 1>, scalar_prefetch = 0 : i64, scratch_operands = 0 : i64, tpu.core_type = #tpu.core_type<tc>, window_params = [{transform_indices = @transform_0, window_bounds = array<i64: 512, 128>}, {pipeline_mode = #tpu.pipeline_mode<synchronous>, transform_indices = @transform_1, window_bounds = array<i64: 1, 128>}, {pipeline_mode = #tpu.pipeline_mode<synchronous>, transform_indices = @transform_2, window_bounds = array<i64: 1, 128>}, {pipeline_mode = #tpu.pipeline_mode<synchronous>, transform_indices = @transform_3, window_bounds = array<i64: 128, 128>}, {transform_indices = @transform_4, window_bounds = array<i64: 1, 1, 128>}, {transform_indices = @transform_5, window_bounds = array<i64: 1, 1, 128>}]} {
    %c0 = arith.constant 0 : index
    %c0_0 = arith.constant 0 : index
    %0 = vector.load %arg1[%c0, %c0_0] : memref<512x128xbf16, #tpu.memory_space<vmem>>, vector<512x128xbf16>
    %1 = arith.extf %0 : vector<512x128xbf16> to vector<512x128xf32>
    %c0_1 = arith.constant 0 : index
    %c0_2 = arith.constant 0 : index
    %2 = vector.load %arg2[%c0_1, %c0_2] : memref<1x128xf32, #tpu.memory_space<vmem>>, vector<1x128xf32>
    %3 = vector.broadcast %2 : vector<1x128xf32> to vector<512x128xf32>
    %4 = arith.mulf %1, %3 : vector<512x128xf32>
    %c0_3 = arith.constant 0 : index
    %c0_4 = arith.constant 0 : index
    %5 = vector.load %arg3[%c0_3, %c0_4] : memref<1x128xf32, #tpu.memory_space<vmem>>, vector<1x128xf32>
    %6 = vector.broadcast %5 : vector<1x128xf32> to vector<512x128xf32>
    %7 = arith.addf %4, %6 : vector<512x128xf32>
    %cst = arith.constant 0.000000e+00 : f32
    %8 = vector.broadcast %cst : f32 to vector<512x128xf32>
    %9 = arith.maximumf %7, %8 : vector<512x128xf32>
    %10 = arith.truncf %9 : vector<512x128xf32> to vector<512x128xbf16>
    %c0_5 = arith.constant 0 : index
    %c0_6 = arith.constant 0 : index
    %11 = vector.load %arg4[%c0_5, %c0_6] : memref<128x128xbf16, #tpu.memory_space<vmem>>, vector<128x128xbf16>
    %cst_7 = arith.constant dense<0.000000e+00> : vector<512x128xf32>
    %12 = tpu.matmul %10, %11, %cst_7 {dimension_numbers = #tpu.dot_dimension_numbers<[1], [0], [0], [1], [0, 0, 1, 1], [], []>} : vector<512x128xbf16>, vector<128x128xbf16>, vector<512x128xf32> -> vector<512x128xf32>
    %cst_8 = arith.constant dense<0.000000e+00> : vector<128xf32>
    %13 = vector.multi_reduction <add>, %12, %cst_8 [0] : vector<512x128xf32> to vector<128xf32>
    %14 = vector.shape_cast %13 : vector<128xf32> to vector<1x128xf32>
    %15 = vector.shape_cast %14 : vector<1x128xf32> to vector<1x1x128xf32>
    %c0_9 = arith.constant 0 : index
    %c0_10 = arith.constant 0 : index
    %c0_11 = arith.constant 0 : index
    %16 = vector.load %arg5[%c0_9, %c0_10, %c0_11] : memref<1x1x128xf32, #tpu.memory_space<vmem>>, vector<1x1x128xf32>
    tpu.vector_store %arg5[%c0_9, %c0_10, %c0_11], %15 {strides = array<i32>} : memref<1x1x128xf32, #tpu.memory_space<vmem>>, vector<1x1x128xf32>,
    %17 = arith.mulf %12, %12 : vector<512x128xf32>
    %cst_12 = arith.constant dense<0.000000e+00> : vector<128xf32>
    %18 = vector.multi_reduction <add>, %17, %cst_12 [0] : vector<512x128xf32> to vector<128xf32>
    %19 = vector.shape_cast %18 : vector<128xf32> to vector<1x128xf32>
    %20 = vector.shape_cast %19 : vector<1x128xf32> to vector<1x1x128xf32>
    %c0_13 = arith.constant 0 : index
    %c0_14 = arith.constant 0 : index
    %c0_15 = arith.constant 0 : index
    %21 = vector.load %arg6[%c0_13, %c0_14, %c0_15] : memref<1x1x128xf32, #tpu.memory_space<vmem>>, vector<1x1x128xf32>
    tpu.vector_store %arg6[%c0_13, %c0_14, %c0_15], %20 {strides = array<i32>} : memref<1x1x128xf32, #tpu.memory_space<vmem>>, vector<1x1x128xf32>,
    return
  }
  func.func @transform_0(%arg0: i32) -> (i32, i32) {
    %c0_i32 = arith.constant 0 : i32
    %c0_i32_0 = arith.constant 0 : i32
    return %arg0, %c0_i32 : i32, i32
  }
  func.func @transform_1(%arg0: i32) -> (i32, i32) {
    %c0_i32 = arith.constant 0 : i32
    %c0_i32_0 = arith.constant 0 : i32
    %c0_i32_1 = arith.constant 0 : i32
    return %c0_i32, %c0_i32_0 : i32, i32
  }
  func.func @transform_2(%arg0: i32) -> (i32, i32) {
    %c0_i32 = arith.constant 0 : i32
    %c0_i32_0 = arith.constant 0 : i32
    %c0_i32_1 = arith.constant 0 : i32
    return %c0_i32, %c0_i32_0 : i32, i32
  }
  func.func @transform_3(%arg0: i32) -> (i32, i32) {
    %c0_i32 = arith.constant 0 : i32
    %c0_i32_0 = arith.constant 0 : i32
    %c0_i32_1 = arith.constant 0 : i32
    return %c0_i32, %c0_i32_0 : i32, i32
  }
  func.func @transform_4(%arg0: i32) -> (i32, i32, i32) {
    %c0_i32 = arith.constant 0 : i32
    %c0_i32_0 = arith.constant 0 : i32
    %c0_i32_1 = arith.constant 0 : i32
    return %arg0, %c0_i32, %c0_i32_0 : i32, i32, i32
  }
  func.func @transform_5(%arg0: i32) -> (i32, i32, i32) {
    %c0_i32 = arith.constant 0 : i32
    %c0_i32_0 = arith.constant 0 : i32
    %c0_i32_1 = arith.constant 0 : i32
    return %arg0, %c0_i32, %c0_i32_0 : i32, i32, i32
  }
}

module attributes {stable_mosaic.version = 11 : i64} {
  func.func @_conv1x1_stats_kernel(%arg0: i32, %arg1: memref<512x128xbf16, #tpu.memory_space<vmem>>, %arg2: memref<128x128xbf16, #tpu.memory_space<vmem>>, %arg3: memref<512x128xbf16, #tpu.memory_space<vmem>>, %arg4: memref<1x1x128xf32, #tpu.memory_space<vmem>>, %arg5: memref<1x1x128xf32, #tpu.memory_space<vmem>>) attributes {dimension_semantics = [#tpu.dimension_semantics<parallel>], iteration_bounds = array<i64: 1>, scalar_prefetch = 0 : i64, scratch_operands = 0 : i64, tpu.core_type = #tpu.core_type<tc>, window_params = [{transform_indices = @transform_0, window_bounds = array<i64: 512, 128>}, {pipeline_mode = #tpu.pipeline_mode<synchronous>, transform_indices = @transform_1, window_bounds = array<i64: 128, 128>}, {transform_indices = @transform_2, window_bounds = array<i64: 512, 128>}, {transform_indices = @transform_3, window_bounds = array<i64: 1, 1, 128>}, {transform_indices = @transform_4, window_bounds = array<i64: 1, 1, 128>}]} {
    %c0 = arith.constant 0 : index
    %c0_0 = arith.constant 0 : index
    %0 = vector.load %arg1[%c0, %c0_0] : memref<512x128xbf16, #tpu.memory_space<vmem>>, vector<512x128xbf16>
    %c0_1 = arith.constant 0 : index
    %c0_2 = arith.constant 0 : index
    %1 = vector.load %arg2[%c0_1, %c0_2] : memref<128x128xbf16, #tpu.memory_space<vmem>>, vector<128x128xbf16>
    %cst = arith.constant dense<0.000000e+00> : vector<512x128xf32>
    %2 = tpu.matmul %0, %1, %cst {dimension_numbers = #tpu.dot_dimension_numbers<[1], [0], [0], [1], [0, 0, 1, 1], [], []>} : vector<512x128xbf16>, vector<128x128xbf16>, vector<512x128xf32> -> vector<512x128xf32>
    %3 = arith.truncf %2 : vector<512x128xf32> to vector<512x128xbf16>
    %c0_3 = arith.constant 0 : index
    %c0_4 = arith.constant 0 : index
    %4 = vector.load %arg3[%c0_3, %c0_4] : memref<512x128xbf16, #tpu.memory_space<vmem>>, vector<512x128xbf16>
    tpu.vector_store %arg3[%c0_3, %c0_4], %3 {strides = array<i32>} : memref<512x128xbf16, #tpu.memory_space<vmem>>, vector<512x128xbf16>,
    %cst_5 = arith.constant dense<0.000000e+00> : vector<128xf32>
    %5 = vector.multi_reduction <add>, %2, %cst_5 [0] : vector<512x128xf32> to vector<128xf32>
    %6 = vector.shape_cast %5 : vector<128xf32> to vector<1x128xf32>
    %7 = vector.shape_cast %6 : vector<1x128xf32> to vector<1x1x128xf32>
    %c0_6 = arith.constant 0 : index
    %c0_7 = arith.constant 0 : index
    %c0_8 = arith.constant 0 : index
    %8 = vector.load %arg4[%c0_6, %c0_7, %c0_8] : memref<1x1x128xf32, #tpu.memory_space<vmem>>, vector<1x1x128xf32>
    tpu.vector_store %arg4[%c0_6, %c0_7, %c0_8], %7 {strides = array<i32>} : memref<1x1x128xf32, #tpu.memory_space<vmem>>, vector<1x1x128xf32>,
    %9 = arith.mulf %2, %2 : vector<512x128xf32>
    %cst_9 = arith.constant dense<0.000000e+00> : vector<128xf32>
    %10 = vector.multi_reduction <add>, %9, %cst_9 [0] : vector<512x128xf32> to vector<128xf32>
    %11 = vector.shape_cast %10 : vector<128xf32> to vector<1x128xf32>
    %12 = vector.shape_cast %11 : vector<1x128xf32> to vector<1x1x128xf32>
    %c0_10 = arith.constant 0 : index
    %c0_11 = arith.constant 0 : index
    %c0_12 = arith.constant 0 : index
    %13 = vector.load %arg5[%c0_10, %c0_11, %c0_12] : memref<1x1x128xf32, #tpu.memory_space<vmem>>, vector<1x1x128xf32>
    tpu.vector_store %arg5[%c0_10, %c0_11, %c0_12], %12 {strides = array<i32>} : memref<1x1x128xf32, #tpu.memory_space<vmem>>, vector<1x1x128xf32>,
    return
  }
  func.func @transform_0(%arg0: i32) -> (i32, i32) {
    %c0_i32 = arith.constant 0 : i32
    %c0_i32_0 = arith.constant 0 : i32
    return %arg0, %c0_i32 : i32, i32
  }
  func.func @transform_1(%arg0: i32) -> (i32, i32) {
    %c0_i32 = arith.constant 0 : i32
    %c0_i32_0 = arith.constant 0 : i32
    %c0_i32_1 = arith.constant 0 : i32
    return %c0_i32, %c0_i32_0 : i32, i32
  }
  func.func @transform_2(%arg0: i32) -> (i32, i32) {
    %c0_i32 = arith.constant 0 : i32
    %c0_i32_0 = arith.constant 0 : i32
    return %arg0, %c0_i32 : i32, i32
  }
  func.func @transform_3(%arg0: i32) -> (i32, i32, i32) {
    %c0_i32 = arith.constant 0 : i32
    %c0_i32_0 = arith.constant 0 : i32
    %c0_i32_1 = arith.constant 0 : i32
    return %arg0, %c0_i32, %c0_i32_0 : i32, i32, i32
  }
  func.func @transform_4(%arg0: i32) -> (i32, i32, i32) {
    %c0_i32 = arith.constant 0 : i32
    %c0_i32_0 = arith.constant 0 : i32
    %c0_i32_1 = arith.constant 0 : i32
    return %arg0, %c0_i32, %c0_i32_0 : i32, i32, i32
  }
}

module attributes {stable_mosaic.version = 11 : i64} {
  func.func @_bn_relu_conv3x3_stats_kernel(%arg0: i32, %arg1: memref<256x128xbf16, #tpu.memory_space<vmem>>, %arg2: memref<1x128xf32, #tpu.memory_space<vmem>>, %arg3: memref<1x128xf32, #tpu.memory_space<vmem>>, %arg4: memref<3x384x128xbf16, #tpu.memory_space<vmem>>, %arg5: memref<256x128xbf16, #tpu.memory_space<vmem>>, %arg6: memref<1x1x128xf32, #tpu.memory_space<vmem>>, %arg7: memref<1x1x128xf32, #tpu.memory_space<vmem>>, %arg8: memref<18x16x384xbf16, #tpu.memory_space<vmem>>) attributes {dimension_semantics = [#tpu.dimension_semantics<parallel>], iteration_bounds = array<i64: 2>, scalar_prefetch = 0 : i64, scratch_operands = 1 : i64, tpu.core_type = #tpu.core_type<tc>, window_params = [{transform_indices = @transform_0, window_bounds = array<i64: 256, 128>}, {pipeline_mode = #tpu.pipeline_mode<synchronous>, transform_indices = @transform_1, window_bounds = array<i64: 1, 128>}, {pipeline_mode = #tpu.pipeline_mode<synchronous>, transform_indices = @transform_2, window_bounds = array<i64: 1, 128>}, {pipeline_mode = #tpu.pipeline_mode<synchronous>, transform_indices = @transform_3, window_bounds = array<i64: 3, 384, 128>}, {transform_indices = @transform_4, window_bounds = array<i64: 256, 128>}, {transform_indices = @transform_5, window_bounds = array<i64: 1, 1, 128>}, {transform_indices = @transform_6, window_bounds = array<i64: 1, 1, 128>}]} {
    %c0 = arith.constant 0 : index
    %c0_0 = arith.constant 0 : index
    %0 = vector.load %arg2[%c0, %c0_0] : memref<1x128xf32, #tpu.memory_space<vmem>>, vector<1x128xf32>
    %c0_1 = arith.constant 0 : index
    %c0_2 = arith.constant 0 : index
    %1 = vector.load %arg3[%c0_1, %c0_2] : memref<1x128xf32, #tpu.memory_space<vmem>>, vector<1x128xf32>
    %cst = arith.constant 0.000000e+00 : bf16
    %2 = vector.broadcast %cst : bf16 to vector<1x16x384xbf16>
    %c0_3 = arith.constant 0 : index
    %c0_4 = arith.constant 0 : index
    %c0_5 = arith.constant 0 : index
    %3 = vector.load %arg8[%c0_3, %c0_4, %c0_5] : memref<18x16x384xbf16, #tpu.memory_space<vmem>>, vector<1x16x384xbf16>
    tpu.vector_store %arg8[%c0_3, %c0_4, %c0_5], %2 {strides = array<i32>} : memref<18x16x384xbf16, #tpu.memory_space<vmem>>, vector<1x16x384xbf16>,
    %c17 = arith.constant 17 : index
    %c0_6 = arith.constant 0 : index
    %c0_7 = arith.constant 0 : index
    %4 = vector.load %arg8[%c17, %c0_6, %c0_7] : memref<18x16x384xbf16, #tpu.memory_space<vmem>>, vector<1x16x384xbf16>
    tpu.vector_store %arg8[%c17, %c0_6, %c0_7], %2 {strides = array<i32>} : memref<18x16x384xbf16, #tpu.memory_space<vmem>>, vector<1x16x384xbf16>,
    %c0_8 = arith.constant 0 : index
    %c0_9 = arith.constant 0 : index
    %5 = vector.load %arg1[%c0_8, %c0_9] : memref<256x128xbf16, #tpu.memory_space<vmem>>, vector<128x128xbf16>
    %6 = arith.extf %5 : vector<128x128xbf16> to vector<128x128xf32>
    %7 = vector.broadcast %0 : vector<1x128xf32> to vector<128x128xf32>
    %8 = arith.mulf %6, %7 : vector<128x128xf32>
    %9 = vector.broadcast %1 : vector<1x128xf32> to vector<128x128xf32>
    %10 = arith.addf %8, %9 : vector<128x128xf32>
    %cst_10 = arith.constant 0.000000e+00 : f32
    %11 = vector.broadcast %cst_10 : f32 to vector<128x128xf32>
    %12 = arith.maximumf %10, %11 : vector<128x128xf32>
    %13 = vector.shape_cast %12 : vector<128x128xf32> to vector<8x16x128xf32>
    %cst_11 = arith.constant 0.000000e+00 : f32
    %14 = vector.broadcast %cst_11 : f32 to vector<8x1x128xf32>
    %15 = vector.extract_strided_slice %13 {offsets = [0, 0, 0], sizes = [8, 15, 128], strides = [1, 1, 1]} : vector<8x16x128xf32> to vector<8x15x128xf32>
    %16 = tpu.concatenate %14, %15 in 1 : vector<8x1x128xf32>, vector<8x15x128xf32> -> vector<8x16x128xf32>
    %17 = vector.extract_strided_slice %13 {offsets = [0, 1, 0], sizes = [8, 15, 128], strides = [1, 1, 1]} : vector<8x16x128xf32> to vector<8x15x128xf32>
    %18 = tpu.concatenate %17, %14 in 1 : vector<8x15x128xf32>, vector<8x1x128xf32> -> vector<8x16x128xf32>
    %19 = tpu.concatenate %16, %13, %18 in 2 : vector<8x16x128xf32>, vector<8x16x128xf32>, vector<8x16x128xf32> -> vector<8x16x384xf32>
    %20 = arith.truncf %19 : vector<8x16x384xf32> to vector<8x16x384xbf16>
    %c1 = arith.constant 1 : index
    %c0_12 = arith.constant 0 : index
    %c0_13 = arith.constant 0 : index
    %21 = vector.load %arg8[%c1, %c0_12, %c0_13] : memref<18x16x384xbf16, #tpu.memory_space<vmem>>, vector<8x16x384xbf16>
    tpu.vector_store %arg8[%c1, %c0_12, %c0_13], %20 {strides = array<i32>} : memref<18x16x384xbf16, #tpu.memory_space<vmem>>, vector<8x16x384xbf16>,
    %c128 = arith.constant 128 : index
    %c0_14 = arith.constant 0 : index
    %22 = vector.load %arg1[%c128, %c0_14] : memref<256x128xbf16, #tpu.memory_space<vmem>>, vector<128x128xbf16>
    %23 = arith.extf %22 : vector<128x128xbf16> to vector<128x128xf32>
    %24 = vector.broadcast %0 : vector<1x128xf32> to vector<128x128xf32>
    %25 = arith.mulf %23, %24 : vector<128x128xf32>
    %26 = vector.broadcast %1 : vector<1x128xf32> to vector<128x128xf32>
    %27 = arith.addf %25, %26 : vector<128x128xf32>
    %cst_15 = arith.constant 0.000000e+00 : f32
    %28 = vector.broadcast %cst_15 : f32 to vector<128x128xf32>
    %29 = arith.maximumf %27, %28 : vector<128x128xf32>
    %30 = vector.shape_cast %29 : vector<128x128xf32> to vector<8x16x128xf32>
    %cst_16 = arith.constant 0.000000e+00 : f32
    %31 = vector.broadcast %cst_16 : f32 to vector<8x1x128xf32>
    %32 = vector.extract_strided_slice %30 {offsets = [0, 0, 0], sizes = [8, 15, 128], strides = [1, 1, 1]} : vector<8x16x128xf32> to vector<8x15x128xf32>
    %33 = tpu.concatenate %31, %32 in 1 : vector<8x1x128xf32>, vector<8x15x128xf32> -> vector<8x16x128xf32>
    %34 = vector.extract_strided_slice %30 {offsets = [0, 1, 0], sizes = [8, 15, 128], strides = [1, 1, 1]} : vector<8x16x128xf32> to vector<8x15x128xf32>
    %35 = tpu.concatenate %34, %31 in 1 : vector<8x15x128xf32>, vector<8x1x128xf32> -> vector<8x16x128xf32>
    %36 = tpu.concatenate %33, %30, %35 in 2 : vector<8x16x128xf32>, vector<8x16x128xf32>, vector<8x16x128xf32> -> vector<8x16x384xf32>
    %37 = arith.truncf %36 : vector<8x16x384xf32> to vector<8x16x384xbf16>
    %c9 = arith.constant 9 : index
    %c0_17 = arith.constant 0 : index
    %c0_18 = arith.constant 0 : index
    %38 = vector.load %arg8[%c9, %c0_17, %c0_18] : memref<18x16x384xbf16, #tpu.memory_space<vmem>>, vector<8x16x384xbf16>
    tpu.vector_store %arg8[%c9, %c0_17, %c0_18], %37 {strides = array<i32>} : memref<18x16x384xbf16, #tpu.memory_space<vmem>>, vector<8x16x384xbf16>,
    %cst_19 = arith.constant 0.000000e+00 : f32
    %39 = vector.broadcast %cst_19 : f32 to vector<1x128xf32>
    %cst_20 = arith.constant 0.000000e+00 : f32
    %40 = vector.broadcast %cst_20 : f32 to vector<1x128xf32>
    %cst_21 = arith.constant 0.000000e+00 : f32
    %41 = vector.broadcast %cst_21 : f32 to vector<128x128xf32>
    %c0_22 = arith.constant 0 : index
    %c0_23 = arith.constant 0 : index
    %c0_24 = arith.constant 0 : index
    %42 = vector.load %arg8[%c0_22, %c0_23, %c0_24] : memref<18x16x384xbf16, #tpu.memory_space<vmem>>, vector<8x16x384xbf16>
    %43 = vector.shape_cast %42 : vector<8x16x384xbf16> to vector<128x384xbf16>
    %c0_25 = arith.constant 0 : index
    %c0_26 = arith.constant 0 : index
    %c0_27 = arith.constant 0 : index
    %44 = vector.load %arg4[%c0_25, %c0_26, %c0_27] : memref<3x384x128xbf16, #tpu.memory_space<vmem>>, vector<1x384x128xbf16>
    %45 = vector.shape_cast %44 : vector<1x384x128xbf16> to vector<384x128xbf16>
    %cst_28 = arith.constant dense<0.000000e+00> : vector<128x128xf32>
    %46 = tpu.matmul %43, %45, %cst_28 {dimension_numbers = #tpu.dot_dimension_numbers<[1], [0], [0], [1], [0, 0, 1, 1], [], []>} : vector<128x384xbf16>, vector<384x128xbf16>, vector<128x128xf32> -> vector<128x128xf32>
    %47 = arith.addf %41, %46 : vector<128x128xf32>
    %c1_29 = arith.constant 1 : index
    %c0_30 = arith.constant 0 : index
    %c0_31 = arith.constant 0 : index
    %48 = vector.load %arg8[%c1_29, %c0_30, %c0_31] : memref<18x16x384xbf16, #tpu.memory_space<vmem>>, vector<8x16x384xbf16>
    %49 = vector.shape_cast %48 : vector<8x16x384xbf16> to vector<128x384xbf16>
    %c1_32 = arith.constant 1 : index
    %c0_33 = arith.constant 0 : index
    %c0_34 = arith.constant 0 : index
    %50 = vector.load %arg4[%c1_32, %c0_33, %c0_34] : memref<3x384x128xbf16, #tpu.memory_space<vmem>>, vector<1x384x128xbf16>
    %51 = vector.shape_cast %50 : vector<1x384x128xbf16> to vector<384x128xbf16>
    %cst_35 = arith.constant dense<0.000000e+00> : vector<128x128xf32>
    %52 = tpu.matmul %49, %51, %cst_35 {dimension_numbers = #tpu.dot_dimension_numbers<[1], [0], [0], [1], [0, 0, 1, 1], [], []>} : vector<128x384xbf16>, vector<384x128xbf16>, vector<128x128xf32> -> vector<128x128xf32>
    %53 = arith.addf %47, %52 : vector<128x128xf32>
    %c2 = arith.constant 2 : index
    %c0_36 = arith.constant 0 : index
    %c0_37 = arith.constant 0 : index
    %54 = vector.load %arg8[%c2, %c0_36, %c0_37] : memref<18x16x384xbf16, #tpu.memory_space<vmem>>, vector<8x16x384xbf16>
    %55 = vector.shape_cast %54 : vector<8x16x384xbf16> to vector<128x384xbf16>
    %c2_38 = arith.constant 2 : index
    %c0_39 = arith.constant 0 : index
    %c0_40 = arith.constant 0 : index
    %56 = vector.load %arg4[%c2_38, %c0_39, %c0_40] : memref<3x384x128xbf16, #tpu.memory_space<vmem>>, vector<1x384x128xbf16>
    %57 = vector.shape_cast %56 : vector<1x384x128xbf16> to vector<384x128xbf16>
    %cst_41 = arith.constant dense<0.000000e+00> : vector<128x128xf32>
    %58 = tpu.matmul %55, %57, %cst_41 {dimension_numbers = #tpu.dot_dimension_numbers<[1], [0], [0], [1], [0, 0, 1, 1], [], []>} : vector<128x384xbf16>, vector<384x128xbf16>, vector<128x128xf32> -> vector<128x128xf32>
    %59 = arith.addf %53, %58 : vector<128x128xf32>
    %60 = arith.truncf %59 : vector<128x128xf32> to vector<128x128xbf16>
    %c0_42 = arith.constant 0 : index
    %c0_43 = arith.constant 0 : index
    %61 = vector.load %arg5[%c0_42, %c0_43] : memref<256x128xbf16, #tpu.memory_space<vmem>>, vector<128x128xbf16>
    tpu.vector_store %arg5[%c0_42, %c0_43], %60 {strides = array<i32>} : memref<256x128xbf16, #tpu.memory_space<vmem>>, vector<128x128xbf16>,
    %cst_44 = arith.constant dense<0.000000e+00> : vector<128xf32>
    %62 = vector.multi_reduction <add>, %59, %cst_44 [0] : vector<128x128xf32> to vector<128xf32>
    %63 = vector.shape_cast %62 : vector<128xf32> to vector<1x128xf32>
    %64 = arith.addf %39, %63 : vector<1x128xf32>
    %65 = arith.mulf %59, %59 : vector<128x128xf32>
    %cst_45 = arith.constant dense<0.000000e+00> : vector<128xf32>
    %66 = vector.multi_reduction <add>, %65, %cst_45 [0] : vector<128x128xf32> to vector<128xf32>
    %67 = vector.shape_cast %66 : vector<128xf32> to vector<1x128xf32>
    %68 = arith.addf %40, %67 : vector<1x128xf32>
    %cst_46 = arith.constant 0.000000e+00 : f32
    %69 = vector.broadcast %cst_46 : f32 to vector<128x128xf32>
    %c8 = arith.constant 8 : index
    %c0_47 = arith.constant 0 : index
    %c0_48 = arith.constant 0 : index
    %70 = vector.load %arg8[%c8, %c0_47, %c0_48] : memref<18x16x384xbf16, #tpu.memory_space<vmem>>, vector<8x16x384xbf16>
    %71 = vector.shape_cast %70 : vector<8x16x384xbf16> to vector<128x384xbf16>
    %c0_49 = arith.constant 0 : index
    %c0_50 = arith.constant 0 : index
    %c0_51 = arith.constant 0 : index
    %72 = vector.load %arg4[%c0_49, %c0_50, %c0_51] : memref<3x384x128xbf16, #tpu.memory_space<vmem>>, vector<1x384x128xbf16>
    %73 = vector.shape_cast %72 : vector<1x384x128xbf16> to vector<384x128xbf16>
    %cst_52 = arith.constant dense<0.000000e+00> : vector<128x128xf32>
    %74 = tpu.matmul %71, %73, %cst_52 {dimension_numbers = #tpu.dot_dimension_numbers<[1], [0], [0], [1], [0, 0, 1, 1], [], []>} : vector<128x384xbf16>, vector<384x128xbf16>, vector<128x128xf32> -> vector<128x128xf32>
    %75 = arith.addf %69, %74 : vector<128x128xf32>
    %c9_53 = arith.constant 9 : index
    %c0_54 = arith.constant 0 : index
    %c0_55 = arith.constant 0 : index
    %76 = vector.load %arg8[%c9_53, %c0_54, %c0_55] : memref<18x16x384xbf16, #tpu.memory_space<vmem>>, vector<8x16x384xbf16>
    %77 = vector.shape_cast %76 : vector<8x16x384xbf16> to vector<128x384xbf16>
    %c1_56 = arith.constant 1 : index
    %c0_57 = arith.constant 0 : index
    %c0_58 = arith.constant 0 : index
    %78 = vector.load %arg4[%c1_56, %c0_57, %c0_58] : memref<3x384x128xbf16, #tpu.memory_space<vmem>>, vector<1x384x128xbf16>
    %79 = vector.shape_cast %78 : vector<1x384x128xbf16> to vector<384x128xbf16>
    %cst_59 = arith.constant dense<0.000000e+00> : vector<128x128xf32>
    %80 = tpu.matmul %77, %79, %cst_59 {dimension_numbers = #tpu.dot_dimension_numbers<[1], [0], [0], [1], [0, 0, 1, 1], [], []>} : vector<128x384xbf16>, vector<384x128xbf16>, vector<128x128xf32> -> vector<128x128xf32>
    %81 = arith.addf %75, %80 : vector<128x128xf32>
    %c10 = arith.constant 10 : index
    %c0_60 = arith.constant 0 : index
    %c0_61 = arith.constant 0 : index
    %82 = vector.load %arg8[%c10, %c0_60, %c0_61] : memref<18x16x384xbf16, #tpu.memory_space<vmem>>, vector<8x16x384xbf16>
    %83 = vector.shape_cast %82 : vector<8x16x384xbf16> to vector<128x384xbf16>
    %c2_62 = arith.constant 2 : index
    %c0_63 = arith.constant 0 : index
    %c0_64 = arith.constant 0 : index
    %84 = vector.load %arg4[%c2_62, %c0_63, %c0_64] : memref<3x384x128xbf16, #tpu.memory_space<vmem>>, vector<1x384x128xbf16>
    %85 = vector.shape_cast %84 : vector<1x384x128xbf16> to vector<384x128xbf16>
    %cst_65 = arith.constant dense<0.000000e+00> : vector<128x128xf32>
    %86 = tpu.matmul %83, %85, %cst_65 {dimension_numbers = #tpu.dot_dimension_numbers<[1], [0], [0], [1], [0, 0, 1, 1], [], []>} : vector<128x384xbf16>, vector<384x128xbf16>, vector<128x128xf32> -> vector<128x128xf32>
    %87 = arith.addf %81, %86 : vector<128x128xf32>
    %88 = arith.truncf %87 : vector<128x128xf32> to vector<128x128xbf16>
    %c128_66 = arith.constant 128 : index
    %c0_67 = arith.constant 0 : index
    %89 = vector.load %arg5[%c128_66, %c0_67] : memref<256x128xbf16, #tpu.memory_space<vmem>>, vector<128x128xbf16>
    tpu.vector_store %arg5[%c128_66, %c0_67], %88 {strides = array<i32>} : memref<256x128xbf16, #tpu.memory_space<vmem>>, vector<128x128xbf16>,
    %cst_68 = arith.constant dense<0.000000e+00> : vector<128xf32>
    %90 = vector.multi_reduction <add>, %87, %cst_68 [0] : vector<128x128xf32> to vector<128xf32>
    %91 = vector.shape_cast %90 : vector<128xf32> to vector<1x128xf32>
    %92 = arith.addf %64, %91 : vector<1x128xf32>
    %93 = arith.mulf %87, %87 : vector<128x128xf32>
    %cst_69 = arith.constant dense<0.000000e+00> : vector<128xf32>
    %94 = vector.multi_reduction <add>, %93, %cst_69 [0] : vector<128x128xf32> to vector<128xf32>
    %95 = vector.shape_cast %94 : vector<128xf32> to vector<1x128xf32>
    %96 = arith.addf %68, %95 : vector<1x128xf32>
    %97 = vector.shape_cast %92 : vector<1x128xf32> to vector<1x1x128xf32>
    %c0_70 = arith.constant 0 : index
    %c0_71 = arith.constant 0 : index
    %c0_72 = arith.constant 0 : index
    %98 = vector.load %arg6[%c0_70, %c0_71, %c0_72] : memref<1x1x128xf32, #tpu.memory_space<vmem>>, vector<1x1x128xf32>
    tpu.vector_store %arg6[%c0_70, %c0_71, %c0_72], %97 {strides = array<i32>} : memref<1x1x128xf32, #tpu.memory_space<vmem>>, vector<1x1x128xf32>,
    %99 = vector.shape_cast %96 : vector<1x128xf32> to vector<1x1x128xf32>
    %c0_73 = arith.constant 0 : index
    %c0_74 = arith.constant 0 : index
    %c0_75 = arith.constant 0 : index
    %100 = vector.load %arg7[%c0_73, %c0_74, %c0_75] : memref<1x1x128xf32, #tpu.memory_space<vmem>>, vector<1x1x128xf32>
    tpu.vector_store %arg7[%c0_73, %c0_74, %c0_75], %99 {strides = array<i32>} : memref<1x1x128xf32, #tpu.memory_space<vmem>>, vector<1x1x128xf32>,
    return
  }
  func.func @transform_0(%arg0: i32) -> (i32, i32) {
    %c0_i32 = arith.constant 0 : i32
    %c0_i32_0 = arith.constant 0 : i32
    return %arg0, %c0_i32 : i32, i32
  }
  func.func @transform_1(%arg0: i32) -> (i32, i32) {
    %c0_i32 = arith.constant 0 : i32
    %c0_i32_0 = arith.constant 0 : i32
    %c0_i32_1 = arith.constant 0 : i32
    return %c0_i32, %c0_i32_0 : i32, i32
  }
  func.func @transform_2(%arg0: i32) -> (i32, i32) {
    %c0_i32 = arith.constant 0 : i32
    %c0_i32_0 = arith.constant 0 : i32
    %c0_i32_1 = arith.constant 0 : i32
    return %c0_i32, %c0_i32_0 : i32, i32
  }
  func.func @transform_3(%arg0: i32) -> (i32, i32, i32) {
    %c0_i32 = arith.constant 0 : i32
    %c0_i32_0 = arith.constant 0 : i32
    %c0_i32_1 = arith.constant 0 : i32
    %c0_i32_2 = arith.constant 0 : i32
    return %c0_i32, %c0_i32_0, %c0_i32_1 : i32, i32, i32
  }
  func.func @transform_4(%arg0: i32) -> (i32, i32) {
    %c0_i32 = arith.constant 0 : i32
    %c0_i32_0 = arith.constant 0 : i32
    return %arg0, %c0_i32 : i32, i32
  }
  func.func @transform_5(%arg0: i32) -> (i32, i32, i32) {
    %c0_i32 = arith.constant 0 : i32
    %c0_i32_0 = arith.constant 0 : i32
    %c0_i32_1 = arith.constant 0 : i32
    return %arg0, %c0_i32, %c0_i32_0 : i32, i32, i32
  }
  func.func @transform_6(%arg0: i32) -> (i32, i32, i32) {
    %c0_i32 = arith.constant 0 : i32
    %c0_i32_0 = arith.constant 0 : i32
    %c0_i32_1 = arith.constant 0 : i32
    return %arg0, %c0_i32, %c0_i32_0 : i32, i32, i32
  }
}

module attributes {stable_mosaic.version = 11 : i64} {
  func.func @_bn_conv3_bn_residual_relu_kernel(%arg0: i32, %arg1: memref<512x128xbf16, #tpu.memory_space<vmem>>, %arg2: memref<512x128xbf16, #tpu.memory_space<vmem>>, %arg3: memref<1x128xf32, #tpu.memory_space<vmem>>, %arg4: memref<1x128xf32, #tpu.memory_space<vmem>>, %arg5: memref<128x128xbf16, #tpu.memory_space<vmem>>, %arg6: memref<1x128xf32, #tpu.memory_space<vmem>>, %arg7: memref<1x128xf32, #tpu.memory_space<vmem>>, %arg8: memref<512x128xf32, #tpu.memory_space<vmem>>) attributes {dimension_semantics = [#tpu.dimension_semantics<parallel>], iteration_bounds = array<i64: 1>, scalar_prefetch = 0 : i64, scratch_operands = 0 : i64, tpu.core_type = #tpu.core_type<tc>, window_params = [{transform_indices = @transform_0, window_bounds = array<i64: 512, 128>}, {transform_indices = @transform_1, window_bounds = array<i64: 512, 128>}, {pipeline_mode = #tpu.pipeline_mode<synchronous>, transform_indices = @transform_2, window_bounds = array<i64: 1, 128>}, {pipeline_mode = #tpu.pipeline_mode<synchronous>, transform_indices = @transform_3, window_bounds = array<i64: 1, 128>}, {pipeline_mode = #tpu.pipeline_mode<synchronous>, transform_indices = @transform_4, window_bounds = array<i64: 128, 128>}, {pipeline_mode = #tpu.pipeline_mode<synchronous>, transform_indices = @transform_5, window_bounds = array<i64: 1, 128>}, {pipeline_mode = #tpu.pipeline_mode<synchronous>, transform_indices = @transform_6, window_bounds = array<i64: 1, 128>}, {transform_indices = @transform_7, window_bounds = array<i64: 512, 128>}]} {
    %c0 = arith.constant 0 : index
    %c0_0 = arith.constant 0 : index
    %0 = vector.load %arg1[%c0, %c0_0] : memref<512x128xbf16, #tpu.memory_space<vmem>>, vector<512x128xbf16>
    %1 = arith.extf %0 : vector<512x128xbf16> to vector<512x128xf32>
    %c0_1 = arith.constant 0 : index
    %c0_2 = arith.constant 0 : index
    %2 = vector.load %arg3[%c0_1, %c0_2] : memref<1x128xf32, #tpu.memory_space<vmem>>, vector<1x128xf32>
    %3 = vector.broadcast %2 : vector<1x128xf32> to vector<512x128xf32>
    %4 = arith.mulf %1, %3 : vector<512x128xf32>
    %c0_3 = arith.constant 0 : index
    %c0_4 = arith.constant 0 : index
    %5 = vector.load %arg4[%c0_3, %c0_4] : memref<1x128xf32, #tpu.memory_space<vmem>>, vector<1x128xf32>
    %6 = vector.broadcast %5 : vector<1x128xf32> to vector<512x128xf32>
    %7 = arith.addf %4, %6 : vector<512x128xf32>
    %cst = arith.constant 0.000000e+00 : f32
    %8 = vector.broadcast %cst : f32 to vector<512x128xf32>
    %9 = arith.maximumf %7, %8 : vector<512x128xf32>
    %10 = arith.truncf %9 : vector<512x128xf32> to vector<512x128xbf16>
    %c0_5 = arith.constant 0 : index
    %c0_6 = arith.constant 0 : index
    %11 = vector.load %arg5[%c0_5, %c0_6] : memref<128x128xbf16, #tpu.memory_space<vmem>>, vector<128x128xbf16>
    %cst_7 = arith.constant dense<0.000000e+00> : vector<512x128xf32>
    %12 = tpu.matmul %10, %11, %cst_7 {dimension_numbers = #tpu.dot_dimension_numbers<[1], [0], [0], [1], [0, 0, 1, 1], [], []>} : vector<512x128xbf16>, vector<128x128xbf16>, vector<512x128xf32> -> vector<512x128xf32>
    %c0_8 = arith.constant 0 : index
    %c0_9 = arith.constant 0 : index
    %13 = vector.load %arg6[%c0_8, %c0_9] : memref<1x128xf32, #tpu.memory_space<vmem>>, vector<1x128xf32>
    %14 = vector.broadcast %13 : vector<1x128xf32> to vector<512x128xf32>
    %15 = arith.mulf %12, %14 : vector<512x128xf32>
    %c0_10 = arith.constant 0 : index
    %c0_11 = arith.constant 0 : index
    %16 = vector.load %arg7[%c0_10, %c0_11] : memref<1x128xf32, #tpu.memory_space<vmem>>, vector<1x128xf32>
    %17 = vector.broadcast %16 : vector<1x128xf32> to vector<512x128xf32>
    %18 = arith.addf %15, %17 : vector<512x128xf32>
    %c0_12 = arith.constant 0 : index
    %c0_13 = arith.constant 0 : index
    %19 = vector.load %arg2[%c0_12, %c0_13] : memref<512x128xbf16, #tpu.memory_space<vmem>>, vector<512x128xbf16>
    %20 = arith.extf %19 : vector<512x128xbf16> to vector<512x128xf32>
    %21 = arith.addf %18, %20 : vector<512x128xf32>
    %cst_14 = arith.constant 0.000000e+00 : f32
    %22 = vector.broadcast %cst_14 : f32 to vector<512x128xf32>
    %23 = arith.maximumf %21, %22 : vector<512x128xf32>
    %c0_15 = arith.constant 0 : index
    %c0_16 = arith.constant 0 : index
    %24 = vector.load %arg8[%c0_15, %c0_16] : memref<512x128xf32, #tpu.memory_space<vmem>>, vector<512x128xf32>
    tpu.vector_store %arg8[%c0_15, %c0_16], %23 {strides = array<i32>} : memref<512x128xf32, #tpu.memory_space<vmem>>, vector<512x128xf32>,
    return
  }
  func.func @transform_0(%arg0: i32) -> (i32, i32) {
    %c0_i32 = arith.constant 0 : i32
    %c0_i32_0 = arith.constant 0 : i32
    return %arg0, %c0_i32 : i32, i32
  }
  func.func @transform_1(%arg0: i32) -> (i32, i32) {
    %c0_i32 = arith.constant 0 : i32
    %c0_i32_0 = arith.constant 0 : i32
    return %arg0, %c0_i32 : i32, i32
  }
  func.func @transform_2(%arg0: i32) -> (i32, i32) {
    %c0_i32 = arith.constant 0 : i32
    %c0_i32_0 = arith.constant 0 : i32
    %c0_i32_1 = arith.constant 0 : i32
    return %c0_i32, %c0_i32_0 : i32, i32
  }
  func.func @transform_3(%arg0: i32) -> (i32, i32) {
    %c0_i32 = arith.constant 0 : i32
    %c0_i32_0 = arith.constant 0 : i32
    %c0_i32_1 = arith.constant 0 : i32
    return %c0_i32, %c0_i32_0 : i32, i32
  }
  func.func @transform_4(%arg0: i32) -> (i32, i32) {
    %c0_i32 = arith.constant 0 : i32
    %c0_i32_0 = arith.constant 0 : i32
    %c0_i32_1 = arith.constant 0 : i32
    return %c0_i32, %c0_i32_0 : i32, i32
  }
  func.func @transform_5(%arg0: i32) -> (i32, i32) {
    %c0_i32 = arith.constant 0 : i32
    %c0_i32_0 = arith.constant 0 : i32
    %c0_i32_1 = arith.constant 0 : i32
    return %c0_i32, %c0_i32_0 : i32, i32
  }
  func.func @transform_6(%arg0: i32) -> (i32, i32) {
    %c0_i32 = arith.constant 0 : i32
    %c0_i32_0 = arith.constant 0 : i32
    %c0_i32_1 = arith.constant 0 : i32
    return %c0_i32, %c0_i32_0 : i32, i32
  }
  func.func @transform_7(%arg0: i32) -> (i32, i32) {
    %c0_i32 = arith.constant 0 : i32
    %c0_i32_0 = arith.constant 0 : i32
    return %arg0, %c0_i32 : i32, i32
  }
}

</mosaic_0001>

<bundles_post_ra>
// kernel: bottleneck_forward.4
= control target key start
LH: loop header
LB: loop body
LE: loop exit
PB: predicated region body
PF: predicated region fallthrough
CT: control target
= control target key end

     0   :  { %s2134_s1 = inlined_call_operand.vmem [shape: bf16[128,128], index: 1, kind: input, shape index: {}]   ;;  %s2135_s0 = inlined_call_operand.vmem [shape: bf16[512,128], index: 0, kind: input, shape index: {}]   ;;  %s2136_s2 = inlined_call_operand.vmem [shape: bf16[512,128], index: 2, kind: output, shape index: {0}]   ;;  %s2137_s3 = inlined_call_operand.vmem [shape: f32[1,1,128], index: 3, kind: output, shape index: {1}]   ;;  %s2138_s4 = inlined_call_operand.vmem [shape: f32[1,1,128], index: 4, kind: output, shape index: {2}]  }
   0x1   :  { %v1655_v0 = vld [vmem:[%s2134_s1] sm:$0xff]   ;;  %v1656_v1 = vld [vmem:[%s2134_s1 + $0x8] sm:$0xff]   ;;  %v1657_v2 = vld [vmem:[%s2134_s1 + $0x10] sm:$0xff]  }
   0x2   :  { %1559 = vmatprep.subr.bf16.mxu0 %v1655_v0  ;;  %1639 = vmatprep.subr.bf16.mxu1 %v1655_v0  ;;  %v1658_v3 = vld [vmem:[%s2134_s1 + $0x18] sm:$0xff]   ;;  %v1663_v4 = vld [vmem:[%s2135_s0] sm:$0xff]   ;;  %v1660_v6 = vld [vmem:[%s2134_s1 + $0x28] sm:$0xff]  }
   0x3   :  { %1560 = vmatpush3.bf16.msra.mxu0 %v1655_v0  ;;  %1647 = vmatpush3.bf16.msra.mxu1 %v1655_v0  ;;  %v1659_v5 = vld [vmem:[%s2134_s1 + $0x20] sm:$0xff]   ;;  %v1661_v7 = vld [vmem:[%s2134_s1 + $0x30] sm:$0xff]   ;;  %v1662_v8 = vld [vmem:[%s2134_s1 + $0x38] sm:$0xff]  }
   0x4   :  { %1561 = vmatprep.subr.bf16.mxu0 %v1656_v1  ;;  %1640 = vmatprep.subr.bf16.mxu1 %v1656_v1  ;;  %v1679_v9 = vld [vmem:[%s2135_s0 + $0x80] sm:$0xff]   ;;  %v1664_v10 = vld [vmem:[%s2135_s0 + $0x8] sm:$0xff]   ;;  %v1665_v11 = vld [vmem:[%s2135_s0 + $0x10] sm:$0xff]  }
   0x5   :  { %1575 = vmatprep.mubr.bf16.mxu0 %v1663_v4  ;;  %1607 = vmatprep.mubr.bf16.mxu1 %v1679_v9  ;;  %v1680_v12 = vld [vmem:[%s2135_s0 + $0x88] sm:$0xff]   ;;  %v1681_v13 = vld [vmem:[%s2135_s0 + $0x90] sm:$0xff]   ;;  %v1666_v14 = vld [vmem:[%s2135_s0 + $0x18] sm:$0xff]  }
   0x6   :  { %v1667_v15 = vld [vmem:[%s2135_s0 + $0x20] sm:$0xff]   ;;  %v1682_v16 = vld [vmem:[%s2135_s0 + $0x98] sm:$0xff]   ;;  %v1668_v18 = vld [vmem:[%s2135_s0 + $0x28] sm:$0xff]  }
   0x7   :  { %1562 = vmatpush3.bf16.msra.mxu0 %v1656_v1  ;;  %1648 = vmatpush3.bf16.msra.mxu1 %v1656_v1  ;;  %v1683_v17 = vld [vmem:[%s2135_s0 + $0xa0] sm:$0xff]   ;;  %v1684_v19 = vld [vmem:[%s2135_s0 + $0xa8] sm:$0xff]   ;;  %v1669_v20 = vld [vmem:[%s2135_s0 + $0x30] sm:$0xff]  }
   0x8   :  { %1563 = vmatprep.subr.bf16.mxu0 %v1657_v2  ;;  %1641 = vmatprep.subr.bf16.mxu1 %v1657_v2  ;;  %v1685_v21 = vld [vmem:[%s2135_s0 + $0xb0] sm:$0xff]   ;;  %v1670_v22 = vld [vmem:[%s2135_s0 + $0x38] sm:$0xff]   ;;  %v1671_v24 = vld [vmem:[%s2135_s0 + $0x40] sm:$0xff]  }
   0x9   :  { %v1686_v23 = vld [vmem:[%s2135_s0 + $0xb8] sm:$0xff]   ;;  %v1687_v25 = vld [vmem:[%s2135_s0 + $0xc0] sm:$0xff]   ;;  %v1672_v26 = vld [vmem:[%s2135_s0 + $0x48] sm:$0xff]  }
   0xa   :  { %v1688_v27 = vld [vmem:[%s2135_s0 + $0xc8] sm:$0xff]   ;;  %v1673_v28 = vld [vmem:[%s2135_s0 + $0x50] sm:$0xff]   ;;  %v1674_v30 = vld [vmem:[%s2135_s0 + $0x58] sm:$0xff]  }
   0xb   :  { %1564 = vmatpush3.bf16.msra.mxu0 %v1657_v2  ;;  %1649 = vmatpush3.bf16.msra.mxu1 %v1657_v2  ;;  %v1689_v29 = vld [vmem:[%s2135_s0 + $0xd0] sm:$0xff]   ;;  %v1690_v31 = vld [vmem:[%s2135_s0 + $0xd8] sm:$0xff]   ;;  %v1675_v32 = vld [vmem:[%s2135_s0 + $0x60] sm:$0xff]  }
   0xc   :  { %1565 = vmatprep.subr.bf16.mxu0 %v1658_v3  ;;  %1642 = vmatprep.subr.bf16.mxu1 %v1658_v3  ;;  %v1691_v33 = vld [vmem:[%s2135_s0 + $0xe0] sm:$0xff]   ;;  %v1676_v34 = vld [vmem:[%s2135_s0 + $0x68] sm:$0xff]   ;;  %v1677_v36 = vld [vmem:[%s2135_s0 + $0x70] sm:$0xff]  }
   0xd   :  { %v1692_v35 = vld [vmem:[%s2135_s0 + $0xe8] sm:$0xff]   ;;  %v1693_v37 = vld [vmem:[%s2135_s0 + $0xf0] sm:$0xff]   ;;  %v1678_v38 = vld [vmem:[%s2135_s0 + $0x78] sm:$0xff]  }
   0xe   :  { %v1694_v39 = vld [vmem:[%s2135_s0 + $0xf8] sm:$0xff]  }
   0xf   :  { %1566 = vmatpush3.bf16.msra.mxu0 %v1658_v3  ;;  %1650 = vmatpush3.bf16.msra.mxu1 %v1658_v3 }
  0x10   :  { %1567 = vmatprep.subr.bf16.mxu0 %v1659_v5  ;;  %1643 = vmatprep.subr.bf16.mxu1 %v1659_v5 }
  0x13   :  { %1568 = vmatpush3.bf16.msra.mxu0 %v1659_v5  ;;  %1651 = vmatpush3.bf16.msra.mxu1 %v1659_v5 }
  0x14   :  { %1569 = vmatprep.subr.bf16.mxu0 %v1660_v6  ;;  %1644 = vmatprep.subr.bf16.mxu1 %v1660_v6 }
  0x17   :  { %1570 = vmatpush3.bf16.msra.mxu0 %v1660_v6  ;;  %1652 = vmatpush3.bf16.msra.mxu1 %v1660_v6 }
  0x18   :  { %1571 = vmatprep.subr.bf16.mxu0 %v1661_v7  ;;  %1645 = vmatprep.subr.bf16.mxu1 %v1661_v7 }
  0x1b   :  { %1572 = vmatpush3.bf16.msra.mxu0 %v1661_v7  ;;  %1653 = vmatpush3.bf16.msra.mxu1 %v1661_v7 }
  0x1c   :  { %1573 = vmatprep.subr.bf16.mxu0 %v1662_v8  ;;  %1646 = vmatprep.subr.bf16.mxu1 %v1662_v8 }
  0x1f   :  { %1574 = vmatpush3.bf16.msra.mxu0 %v1662_v8  ;;  %1654 = vmatpush3.bf16.msra.mxu1 %v1662_v8 }
  0x22   :  { %1576 = vmatmul.mubr.bf16.vlgmr.msra.gmra.mrb[0].mxu0 %v1664_v10  ;;  %1608 = vmatmul.mubr.bf16.vlgmr.msra.gmra.mrb[0].mxu1 %v1680_v12 }
  0x23   :  { %1579 = vmatprep.mubr.bf16.mxu0 %v1665_v11  ;;  %1611 = vmatprep.mubr.bf16.mxu1 %v1681_v13 }
  0x2a   :  { %1580 = vmatmul.mubr.bf16.gmra.mrb[4].mxu0 %v1666_v14  ;;  %1612 = vmatmul.mubr.bf16.gmra.mrb[4].mxu1 %v1682_v16 }
  0x2b   :  { %1583 = vmatprep.mubr.bf16.mxu0 %v1667_v15  ;;  %1615 = vmatprep.mubr.bf16.mxu1 %v1683_v17 }
  0x32   :  { %1584 = vmatmul.mubr.bf16.gmra.mrb[8].mxu0 %v1668_v18  ;;  %1616 = vmatmul.mubr.bf16.gmra.mrb[8].mxu1 %v1684_v19 }
  0x33   :  { %1587 = vmatprep.mubr.bf16.mxu0 %v1669_v20  ;;  %1619 = vmatprep.mubr.bf16.mxu1 %v1685_v21 }
  0x3a   :  { %1588 = vmatmul.mubr.bf16.gmra.mrb[12].mxu0 %v1670_v22  ;;  %1620 = vmatmul.mubr.bf16.gmra.mrb[12].mxu1 %v1686_v23 }
  0x3b   :  { %1591 = vmatprep.mubr.bf16.mxu0 %v1671_v24  ;;  %1623 = vmatprep.mubr.bf16.mxu1 %v1687_v25 }
  0x42   :  { %1592 = vmatmul.mubr.bf16.gmra.mrb[16].mxu0 %v1672_v26  ;;  %1624 = vmatmul.mubr.bf16.gmra.mrb[16].mxu1 %v1688_v27 }
  0x43   :  { %1595 = vmatprep.mubr.bf16.mxu0 %v1673_v28  ;;  %1627 = vmatprep.mubr.bf16.mxu1 %v1689_v29 }
  0x4a   :  { %1596 = vmatmul.mubr.bf16.gmra.mrb[20].mxu0 %v1674_v30  ;;  %1628 = vmatmul.mubr.bf16.gmra.mrb[20].mxu1 %v1690_v31 }
  0x4b   :  { %1599 = vmatprep.mubr.bf16.mxu0 %v1675_v32  ;;  %1631 = vmatprep.mubr.bf16.mxu1 %v1691_v33 }
  0x52   :  { %1600 = vmatmul.mubr.bf16.gmra.mrb[24].mxu0 %v1676_v34  ;;  %1632 = vmatmul.mubr.bf16.gmra.mrb[24].mxu1 %v1692_v35 }
  0x53   :  { %1603 = vmatprep.mubr.bf16.mxu0 %v1677_v36  ;;  %1635 = vmatprep.mubr.bf16.mxu1 %v1693_v37 }
  0x5a   :  { %1604 = vmatmul.mubr.bf16.gmra.mrb[28].mxu0 %v1678_v38  ;;  %1636 = vmatmul.mubr.bf16.gmra.mrb[28].mxu1 %v1694_v39 }
  0xf5   :  { %v1577_v40 = vpop.f32.mrb[0].mxu0  ;;  %v1840_v41 = vpop.f32.mrb[0].mxu1 }
  0xf6   :  { %v369_v42 = vpop.f32.mrb[1].mxu0  ;;  %v1842_v43 = vpop.f32.mrb[1].mxu1  ;;  %v1016_v55 = vmul.f32 %v1577_v40, %v1577_v40 }
  0xf7   :  { %v1578_v44 = vpop.f32.mrb[2].mxu0  ;;  %v1844_v45 = vpop.f32.mrb[2].mxu1  ;;  %v1014_v46 = vmul.f32 %v369_v42, %v369_v42 }
  0xf8   :  { %v1336_v47 = vpack.c.bf16 %v1578_v44, %v1577_v40  ;;  %v372_v48 = vpop.f32.mrb[3].mxu0  ;;  %v1416_v49 = vpack.c.bf16 %v1844_v45, %v1840_v41  ;;  %v1848_v50 = vpop.f32.mrb[3].mxu1  ;;  %v1017_v58 = vmul.f32 %v1578_v44, %v1578_v44 }
  0xf9   :  { %v1331_v51 = vpack.c.bf16 %v372_v48, %v369_v42  ;;  %v944_v52 = vadd.f32 %v372_v48, %v369_v42  ;;  %v1015_v53 = vmul.f32 %v372_v48, %v372_v48  ;;  %v1411_v54 = vpack.c.bf16 %v1848_v50, %v1842_v43 }
  0xfa   :  { %1488 = vst [vmem:[%s2136_s2 + $0x8] sm:$0xff] %v1336_v47   ;;  %1504 = vst [vmem:[%s2136_s2 + $0x88] sm:$0xff] %v1416_v49  }
  0xfb   :  { %1332 = vst [vmem:[%s2136_s2] sm:$0xff] %v1331_v51   ;;  %v945_v56 = vadd.f32 %v1577_v40, %v944_v52  ;;  %v1078_v57 = vadd.f32 %v1015_v53, %v1014_v46  ;;  %1503 = vst [vmem:[%s2136_s2 + $0x80] sm:$0xff] %v1411_v54  }
  0xfd   :  { %v1079_v59 = vadd.f32 %v1078_v57, %v1016_v55  ;;  %v1581_v60 = vpop.f32.mrb[4].mxu0  ;;  %v946_v61 = vadd.f32 %v1578_v44, %v945_v56  ;;  %v1864_v62 = vpop.f32.mrb[4].mxu1 }
  0xfe   :  { %v385_v63 = vpop.f32.mrb[5].mxu0  ;;  %v1866_v0 = vpop.f32.mrb[5].mxu1  ;;  %v1020_v15 = vmul.f32 %v1581_v60, %v1581_v60 }
  0xff   :  { %v947_v1 = vadd.f32 %v946_v61, %v385_v63  ;;  %v1018_v2 = vmul.f32 %v385_v63, %v385_v63  ;;  %v1080_v3 = vadd.f32 %v1079_v59, %v1017_v58  ;;  %v1582_v4 = vpop.f32.mrb[6].mxu0  ;;  %v1868_v5 = vpop.f32.mrb[6].mxu1 }
 0x100   :  { %v1346_v6 = vpack.c.bf16 %v1582_v4, %v1581_v60  ;;  %v388_v7 = vpop.f32.mrb[7].mxu0  ;;  %v1426_v8 = vpack.c.bf16 %v1868_v5, %v1864_v62  ;;  %v1872_v9 = vpop.f32.mrb[7].mxu1  ;;  %v1021_v18 = vmul.f32 %v1582_v4, %v1582_v4 }
 0x101   :  { %v1081_v10 = vadd.f32 %v1080_v3, %v1018_v2  ;;  %v1341_v11 = vpack.c.bf16 %v388_v7, %v385_v63  ;;  %v948_v12 = vadd.f32 %v947_v1, %v388_v7  ;;  %v1019_v13 = vmul.f32 %v388_v7, %v388_v7 }
 0x102   :  { %1490 = vst [vmem:[%s2136_s2 + $0x18] sm:$0xff] %v1346_v6   ;;  %1506 = vst [vmem:[%s2136_s2 + $0x98] sm:$0xff] %v1426_v8   ;;  %v1421_v14 = vpack.c.bf16 %v1872_v9, %v1866_v0 }
 0x103   :  { %1489 = vst [vmem:[%s2136_s2 + $0x10] sm:$0xff] %v1341_v11   ;;  %v949_v16 = vadd.f32 %v1581_v60, %v948_v12  ;;  %v1082_v17 = vadd.f32 %v1081_v10, %v1019_v13 }
 0x104   :  { %1505 = vst [vmem:[%s2136_s2 + $0x90] sm:$0xff] %v1421_v14  }
 0x105   :  { %v1083_v19 = vadd.f32 %v1082_v17, %v1020_v15  ;;  %v1585_v20 = vpop.f32.mrb[8].mxu0  ;;  %v950_v21 = vadd.f32 %v1582_v4, %v949_v16  ;;  %v1888_v22 = vpop.f32.mrb[8].mxu1 }
 0x106   :  { %v401_v23 = vpop.f32.mrb[9].mxu0  ;;  %v1890_v24 = vpop.f32.mrb[9].mxu1  ;;  %v1024_v39 = vmul.f32 %v1585_v20, %v1585_v20 }
 0x107   :  { %v951_v25 = vadd.f32 %v950_v21, %v401_v23  ;;  %v1022_v26 = vmul.f32 %v401_v23, %v401_v23  ;;  %v1084_v27 = vadd.f32 %v1083_v19, %v1021_v18  ;;  %v1586_v28 = vpop.f32.mrb[10].mxu0  ;;  %v1892_v29 = vpop.f32.mrb[10].mxu1 }
 0x108   :  { %v1356_v30 = vpack.c.bf16 %v1586_v28, %v1585_v20  ;;  %v404_v31 = vpop.f32.mrb[11].mxu0  ;;  %v1436_v32 = vpack.c.bf16 %v1892_v29, %v1888_v22  ;;  %v1896_v33 = vpop.f32.mrb[11].mxu1  ;;  %v1025_v44 = vmul.f32 %v1586_v28, %v1586_v28 }
 0x109   :  { %v1085_v34 = vadd.f32 %v1084_v27, %v1022_v26  ;;  %v1351_v35 = vpack.c.bf16 %v404_v31, %v401_v23  ;;  %v952_v36 = vadd.f32 %v951_v25, %v404_v31  ;;  %v1023_v37 = vmul.f32 %v404_v31, %v404_v31 }
 0x10a   :  { %1492 = vst [vmem:[%s2136_s2 + $0x28] sm:$0xff] %v1356_v30   ;;  %1508 = vst [vmem:[%s2136_s2 + $0xa8] sm:$0xff] %v1436_v32   ;;  %v1431_v38 = vpack.c.bf16 %v1896_v33, %v1890_v24 }
 0x10b   :  { %1491 = vst [vmem:[%s2136_s2 + $0x20] sm:$0xff] %v1351_v35   ;;  %v953_v40 = vadd.f32 %v1585_v20, %v952_v36  ;;  %v1086_v42 = vadd.f32 %v1085_v34, %v1023_v37 }
 0x10c   :  { %1507 = vst [vmem:[%s2136_s2 + $0xa0] sm:$0xff] %v1431_v38  }
 0x10d   :  { %v1087_v46 = vadd.f32 %v1086_v42, %v1024_v39  ;;  %v1589_v47 = vpop.f32.mrb[12].mxu0  ;;  %v954_v48 = vadd.f32 %v1586_v28, %v953_v40  ;;  %v1912_v49 = vpop.f32.mrb[12].mxu1 }
 0x10e   :  { %v417_v51 = vpop.f32.mrb[13].mxu0  ;;  %v1914_v52 = vpop.f32.mrb[13].mxu1  ;;  %v1028_v6 = vmul.f32 %v1589_v47, %v1589_v47 }
 0x10f   :  { %v955_v53 = vadd.f32 %v954_v48, %v417_v51  ;;  %v1026_v54 = vmul.f32 %v417_v51, %v417_v51  ;;  %v1088_v55 = vadd.f32 %v1087_v46, %v1025_v44  ;;  %v1590_v56 = vpop.f32.mrb[14].mxu0  ;;  %v1916_v57 = vpop.f32.mrb[14].mxu1 }
 0x110   :  { %v1366_v58 = vpack.c.bf16 %v1590_v56, %v1589_v47  ;;  %v420_v59 = vpop.f32.mrb[15].mxu0  ;;  %v1446_v60 = vpack.c.bf16 %v1916_v57, %v1912_v49  ;;  %v1920_v61 = vpop.f32.mrb[15].mxu1  ;;  %v1029_v10 = vmul.f32 %v1590_v56, %v1590_v56 }
 0x111   :  { %v1089_v63 = vadd.f32 %v1088_v55, %v1026_v54  ;;  %v1361_v1 = vpack.c.bf16 %v420_v59, %v417_v51  ;;  %v956_v2 = vadd.f32 %v955_v53, %v420_v59  ;;  %v1027_v3 = vmul.f32 %v420_v59, %v420_v59 }
 0x112   :  { %1494 = vst [vmem:[%s2136_s2 + $0x38] sm:$0xff] %v1366_v58   ;;  %1510 = vst [vmem:[%s2136_s2 + $0xb8] sm:$0xff] %v1446_v60   ;;  %v1441_v4 = vpack.c.bf16 %v1920_v61, %v1914_v52 }
 0x113   :  { %1493 = vst [vmem:[%s2136_s2 + $0x30] sm:$0xff] %v1361_v1   ;;  %v957_v7 = vadd.f32 %v1589_v47, %v956_v2  ;;  %v1090_v8 = vadd.f32 %v1089_v63, %v1027_v3 }
 0x114   :  { %1509 = vst [vmem:[%s2136_s2 + $0xb0] sm:$0xff] %v1441_v4  }
 0x115   :  { %v1091_v11 = vadd.f32 %v1090_v8, %v1028_v6  ;;  %v1593_v12 = vpop.f32.mrb[16].mxu0  ;;  %v958_v13 = vadd.f32 %v1590_v56, %v957_v7  ;;  %v1936_v14 = vpop.f32.mrb[16].mxu1 }
 0x116   :  { %v433_v15 = vpop.f32.mrb[17].mxu0  ;;  %v1938_v16 = vpop.f32.mrb[17].mxu1  ;;  %v1032_v35 = vmul.f32 %v1593_v12, %v1593_v12 }
 0x117   :  { %v959_v17 = vadd.f32 %v958_v13, %v433_v15  ;;  %v1030_v18 = vmul.f32 %v433_v15, %v433_v15  ;;  %v1092_v19 = vadd.f32 %v1091_v11, %v1029_v10  ;;  %v1594_v20 = vpop.f32.mrb[18].mxu0  ;;  %v1940_v21 = vpop.f32.mrb[18].mxu1 }
 0x118   :  { %v1376_v23 = vpack.c.bf16 %v1594_v20, %v1593_v12  ;;  %v436_v25 = vpop.f32.mrb[19].mxu0  ;;  %v1456_v26 = vpack.c.bf16 %v1940_v21, %v1936_v14  ;;  %v1944_v27 = vpop.f32.mrb[19].mxu1  ;;  %v1033_v38 = vmul.f32 %v1594_v20, %v1594_v20 }
 0x119   :  { %v1093_v28 = vadd.f32 %v1092_v19, %v1030_v18  ;;  %v1371_v30 = vpack.c.bf16 %v436_v25, %v433_v15  ;;  %v960_v31 = vadd.f32 %v959_v17, %v436_v25  ;;  %v1031_v32 = vmul.f32 %v436_v25, %v436_v25 }
 0x11a   :  { %1496 = vst [vmem:[%s2136_s2 + $0x48] sm:$0xff] %v1376_v23   ;;  %1512 = vst [vmem:[%s2136_s2 + $0xc8] sm:$0xff] %v1456_v26   ;;  %v1451_v34 = vpack.c.bf16 %v1944_v27, %v1938_v16 }
 0x11b   :  { %1495 = vst [vmem:[%s2136_s2 + $0x40] sm:$0xff] %v1371_v30   ;;  %v961_v36 = vadd.f32 %v1593_v12, %v960_v31  ;;  %v1094_v37 = vadd.f32 %v1093_v28, %v1031_v32 }
 0x11c   :  { %1511 = vst [vmem:[%s2136_s2 + $0xc0] sm:$0xff] %v1451_v34  }
 0x11d   :  { %v1095_v39 = vadd.f32 %v1094_v37, %v1032_v35  ;;  %v1597_v40 = vpop.f32.mrb[20].mxu0  ;;  %v962_v42 = vadd.f32 %v1594_v20, %v961_v36  ;;  %v1960_v44 = vpop.f32.mrb[20].mxu1 }
 0x11e   :  { %v449_v46 = vpop.f32.mrb[21].mxu0  ;;  %v1962_v47 = vpop.f32.mrb[21].mxu1  ;;  %v1036_v6 = vmul.f32 %v1597_v40, %v1597_v40 }
 0x11f   :  { %v963_v48 = vadd.f32 %v962_v42, %v449_v46  ;;  %v1034_v51 = vmul.f32 %v449_v46, %v449_v46  ;;  %v1096_v53 = vadd.f32 %v1095_v39, %v1033_v38  ;;  %v1598_v54 = vpop.f32.mrb[22].mxu0  ;;  %v1964_v55 = vpop.f32.mrb[22].mxu1 }
 0x120   :  { %v1386_v56 = vpack.c.bf16 %v1598_v54, %v1597_v40  ;;  %v452_v58 = vpop.f32.mrb[23].mxu0  ;;  %v1466_v59 = vpack.c.bf16 %v1964_v55, %v1960_v44  ;;  %v1968_v60 = vpop.f32.mrb[23].mxu1  ;;  %v1037_v10 = vmul.f32 %v1598_v54, %v1598_v54 }
 0x121   :  { %v1097_v63 = vadd.f32 %v1096_v53, %v1034_v51  ;;  %v1381_v1 = vpack.c.bf16 %v452_v58, %v449_v46  ;;  %v964_v2 = vadd.f32 %v963_v48, %v452_v58  ;;  %v1035_v3 = vmul.f32 %v452_v58, %v452_v58 }
 0x122   :  { %1498 = vst [vmem:[%s2136_s2 + $0x58] sm:$0xff] %v1386_v56   ;;  %1514 = vst [vmem:[%s2136_s2 + $0xd8] sm:$0xff] %v1466_v59   ;;  %v1461_v4 = vpack.c.bf16 %v1968_v60, %v1962_v47 }
 0x123   :  { %1497 = vst [vmem:[%s2136_s2 + $0x50] sm:$0xff] %v1381_v1   ;;  %v965_v7 = vadd.f32 %v1597_v40, %v964_v2  ;;  %v1098_v8 = vadd.f32 %v1097_v63, %v1035_v3 }
 0x124   :  { %1513 = vst [vmem:[%s2136_s2 + $0xd0] sm:$0xff] %v1461_v4  }
 0x125   :  { %v1099_v11 = vadd.f32 %v1098_v8, %v1036_v6  ;;  %v1601_v12 = vpop.f32.mrb[24].mxu0  ;;  %v966_v13 = vadd.f32 %v1598_v54, %v965_v7  ;;  %v1984_v15 = vpop.f32.mrb[24].mxu1 }
 0x126   :  { %v465_v17 = vpop.f32.mrb[25].mxu0  ;;  %v1986_v18 = vpop.f32.mrb[25].mxu1  ;;  %v1040_v39 = vmul.f32 %v1601_v12, %v1601_v12 }
 0x127   :  { %v967_v19 = vadd.f32 %v966_v13, %v465_v17  ;;  %v1038_v20 = vmul.f32 %v465_v17, %v465_v17  ;;  %v1100_v23 = vadd.f32 %v1099_v11, %v1037_v10  ;;  %v1602_v25 = vpop.f32.mrb[26].mxu0  ;;  %v1988_v26 = vpop.f32.mrb[26].mxu1 }
 0x128   :  { %v1396_v28 = vpack.c.bf16 %v1602_v25, %v1601_v12  ;;  %v468_v30 = vpop.f32.mrb[27].mxu0  ;;  %v1476_v31 = vpack.c.bf16 %v1988_v26, %v1984_v15  ;;  %v1992_v32 = vpop.f32.mrb[27].mxu1  ;;  %v1041_v46 = vmul.f32 %v1602_v25, %v1602_v25 }
 0x129   :  { %v1101_v34 = vadd.f32 %v1100_v23, %v1038_v20  ;;  %v1391_v35 = vpack.c.bf16 %v468_v30, %v465_v17  ;;  %v968_v36 = vadd.f32 %v967_v19, %v468_v30  ;;  %v1039_v37 = vmul.f32 %v468_v30, %v468_v30 }
 0x12a   :  { %1500 = vst [vmem:[%s2136_s2 + $0x68] sm:$0xff] %v1396_v28   ;;  %1516 = vst [vmem:[%s2136_s2 + $0xe8] sm:$0xff] %v1476_v31   ;;  %v1471_v38 = vpack.c.bf16 %v1992_v32, %v1986_v18  ;;  %v1046_v31 = vmul.f32 %v1842_v43, %v1842_v43 }
 0x12b   :  { %1499 = vst [vmem:[%s2136_s2 + $0x60] sm:$0xff] %v1391_v35   ;;  %v969_v40 = vadd.f32 %v1601_v12, %v968_v36  ;;  %v1102_v42 = vadd.f32 %v1101_v34, %v1039_v37 }
 0x12c   :  { %1515 = vst [vmem:[%s2136_s2 + $0xe0] sm:$0xff] %v1471_v38   ;;  %v1047_v38 = vmul.f32 %v1848_v50, %v1848_v50 }
 0x12d   :  { %v1103_v48 = vadd.f32 %v1102_v42, %v1040_v39  ;;  %v1605_v51 = vpop.f32.mrb[28].mxu0  ;;  %v970_v53 = vadd.f32 %v1602_v25, %v969_v40  ;;  %v2008_v54 = vpop.f32.mrb[28].mxu1  ;;  %v1048_v39 = vmul.f32 %v1840_v41, %v1840_v41 }
 0x12e   :  { %v481_v56 = vpop.f32.mrb[29].mxu0  ;;  %v2010_v58 = vpop.f32.mrb[29].mxu1  ;;  %v1044_v19 = vmul.f32 %v1605_v51, %v1605_v51 }
 0x12f   :  { %v971_v59 = vadd.f32 %v970_v53, %v481_v56  ;;  %v1042_v63 = vmul.f32 %v481_v56, %v481_v56  ;;  %v1104_v1 = vadd.f32 %v1103_v48, %v1041_v46  ;;  %v1606_v2 = vpop.f32.mrb[30].mxu0  ;;  %v2012_v3 = vpop.f32.mrb[30].mxu1  ;;  %v1049_v46 = vmul.f32 %v1844_v45, %v1844_v45 }
 0x130   :  { %v1406_v4 = vpack.c.bf16 %v1606_v2, %v1605_v51  ;;  %v484_v6 = vpop.f32.mrb[31].mxu0  ;;  %v1486_v7 = vpack.c.bf16 %v2012_v3, %v2008_v54  ;;  %v2016_v8 = vpop.f32.mrb[31].mxu1  ;;  %v1045_v25 = vmul.f32 %v1606_v2, %v1606_v2 }
 0x131   :  { %v1105_v10 = vadd.f32 %v1104_v1, %v1042_v63  ;;  %v1401_v11 = vpack.c.bf16 %v484_v6, %v481_v56  ;;  %v972_v12 = vadd.f32 %v971_v59, %v484_v6  ;;  %v1043_v13 = vmul.f32 %v484_v6, %v484_v6 }
 0x132   :  { %1502 = vst [vmem:[%s2136_s2 + $0x78] sm:$0xff] %v1406_v4   ;;  %1518 = vst [vmem:[%s2136_s2 + $0xf8] sm:$0xff] %v1486_v7   ;;  %v1481_v17 = vpack.c.bf16 %v2016_v8, %v2010_v58  ;;  %v1051_v63 = vmul.f32 %v1872_v9, %v1872_v9 }
 0x133   :  { %1501 = vst [vmem:[%s2136_s2 + $0x70] sm:$0xff] %v1401_v11   ;;  %v973_v20 = vadd.f32 %v1605_v51, %v972_v12  ;;  %v1106_v23 = vadd.f32 %v1105_v10, %v1043_v13  ;;  %v1055_v12 = vmul.f32 %v1896_v33, %v1896_v33 }
 0x134   :  { %1517 = vst [vmem:[%s2136_s2 + $0xf0] sm:$0xff] %v1481_v17  }
 0x135   :  { %v1107_v28 = vadd.f32 %v1106_v23, %v1044_v19  ;;  %v974_v30 = vadd.f32 %v1606_v2, %v973_v20 }
 0x137   :  { %v975_v34 = vadd.f32 %v974_v30, %v1842_v43  ;;  %v1108_v35 = vadd.f32 %v1107_v28, %v1045_v25  ;;  %v1050_v43 = vmul.f32 %v1866_v0, %v1866_v0  ;;  %v1059_v30 = vmul.f32 %v1920_v61, %v1920_v61 }
 0x139   :  { %v1109_v36 = vadd.f32 %v1108_v35, %v1046_v31  ;;  %v976_v37 = vadd.f32 %v975_v34, %v1848_v50 }
 0x13b   :  { %v977_v40 = vadd.f32 %v1840_v41, %v976_v37  ;;  %v1110_v42 = vadd.f32 %v1109_v36, %v1047_v38  ;;  %v1052_v41 = vmul.f32 %v1864_v62, %v1864_v62 }
 0x13d   :  { %v1111_v48 = vadd.f32 %v1110_v42, %v1048_v39  ;;  %v978_v51 = vadd.f32 %v1844_v45, %v977_v40  ;;  %v1053_v45 = vmul.f32 %v1868_v5, %v1868_v5  ;;  %v1063_v40 = vmul.f32 %v1944_v27, %v1944_v27 }
 0x13f   :  { %v979_v53 = vadd.f32 %v978_v51, %v1866_v0  ;;  %v1112_v56 = vadd.f32 %v1111_v48, %v1049_v46  ;;  %v1054_v0 = vmul.f32 %v1890_v24, %v1890_v24 }
 0x141   :  { %v1113_v59 = vadd.f32 %v1112_v56, %v1050_v43  ;;  %v980_v50 = vadd.f32 %v979_v53, %v1872_v9 }
 0x143   :  { %v981_v1 = vadd.f32 %v1864_v62, %v980_v50  ;;  %v1114_v2 = vadd.f32 %v1113_v59, %v1051_v63  ;;  %v1056_v62 = vmul.f32 %v1888_v22, %v1888_v22  ;;  %v1067_v59 = vmul.f32 %v1968_v60, %v1968_v60 }
 0x145   :  { %v1115_v4 = vadd.f32 %v1114_v2, %v1052_v41  ;;  %v982_v6 = vadd.f32 %v1868_v5, %v981_v1  ;;  %v1057_v5 = vmul.f32 %v1892_v29, %v1892_v29 }
 0x147   :  { %v983_v7 = vadd.f32 %v982_v6, %v1890_v24  ;;  %v1116_v10 = vadd.f32 %v1115_v4, %v1053_v45  ;;  %v1058_v24 = vmul.f32 %v1914_v52, %v1914_v52  ;;  %v1071_v6 = vmul.f32 %v1992_v32, %v1992_v32 }
 0x149   :  { %v1117_v11 = vadd.f32 %v1116_v10, %v1054_v0  ;;  %v984_v9 = vadd.f32 %v983_v7, %v1896_v33 }
 0x14b   :  { %v985_v13 = vadd.f32 %v1888_v22, %v984_v9  ;;  %v1118_v17 = vadd.f32 %v1117_v11, %v1055_v12  ;;  %v1060_v22 = vmul.f32 %v1912_v49, %v1912_v49 }
 0x14d   :  { %v1119_v19 = vadd.f32 %v1118_v17, %v1056_v62  ;;  %v986_v20 = vadd.f32 %v1892_v29, %v985_v13  ;;  %v1061_v29 = vmul.f32 %v1916_v57, %v1916_v57  ;;  %v1075_v13 = vmul.f32 %v2016_v8, %v2016_v8 }
 0x14f   :  { %v987_v23 = vadd.f32 %v986_v20, %v1914_v52  ;;  %v1120_v25 = vadd.f32 %v1119_v19, %v1057_v5  ;;  %v1062_v52 = vmul.f32 %v1938_v16, %v1938_v16 }
 0x151   :  { %v1121_v28 = vadd.f32 %v1120_v25, %v1058_v24  ;;  %v988_v33 = vadd.f32 %v987_v23, %v1920_v61 }
 0x153   :  { %v989_v31 = vadd.f32 %v1912_v49, %v988_v33  ;;  %v1122_v34 = vadd.f32 %v1121_v28, %v1059_v30  ;;  %v1064_v49 = vmul.f32 %v1936_v14, %v1936_v14 }
 0x155   :  { %v1123_v35 = vadd.f32 %v1122_v34, %v1060_v22  ;;  %v990_v36 = vadd.f32 %v1916_v57, %v989_v31  ;;  %v1065_v57 = vmul.f32 %v1940_v21, %v1940_v21 }
 0x157   :  { %v991_v37 = vadd.f32 %v990_v36, %v1938_v16  ;;  %v1124_v38 = vadd.f32 %v1123_v35, %v1061_v29  ;;  %v1066_v16 = vmul.f32 %v1962_v47, %v1962_v47 }
 0x159   :  { %v1125_v39 = vadd.f32 %v1124_v38, %v1062_v52  ;;  %v992_v61 = vadd.f32 %v991_v37, %v1944_v27 }
 0x15b   :  { %v993_v42 = vadd.f32 %v1936_v14, %v992_v61  ;;  %v1126_v46 = vadd.f32 %v1125_v39, %v1063_v40  ;;  %v1068_v14 = vmul.f32 %v1960_v44, %v1960_v44 }
 0x15d   :  { %v1127_v48 = vadd.f32 %v1126_v46, %v1064_v49  ;;  %v994_v51 = vadd.f32 %v1940_v21, %v993_v42  ;;  %v1069_v21 = vmul.f32 %v1964_v55, %v1964_v55 }
 0x15f   :  { %v995_v43 = vadd.f32 %v994_v51, %v1962_v47  ;;  %v1128_v53 = vadd.f32 %v1127_v48, %v1065_v57  ;;  %v1070_v47 = vmul.f32 %v1986_v18, %v1986_v18 }
 0x161   :  { %v1129_v56 = vadd.f32 %v1128_v53, %v1066_v16  ;;  %v996_v27 = vadd.f32 %v995_v43, %v1968_v60 }
 0x163   :  { %v997_v50 = vadd.f32 %v1960_v44, %v996_v27  ;;  %v1130_v63 = vadd.f32 %v1129_v56, %v1067_v59  ;;  %v1072_v44 = vmul.f32 %v1984_v15, %v1984_v15 }
 0x165   :  { %v1131_v41 = vadd.f32 %v1130_v63, %v1068_v14  ;;  %v998_v1 = vadd.f32 %v1964_v55, %v997_v50  ;;  %v1073_v55 = vmul.f32 %v1988_v26, %v1988_v26 }
 0x167   :  { %v999_v2 = vadd.f32 %v998_v1, %v1986_v18  ;;  %v1132_v45 = vadd.f32 %v1131_v41, %v1069_v21  ;;  %v1074_v18 = vmul.f32 %v2010_v58, %v2010_v58 }
 0x169   :  { %v1133_v4 = vadd.f32 %v1132_v45, %v1070_v47  ;;  %v1000_v60 = vadd.f32 %v999_v2, %v1992_v32 }
 0x16b   :  { %v1001_v0 = vadd.f32 %v1984_v15, %v1000_v60  ;;  %v1134_v7 = vadd.f32 %v1133_v4, %v1071_v6  ;;  %v1076_v15 = vmul.f32 %v2008_v54, %v2008_v54 }
 0x16d   :  { %v1135_v10 = vadd.f32 %v1134_v7, %v1072_v44  ;;  %v1002_v11 = vadd.f32 %v1988_v26, %v1001_v0  ;;  %v1077_v26 = vmul.f32 %v2012_v3, %v2012_v3 }
 0x16f   :  { %v1003_v9 = vadd.f32 %v1002_v11, %v2010_v58  ;;  %v1136_v12 = vadd.f32 %v1135_v10, %v1073_v55 }
 0x171   :  { %v1137_v62 = vadd.f32 %v1136_v12, %v1074_v18  ;;  %v1004_v32 = vadd.f32 %v1003_v9, %v2016_v8 }
 0x173   :  { %v1005_v17 = vadd.f32 %v2008_v54, %v1004_v32  ;;  %v1138_v5 = vadd.f32 %v1137_v62, %v1075_v13 }
 0x175   :  { %v1006_v19 = vadd.f32 %v2012_v3, %v1005_v17  ;;  %v1139_v20 = vadd.f32 %v1138_v5, %v1076_v15 }
 0x177   :  { %v1007_v58 = vrot.slane %v1006_v19, 4  ;;  %v1140_v24 = vadd.f32 %v1139_v20, %v1077_v26 }
 0x179   :  { %v1008_v23 = vadd.f32 %v1007_v58, %v1006_v19  ;;  %v1141_v25 = vrot.slane %v1140_v24, 4 }
 0x17b   :  { %v1009_v28 = vrot.slane %v1008_v23, 2  ;;  %v1142_v33 = vadd.f32 %v1141_v25, %v1140_v24 }
 0x17d   :  { %v1010_v30 = vadd.f32 %v1009_v28, %v1008_v23  ;;  %v1143_v8 = vrot.slane %v1142_v33, 2 }
 0x17f   :  { %v1011_v22 = vrot.slane %v1010_v30, 1  ;;  %v1144_v31 = vadd.f32 %v1143_v8, %v1142_v33 }
 0x181   :  { %v1012_v34 = vadd.f32 %v1011_v22, %v1010_v30  ;;  %v1145_v29 = vrot.slane %v1144_v31, 1 }
 0x183   :  { %1013 = vst [vmem:[%s2137_s3] sm:$0x1] %v1012_v34  ;;  %v1146_v54 = vadd.f32 %v1145_v29, %v1144_v31 }
 0x185   :  { %1147 = vst [vmem:[%s2138_s4] sm:$0x1] %v1146_v54 }

// kernel: bottleneck_forward.7
= control target key start
LH: loop header
LB: loop body
LE: loop exit
PB: predicated region body
PF: predicated region fallthrough
CT: control target
= control target key end

     0   :  { %s2675_s4 = inlined_call_operand.vmem [shape: bf16[128,128], index: 4, kind: input, shape index: {}]   ;;  %s2676_s0 = inlined_call_operand.vmem [shape: bf16[512,128], index: 0, kind: input, shape index: {}]   ;;  %s2677_s2 = inlined_call_operand.vmem [shape: f32[1,128], index: 2, kind: input, shape index: {}]   ;;  %s2678_s3 = inlined_call_operand.vmem [shape: f32[1,128], index: 3, kind: input, shape index: {}]   ;;  %s2679_s1 = inlined_call_operand.vmem [shape: bf16[512,128], index: 1, kind: input, shape index: {}]   ;;  %s2680_s5 = inlined_call_operand.vmem [shape: f32[1,128], index: 5, kind: input, shape index: {}]   ;;  %s2681_s6 = inlined_call_operand.vmem [shape: f32[1,128], index: 6, kind: input, shape index: {}]   ;;  %s2682_s7 = inlined_call_operand.vmem [shape: f32[512,128], index: 7, kind: output, shape index: {}]  }
   0x1   :  { %v1678_v0 = vld [vmem:[%s2675_s4] sm:$0xff]   ;;  %v1679_v1 = vld [vmem:[%s2675_s4 + $0x8] sm:$0xff]   ;;  %v1680_v2 = vld [vmem:[%s2675_s4 + $0x10] sm:$0xff]  }
   0x2   :  { %1582 = vmatprep.subr.bf16.mxu0 %v1678_v0  ;;  %1662 = vmatprep.subr.bf16.mxu1 %v1678_v0  ;;  %v1681_v3 = vld [vmem:[%s2675_s4 + $0x18] sm:$0xff]   ;;  %v1225_v4 = vld [vmem:[%s2676_s0] sm:$0xff]   ;;  %v1480_v9 = vld [vmem:[%s2676_s0 + $0x8] sm:$0xff]  }
   0x3   :  { %1583 = vmatpush3.bf16.msra.mxu0 %v1678_v0  ;;  %1670 = vmatpush3.bf16.msra.mxu1 %v1678_v0  ;;  %v1744_v5 = vld [vmem:[%s2677_s2] ss:$0 sm:$0xff]  ;;  %v1226_v6 = vunpack.c.l.bf16 %v1225_v4  ;;  %v1227_v7 = vunpack.c.h.bf16 %v1225_v4  ;;  %v1496_v10 = vld [vmem:[%s2676_s0 + $0x88] sm:$0xff]   ;;  %v1230_v14 = vunpack.c.l.bf16 %v1480_v9  ;;  %v1231_v15 = vunpack.c.h.bf16 %v1480_v9  ;;  %v1481_v16 = vld [vmem:[%s2676_s0 + $0x10] sm:$0xff]  }
   0x4   :  { %1584 = vmatprep.subr.bf16.mxu0 %v1679_v1  ;;  %1663 = vmatprep.subr.bf16.mxu1 %v1679_v1  ;;  %v1495_v8 = vld [vmem:[%s2676_s0 + $0x80] sm:$0xff]   ;;  %v1294_v19 = vunpack.c.l.bf16 %v1496_v10  ;;  %v1295_v20 = vunpack.c.h.bf16 %v1496_v10  ;;  %v1234_v25 = vunpack.c.l.bf16 %v1481_v16  ;;  %v1497_v38 = vld [vmem:[%s2676_s0 + $0x90] sm:$0xff]   ;;  %v1683_v39 = vld [vmem:[%s2675_s4 + $0x28] sm:$0xff]   ;;  %v1235_v48 = vunpack.c.h.bf16 %v1481_v16 }
   0x5   :  { %v1758_v11 = vld [vmem:[%s2678_s3] ss:$0 sm:$0xff]  ;;  %v1290_v12 = vunpack.c.l.bf16 %v1495_v8  ;;  %v1291_v13 = vunpack.c.h.bf16 %v1495_v8  ;;  %v162_v17 = vmul.f32 %v1226_v6, %v1744_v5  ;;  %v163_v18 = vmul.f32 %v1227_v7, %v1744_v5  ;;  %v1482_v44 = vld [vmem:[%s2676_s0 + $0x18] sm:$0xff]   ;;  %v1684_v58 = vld [vmem:[%s2675_s4 + $0x30] sm:$0xff]  }
   0x6   :  { %v1682_v21 = vld [vmem:[%s2675_s4 + $0x20] sm:$0xff]   ;;  %v164_v24 = vmul.f32 %v1230_v14, %v1744_v5  ;;  %v165_v28 = vmul.f32 %v1231_v15, %v1744_v5  ;;  %v196_v29 = vmul.f32 %v1294_v19, %v1744_v5  ;;  %v197_v33 = vmul.f32 %v1295_v20, %v1744_v5  ;;  %v1498_v53 = vld [vmem:[%s2676_s0 + $0x98] sm:$0xff]  }
   0x7   :  { %1585 = vmatpush3.bf16.msra.mxu0 %v1679_v1  ;;  %1671 = vmatpush3.bf16.msra.mxu1 %v1679_v1  ;;  %v194_v22 = vmul.f32 %v1290_v12, %v1744_v5  ;;  %v195_v23 = vmul.f32 %v1291_v13, %v1744_v5  ;;  %v233_v26 = vadd.f32 %v1758_v11, %v162_v17  ;;  %v1298_v52 = vunpack.c.l.bf16 %v1497_v38  ;;  %v1685_v14 = vld [vmem:[%s2675_s4 + $0x38] sm:$0xff]   ;;  %v1499_v19 = vld [vmem:[%s2676_s0 + $0xa0] sm:$0xff]  }
   0x8   :  { %1586 = vmatprep.subr.bf16.mxu0 %v1680_v2  ;;  %1664 = vmatprep.subr.bf16.mxu1 %v1680_v2  ;;  %v234_v27 = vadd.f32 %v1758_v11, %v163_v18  ;;  %v235_v32 = vadd.f32 %v1758_v11, %v164_v24  ;;  %v236_v36 = vadd.f32 %v1758_v11, %v165_v28  ;;  %v1299_v56 = vunpack.c.h.bf16 %v1497_v38  ;;  %v1484_v28 = vld [vmem:[%s2676_s0 + $0x28] sm:$0xff]  }
   0x9   :  { %v265_v30 = vadd.f32 %v1758_v11, %v194_v22  ;;  %v266_v31 = vadd.f32 %v1758_v11, %v195_v23  ;;  %v297_v34 = vmax.f32 %v233_v26, 0.0  ;;  %v267_v37 = vadd.f32 %v1758_v11, %v196_v29 }
   0xa   :  { %v298_v35 = vmax.f32 %v234_v27, 0.0  ;;  %v299_v42 = vmax.f32 %v235_v32, 0.0  ;;  %v268_v43 = vadd.f32 %v1758_v11, %v197_v33  ;;  %v300_v46 = vmax.f32 %v236_v36, 0.0  ;;  %v1500_v33 = vld [vmem:[%s2676_s0 + $0xa8] sm:$0xff]  }
   0xb   :  { %1587 = vmatpush3.bf16.msra.mxu0 %v1680_v2  ;;  %1672 = vmatpush3.bf16.msra.mxu1 %v1680_v2  ;;  %v329_v40 = vmax.f32 %v265_v30, 0.0  ;;  %v330_v41 = vmax.f32 %v266_v31, 0.0  ;;  %v331_v47 = vmax.f32 %v267_v37, 0.0  ;;  %v166_v51 = vmul.f32 %v1234_v25, %v1744_v5 }
   0xc   :  { %1588 = vmatprep.subr.bf16.mxu0 %v1681_v3  ;;  %1665 = vmatprep.subr.bf16.mxu1 %v1681_v3  ;;  %v361_v45 = vpack.c.bf16 %v298_v35, %v297_v34  ;;  %v332_v50 = vmax.f32 %v268_v43, 0.0  ;;  %v1795_v54 = vpack.c.bf16 %v300_v46, %v299_v42  ;;  %v167_v55 = vmul.f32 %v1235_v48, %v1744_v5  ;;  %v1485_v42 = vld [vmem:[%s2676_s0 + $0x30] sm:$0xff]  }
   0xd   :  { %v377_v49 = vpack.c.bf16 %v330_v41, %v329_v40  ;;  %v1238_v57 = vunpack.c.l.bf16 %v1482_v44  ;;  %v237_v60 = vadd.f32 %v1758_v11, %v166_v51  ;;  %v198_v61 = vmul.f32 %v1298_v52, %v1744_v5 }
   0xe   :  { %v1801_v59 = vpack.c.bf16 %v332_v50, %v331_v47  ;;  %v1239_v62 = vunpack.c.h.bf16 %v1482_v44  ;;  %1598 = vmatprep.mubr.bf16.mxu0 %v361_v45  ;;  %v238_v63 = vadd.f32 %v1758_v11, %v167_v55  ;;  %v199_v0 = vmul.f32 %v1299_v56, %v1744_v5 }
   0xf   :  { %1589 = vmatpush3.bf16.msra.mxu0 %v1681_v3  ;;  %1673 = vmatpush3.bf16.msra.mxu1 %v1681_v3  ;;  %v168_v1 = vmul.f32 %v1238_v57, %v1744_v5  ;;  %v1302_v2 = vunpack.c.l.bf16 %v1498_v53  ;;  %v1483_v3 = vld [vmem:[%s2676_s0 + $0x20] sm:$0xff]   ;;  %v301_v4 = vmax.f32 %v237_v60, 0.0  ;;  %v269_v6 = vadd.f32 %v1758_v11, %v198_v61  ;;  %v1501_v61 = vld [vmem:[%s2676_s0 + $0xb0] sm:$0xff]  }
  0x10   :  { %1590 = vmatprep.subr.bf16.mxu0 %v1682_v21  ;;  %1666 = vmatprep.subr.bf16.mxu1 %v1682_v21  ;;  %v169_v7 = vmul.f32 %v1239_v62, %v1744_v5  ;;  %v1303_v8 = vunpack.c.h.bf16 %v1498_v53  ;;  %v302_v9 = vmax.f32 %v238_v63, 0.0  ;;  %v270_v10 = vadd.f32 %v1758_v11, %v199_v0 }
  0x11   :  { %1630 = vmatprep.mubr.bf16.mxu1 %v377_v49  ;;  %v239_v12 = vadd.f32 %v1758_v11, %v168_v1  ;;  %v200_v13 = vmul.f32 %v1302_v2, %v1744_v5  ;;  %v333_v15 = vmax.f32 %v269_v6, 0.0  ;;  %v1242_v18 = vunpack.c.l.bf16 %v1483_v3  ;;  %v1486_v2 = vld [vmem:[%s2676_s0 + $0x38] sm:$0xff]  }
  0x12   :  { %v240_v16 = vadd.f32 %v1758_v11, %v169_v7  ;;  %v201_v17 = vmul.f32 %v1303_v8, %v1744_v5  ;;  %v363_v20 = vpack.c.bf16 %v302_v9, %v301_v4  ;;  %v1243_v26 = vunpack.c.h.bf16 %v1483_v3 }
  0x13   :  { %1591 = vmatpush3.bf16.msra.mxu0 %v1682_v21  ;;  %1674 = vmatpush3.bf16.msra.mxu1 %v1682_v21  ;;  %v334_v21 = vmax.f32 %v270_v10, 0.0  ;;  %v303_v22 = vmax.f32 %v239_v12, 0.0  ;;  %v271_v23 = vadd.f32 %v1758_v11, %v200_v13  ;;  %v170_v27 = vmul.f32 %v1242_v18, %v1744_v5 }
  0x14   :  { %1592 = vmatprep.subr.bf16.mxu0 %v1683_v39  ;;  %1667 = vmatprep.subr.bf16.mxu1 %v1683_v39  ;;  %v304_v24 = vmax.f32 %v240_v16, 0.0  ;;  %v272_v25 = vadd.f32 %v1758_v11, %v201_v17  ;;  %v1306_v31 = vunpack.c.l.bf16 %v1499_v19  ;;  %v1307_v32 = vunpack.c.h.bf16 %v1499_v19 }
  0x15   :  { %v379_v29 = vpack.c.bf16 %v334_v21, %v333_v15  ;;  %v335_v30 = vmax.f32 %v271_v23, 0.0  ;;  %v171_v36 = vmul.f32 %v1243_v26, %v1744_v5  ;;  %v241_v37 = vadd.f32 %v1758_v11, %v170_v27  ;;  %v1502_v15 = vld [vmem:[%s2676_s0 + $0xb8] sm:$0xff]  }
  0x16   :  { %v1833_v34 = vpack.c.bf16 %v304_v24, %v303_v22  ;;  %v336_v35 = vmax.f32 %v272_v25, 0.0  ;;  %v202_v38 = vmul.f32 %v1306_v31, %v1744_v5  ;;  %v1246_v40 = vunpack.c.l.bf16 %v1484_v28 }
  0x17   :  { %1593 = vmatpush3.bf16.msra.mxu0 %v1683_v39  ;;  %1675 = vmatpush3.bf16.msra.mxu1 %v1683_v39  ;;  %v203_v39 = vmul.f32 %v1307_v32, %v1744_v5  ;;  %v1247_v41 = vunpack.c.h.bf16 %v1484_v28  ;;  %v242_v44 = vadd.f32 %v1758_v11, %v171_v36  ;;  %v305_v45 = vmax.f32 %v241_v37, 0.0 }
  0x18   :  { %1594 = vmatprep.subr.bf16.mxu0 %v1684_v58  ;;  %1668 = vmatprep.subr.bf16.mxu1 %v1684_v58  ;;  %v380_v43 = vpack.c.bf16 %v336_v35, %v335_v30  ;;  %v1310_v46 = vunpack.c.l.bf16 %v1500_v33  ;;  %v273_v47 = vadd.f32 %v1758_v11, %v202_v38  ;;  %v172_v49 = vmul.f32 %v1246_v40, %v1744_v5 }
  0x19   :  { %v274_v48 = vadd.f32 %v1758_v11, %v203_v39  ;;  %v1311_v50 = vunpack.c.h.bf16 %v1500_v33  ;;  %v306_v51 = vmax.f32 %v242_v44, 0.0  ;;  %v173_v52 = vmul.f32 %v1247_v41, %v1744_v5  ;;  %v1503_v33 = vld [vmem:[%s2676_s0 + $0xc0] sm:$0xff]  }
  0x1a   :  { %v204_v53 = vmul.f32 %v1310_v46, %v1744_v5  ;;  %v1250_v55 = vunpack.c.l.bf16 %v1485_v42  ;;  %v337_v56 = vmax.f32 %v273_v47, 0.0  ;;  %v1251_v1 = vunpack.c.h.bf16 %v1485_v42 }
  0x1b   :  { %1595 = vmatpush3.bf16.msra.mxu0 %v1684_v58  ;;  %1676 = vmatpush3.bf16.msra.mxu1 %v1684_v58  ;;  %v338_v57 = vmax.f32 %v274_v48, 0.0  ;;  %v243_v58 = vadd.f32 %v1758_v11, %v172_v49  ;;  %v205_v60 = vmul.f32 %v1311_v50, %v1744_v5  ;;  %v365_v62 = vpack.c.bf16 %v306_v51, %v305_v45  ;;  %v1504_v51 = vld [vmem:[%s2676_s0 + $0xc8] sm:$0xff]  }
  0x1c   :  { %1596 = vmatprep.subr.bf16.mxu0 %v1685_v14  ;;  %1669 = vmatprep.subr.bf16.mxu1 %v1685_v14  ;;  %v244_v63 = vadd.f32 %v1758_v11, %v173_v52  ;;  %v275_v0 = vadd.f32 %v1758_v11, %v204_v53  ;;  %v175_v8 = vmul.f32 %v1251_v1, %v1744_v5  ;;  %v1314_v9 = vunpack.c.l.bf16 %v1501_v61 }
  0x1d   :  { %v381_v3 = vpack.c.bf16 %v338_v57, %v337_v56  ;;  %v307_v4 = vmax.f32 %v243_v58, 0.0  ;;  %v276_v6 = vadd.f32 %v1758_v11, %v205_v60  ;;  %v1315_v13 = vunpack.c.h.bf16 %v1501_v61 }
  0x1e   :  { %v308_v7 = vmax.f32 %v244_v63, 0.0  ;;  %v246_v17 = vadd.f32 %v1758_v11, %v175_v8  ;;  %v206_v18 = vmul.f32 %v1314_v9, %v1744_v5  ;;  %v1255_v19 = vunpack.c.h.bf16 %v1486_v2 }
  0x1f   :  { %1597 = vmatpush3.bf16.msra.mxu0 %v1685_v14  ;;  %1677 = vmatpush3.bf16.msra.mxu1 %v1685_v14  ;;  %v340_v10 = vmax.f32 %v276_v6, 0.0  ;;  %v1254_v14 = vunpack.c.l.bf16 %v1486_v2  ;;  %v207_v23 = vmul.f32 %v1315_v13, %v1744_v5  ;;  %v1318_v28 = vunpack.c.l.bf16 %v1502_v15  ;;  %v1489_v2 = vld [vmem:[%s2676_s0 + $0x50] sm:$0xff]  }
  0x20   :  { %v366_v16 = vpack.c.bf16 %v308_v7, %v307_v4  ;;  %v310_v25 = vmax.f32 %v246_v17, 0.0  ;;  %v277_v26 = vadd.f32 %v1758_v11, %v206_v18  ;;  %v177_v27 = vmul.f32 %v1255_v19, %v1744_v5 }
  0x21   :  { %v176_v24 = vmul.f32 %v1254_v14, %v1744_v5  ;;  %v1319_v31 = vunpack.c.h.bf16 %v1502_v15  ;;  %v208_v38 = vmul.f32 %v1318_v28, %v1744_v5  ;;  %v1323_v50 = vunpack.c.h.bf16 %v1503_v33 }
  0x22   :  { %1599 = vmatmul.mubr.bf16.vlgmr.msra.gmra.mrb[0].mxu0 %v1795_v54  ;;  %1631 = vmatmul.mubr.bf16.vlgmr.msra.gmra.mrb[0].mxu1 %v1801_v59  ;;  %v174_v54 = vmul.f32 %v1250_v55, %v1744_v5  ;;  %v339_v59 = vmax.f32 %v275_v0, 0.0  ;;  %v341_v36 = vmax.f32 %v277_v26, 0.0  ;;  %v248_v37 = vadd.f32 %v1758_v11, %v177_v27 }
  0x23   :  { %1602 = vmatprep.mubr.bf16.mxu0 %v363_v20  ;;  %1634 = vmatprep.mubr.bf16.mxu1 %v379_v29  ;;  %v1487_v20 = vld [vmem:[%s2676_s0 + $0x40] sm:$0xff]   ;;  %v278_v29 = vadd.f32 %v1758_v11, %v207_v23  ;;  %v247_v30 = vadd.f32 %v1758_v11, %v176_v24  ;;  %v209_v41 = vmul.f32 %v1319_v31, %v1744_v5  ;;  %v1326_v1 = vunpack.c.l.bf16 %v1504_v51 }
  0x24   :  { %v245_v12 = vadd.f32 %v1758_v11, %v174_v54  ;;  %v382_v21 = vpack.c.bf16 %v340_v10, %v339_v59  ;;  %v1258_v32 = vunpack.c.l.bf16 %v1487_v20  ;;  %v1259_v42 = vunpack.c.h.bf16 %v1487_v20  ;;  %v1505_v10 = vld [vmem:[%s2676_s0 + $0xd0] sm:$0xff]   ;;  %v1490_v20 = vld [vmem:[%s2676_s0 + $0x58] sm:$0xff]  }
  0x25   :  { %v342_v39 = vmax.f32 %v278_v29, 0.0  ;;  %v311_v40 = vmax.f32 %v247_v30, 0.0  ;;  %v312_v44 = vmax.f32 %v248_v37, 0.0  ;;  %v279_v45 = vadd.f32 %v1758_v11, %v208_v38 }
  0x26   :  { %v309_v22 = vmax.f32 %v245_v12, 0.0  ;;  %v178_v46 = vmul.f32 %v1258_v32, %v1744_v5  ;;  %v280_v48 = vadd.f32 %v1758_v11, %v209_v41  ;;  %v179_v49 = vmul.f32 %v1259_v42, %v1744_v5 }
  0x27   :  { %v383_v47 = vpack.c.bf16 %v342_v39, %v341_v36  ;;  %v368_v52 = vpack.c.bf16 %v312_v44, %v311_v40  ;;  %v343_v53 = vmax.f32 %v279_v45, 0.0  ;;  %v211_v60 = vmul.f32 %v1323_v50, %v1744_v5  ;;  %v1491_v44 = vld [vmem:[%s2676_s0 + $0x60] sm:$0xff]  }
  0x28   :  { %v367_v35 = vpack.c.bf16 %v310_v25, %v309_v22  ;;  %v249_v55 = vadd.f32 %v1758_v11, %v178_v46  ;;  %v344_v57 = vmax.f32 %v280_v48, 0.0  ;;  %v250_v58 = vadd.f32 %v1758_v11, %v179_v49 }
  0x29   :  { %v282_v6 = vadd.f32 %v1758_v11, %v211_v60  ;;  %v1327_v8 = vunpack.c.h.bf16 %v1504_v51  ;;  %v212_v9 = vmul.f32 %v1326_v1, %v1744_v5  ;;  %v1266_v15 = vunpack.c.l.bf16 %v1489_v2  ;;  %v1507_v51 = vld [vmem:[%s2676_s0 + $0xe0] sm:$0xff]  }
  0x2a   :  { %1603 = vmatmul.mubr.bf16.gmra.mrb[4].mxu0 %v1833_v34  ;;  %1635 = vmatmul.mubr.bf16.gmra.mrb[4].mxu1 %v380_v43  ;;  %v1322_v34 = vunpack.c.l.bf16 %v1503_v33  ;;  %v1488_v43 = vld [vmem:[%s2676_s0 + $0x48] sm:$0xff]   ;;  %v314_v4 = vmax.f32 %v250_v58, 0.0  ;;  %v1267_v19 = vunpack.c.h.bf16 %v1489_v2  ;;  %v1330_v24 = vunpack.c.l.bf16 %v1505_v10  ;;  %v1506_v33 = vld [vmem:[%s2676_s0 + $0xd8] sm:$0xff]  }
  0x2b   :  { %1606 = vmatprep.mubr.bf16.mxu0 %v365_v62  ;;  %1638 = vmatprep.mubr.bf16.mxu1 %v381_v3  ;;  %v1262_v61 = vunpack.c.l.bf16 %v1488_v43  ;;  %v313_v62 = vmax.f32 %v249_v55, 0.0  ;;  %v1263_v0 = vunpack.c.h.bf16 %v1488_v43  ;;  %v384_v3 = vpack.c.bf16 %v344_v57, %v343_v53  ;;  %v1492_v2 = vld [vmem:[%s2676_s0 + $0x68] sm:$0xff]  }
  0x2c   :  { %v210_v56 = vmul.f32 %v1322_v34, %v1744_v5  ;;  %v346_v13 = vmax.f32 %v282_v6, 0.0  ;;  %v213_v17 = vmul.f32 %v1327_v8, %v1744_v5  ;;  %v283_v18 = vadd.f32 %v1758_v11, %v212_v9 }
  0x2d   :  { %v180_v54 = vmul.f32 %v1262_v61, %v1744_v5  ;;  %v181_v59 = vmul.f32 %v1263_v0, %v1744_v5  ;;  %v369_v12 = vpack.c.bf16 %v314_v4, %v313_v62  ;;  %v182_v23 = vmul.f32 %v1266_v15, %v1744_v5 }
  0x2e   :  { %v281_v63 = vadd.f32 %v1758_v11, %v210_v56  ;;  %v284_v26 = vadd.f32 %v1758_v11, %v213_v17  ;;  %v347_v27 = vmax.f32 %v283_v18, 0.0  ;;  %v183_v28 = vmul.f32 %v1267_v19, %v1744_v5  ;;  %v1493_v19 = vld [vmem:[%s2676_s0 + $0x70] sm:$0xff]  }
  0x2f   :  { %v251_v14 = vadd.f32 %v1758_v11, %v180_v54  ;;  %v253_v29 = vadd.f32 %v1758_v11, %v182_v23  ;;  %v1331_v30 = vunpack.c.h.bf16 %v1505_v10  ;;  %v214_v31 = vmul.f32 %v1330_v24, %v1744_v5 }
  0x30   :  { %v345_v7 = vmax.f32 %v281_v63, 0.0  ;;  %v1270_v32 = vunpack.c.l.bf16 %v1490_v20  ;;  %v348_v36 = vmax.f32 %v284_v26, 0.0  ;;  %v254_v37 = vadd.f32 %v1758_v11, %v183_v28  ;;  %v1509_v28 = vld [vmem:[%s2676_s0 + $0xf0] sm:$0xff]  }
  0x31   :  { %v315_v22 = vmax.f32 %v251_v14, 0.0  ;;  %v1271_v38 = vunpack.c.h.bf16 %v1490_v20  ;;  %v317_v39 = vmax.f32 %v253_v29, 0.0  ;;  %v215_v40 = vmul.f32 %v1331_v30, %v1744_v5 }
  0x32   :  { %1607 = vmatmul.mubr.bf16.gmra.mrb[8].mxu0 %v366_v16  ;;  %1639 = vmatmul.mubr.bf16.gmra.mrb[8].mxu1 %v382_v21  ;;  %v252_v16 = vadd.f32 %v1758_v11, %v181_v59  ;;  %v385_v21 = vpack.c.bf16 %v346_v13, %v345_v7  ;;  %v285_v41 = vadd.f32 %v1758_v11, %v214_v31  ;;  %v318_v46 = vmax.f32 %v254_v37, 0.0  ;;  %v1508_v7 = vld [vmem:[%s2676_s0 + $0xe8] sm:$0xff]  }
  0x33   :  { %1610 = vmatprep.mubr.bf16.mxu0 %v367_v35  ;;  %1642 = vmatprep.mubr.bf16.mxu1 %v383_v47  ;;  %v184_v42 = vmul.f32 %v1270_v32, %v1744_v5  ;;  %v386_v45 = vpack.c.bf16 %v348_v36, %v347_v27  ;;  %v185_v34 = vmul.f32 %v1271_v38, %v1744_v5  ;;  %v1334_v43 = vunpack.c.l.bf16 %v1506_v33  ;;  %v1494_v38 = vld [vmem:[%s2676_s0 + $0x78] sm:$0xff]  }
  0x34   :  { %v316_v25 = vmax.f32 %v252_v16, 0.0  ;;  %v286_v47 = vadd.f32 %v1758_v11, %v215_v40  ;;  %v349_v48 = vmax.f32 %v285_v41, 0.0  ;;  %v1335_v50 = vunpack.c.h.bf16 %v1506_v33 }
  0x35   :  { %v255_v49 = vadd.f32 %v1758_v11, %v184_v42  ;;  %v371_v53 = vpack.c.bf16 %v318_v46, %v317_v39  ;;  %v216_v55 = vmul.f32 %v1334_v43, %v1744_v5  ;;  %v1274_v56 = vunpack.c.l.bf16 %v1491_v44 }
  0x36   :  { %v370_v35 = vpack.c.bf16 %v316_v25, %v315_v22  ;;  %v350_v57 = vmax.f32 %v286_v47, 0.0  ;;  %v217_v60 = vmul.f32 %v1335_v50, %v1744_v5  ;;  %v1275_v61 = vunpack.c.h.bf16 %v1491_v44  ;;  %v1510_v50 = vld [vmem:[%s2676_s0 + $0xf8] sm:$0xff]  }
  0x37   :  { %v319_v58 = vmax.f32 %v255_v49, 0.0  ;;  %v287_v63 = vadd.f32 %v1758_v11, %v216_v55  ;;  %v186_v0 = vmul.f32 %v1274_v56, %v1744_v5  ;;  %v1338_v1 = vunpack.c.l.bf16 %v1507_v51 }
  0x38   :  { %v288_v4 = vadd.f32 %v1758_v11, %v217_v60  ;;  %v187_v6 = vmul.f32 %v1275_v61, %v1744_v5  ;;  %v1339_v54 = vunpack.c.h.bf16 %v1507_v51  ;;  %v1278_v14 = vunpack.c.l.bf16 %v1492_v2 }
  0x39   :  { %v351_v59 = vmax.f32 %v287_v63, 0.0  ;;  %v257_v8 = vadd.f32 %v1758_v11, %v186_v0  ;;  %v218_v9 = vmul.f32 %v1338_v1, %v1744_v5  ;;  %v1279_v17 = vunpack.c.h.bf16 %v1492_v2 }
  0x3a   :  { %1611 = vmatmul.mubr.bf16.gmra.mrb[12].mxu0 %v368_v52  ;;  %1643 = vmatmul.mubr.bf16.gmra.mrb[12].mxu1 %v384_v3  ;;  %v256_v52 = vadd.f32 %v1758_v11, %v185_v34  ;;  %v387_v3 = vpack.c.bf16 %v350_v57, %v349_v48  ;;  %v352_v10 = vmax.f32 %v288_v4, 0.0  ;;  %v219_v13 = vmul.f32 %v1339_v54, %v1744_v5 }
  0x3b   :  { %1614 = vmatprep.mubr.bf16.mxu0 %v369_v12  ;;  %1646 = vmatprep.mubr.bf16.mxu1 %v385_v21  ;;  %v258_v12 = vadd.f32 %v1758_v11, %v187_v6  ;;  %v289_v16 = vadd.f32 %v1758_v11, %v218_v9  ;;  %v1342_v18 = vunpack.c.l.bf16 %v1508_v7  ;;  %v321_v20 = vmax.f32 %v257_v8, 0.0 }
  0x3c   :  { %v320_v62 = vmax.f32 %v256_v52, 0.0  ;;  %v290_v22 = vadd.f32 %v1758_v11, %v219_v13  ;;  %v188_v23 = vmul.f32 %v1278_v14, %v1744_v5  ;;  %v189_v25 = vmul.f32 %v1279_v17, %v1744_v5 }
  0x3d   :  { %v322_v21 = vmax.f32 %v258_v12, 0.0  ;;  %v353_v24 = vmax.f32 %v289_v16, 0.0  ;;  %v1343_v26 = vunpack.c.h.bf16 %v1508_v7  ;;  %v220_v27 = vmul.f32 %v1342_v18, %v1744_v5 }
  0x3e   :  { %v372_v15 = vpack.c.bf16 %v320_v62, %v319_v58  ;;  %v388_v29 = vpack.c.bf16 %v352_v10, %v351_v59  ;;  %v354_v30 = vmax.f32 %v290_v22, 0.0  ;;  %v259_v31 = vadd.f32 %v1758_v11, %v188_v23  ;;  %v2016_v22 = vld [vmem:[%s2679_s1 + $0x18] sm:$0xff]  }
  0x3f   :  { %v1282_v32 = vunpack.c.l.bf16 %v1493_v19  ;;  %v260_v33 = vadd.f32 %v1758_v11, %v189_v25  ;;  %v291_v36 = vadd.f32 %v1758_v11, %v220_v27  ;;  %v1283_v37 = vunpack.c.h.bf16 %v1493_v19  ;;  %v2021_v23 = vld [vmem:[%s2679_s1 + $0x98] sm:$0xff]   ;;  %v2031_v25 = vld [vmem:[%s2679_s1 + $0x90] sm:$0xff]  }
  0x40   :  { %v373_v39 = vpack.c.bf16 %v322_v21, %v321_v20  ;;  %v389_v40 = vpack.c.bf16 %v354_v30, %v353_v24  ;;  %v1346_v42 = vunpack.c.l.bf16 %v1509_v28  ;;  %v323_v44 = vmax.f32 %v259_v31, 0.0  ;;  %v2006_v20 = vld [vmem:[%s2679_s1] sm:$0xff]   ;;  %v2026_v24 = vld [vmem:[%s2679_s1 + $0x10] sm:$0xff]   ;;  %v2040_v30 = vld [vmem:[%s2679_s1 + $0x28] sm:$0xff]  }
  0x41   :  { %v190_v41 = vmul.f32 %v1282_v32, %v1744_v5  ;;  %v191_v34 = vmul.f32 %v1283_v37, %v1744_v5  ;;  %v1347_v47 = vunpack.c.h.bf16 %v1509_v28  ;;  %v1286_v49 = vunpack.c.l.bf16 %v1494_v38  ;;  %v2011_v21 = vld [vmem:[%s2679_s1 + $0x80] sm:$0xff]  }
  0x42   :  { %1615 = vmatmul.mubr.bf16.gmra.mrb[16].mxu0 %v370_v35  ;;  %1647 = vmatmul.mubr.bf16.gmra.mrb[16].mxu1 %v386_v45  ;;  %v221_v35 = vmul.f32 %v1343_v26, %v1744_v5  ;;  %v324_v45 = vmax.f32 %v260_v33, 0.0  ;;  %v222_v48 = vmul.f32 %v1346_v42, %v1744_v5  ;;  %v355_v51 = vmax.f32 %v291_v36, 0.0  ;;  %v2049_v36 = vld [vmem:[%s2679_s1 + $0xa8] sm:$0xff]   ;;  %v2054_v37 = vld [vmem:[%s2679_s1 + $0x20] sm:$0xff]  }
  0x43   :  { %1618 = vmatprep.mubr.bf16.mxu0 %v371_v53  ;;  %1650 = vmatprep.mubr.bf16.mxu1 %v387_v3  ;;  %v261_v43 = vadd.f32 %v1758_v11, %v190_v41  ;;  %v262_v52 = vadd.f32 %v1758_v11, %v191_v34  ;;  %v1287_v55 = vunpack.c.h.bf16 %v1494_v38  ;;  %v223_v57 = vmul.f32 %v1347_v47, %v1744_v5  ;;  %v2059_v38 = vld [vmem:[%s2679_s1 + $0xa0] sm:$0xff]   ;;  %v2077_v47 = vld [vmem:[%s2679_s1 + $0xb8] sm:$0xff]  }
  0x44   :  { %v292_v46 = vadd.f32 %v1758_v11, %v221_v35  ;;  %v293_v58 = vadd.f32 %v1758_v11, %v222_v48  ;;  %v192_v60 = vmul.f32 %v1286_v49, %v1744_v5  ;;  %v1350_v63 = vunpack.c.l.bf16 %v1510_v50  ;;  %v2082_v48 = vld [vmem:[%s2679_s1 + $0x30] sm:$0xff]  }
  0x45   :  { %v325_v56 = vmax.f32 %v261_v43, 0.0  ;;  %v326_v61 = vmax.f32 %v262_v52, 0.0  ;;  %v193_v62 = vmul.f32 %v1287_v55, %v1744_v5  ;;  %v374_v0 = vpack.c.bf16 %v324_v45, %v323_v44  ;;  %v2068_v44 = vld [vmem:[%s2679_s1 + $0x38] sm:$0xff]   ;;  %v2087_v49 = vld [vmem:[%s2679_s1 + $0xb0] sm:$0xff]   ;;  %v2096_v55 = vld [vmem:[%s2679_s1 + $0x48] sm:$0xff]  }
  0x46   :  { %v356_v53 = vmax.f32 %v292_v46, 0.0  ;;  %v294_v1 = vadd.f32 %v1758_v11, %v223_v57  ;;  %v357_v2 = vmax.f32 %v293_v58, 0.0  ;;  %v1351_v3 = vunpack.c.h.bf16 %v1510_v50  ;;  %v2217_v57 = vld [vmem:[%s2681_s6] ss:$0 sm:$0xff] }
  0x47   :  { %v263_v6 = vadd.f32 %v1758_v11, %v192_v60  ;;  %v264_v54 = vadd.f32 %v1758_v11, %v193_v62  ;;  %v224_v7 = vmul.f32 %v1350_v63, %v1744_v5  ;;  %v375_v59 = vpack.c.bf16 %v326_v61, %v325_v56  ;;  %v2105_v61 = vld [vmem:[%s2679_s1 + $0xc8] sm:$0xff]   ;;  %v2110_v62 = vld [vmem:[%s2679_s1 + $0x40] sm:$0xff]  }
  0x48   :  { %v390_v4 = vpack.c.bf16 %v356_v53, %v355_v51  ;;  %v358_v8 = vmax.f32 %v294_v1, 0.0  ;;  %v225_v9 = vmul.f32 %v1351_v3, %v1744_v5  ;;  %v1996_v5 = vld [vmem:[%s2679_s1 + $0x8] sm:$0xff]   ;;  %v1354_v28 = vunpack.c.l.bf16 %v2006_v20  ;;  %v2115_v63 = vld [vmem:[%s2679_s1 + $0xc0] sm:$0xff]  }
  0x49   :  { %v295_v10 = vadd.f32 %v1758_v11, %v224_v7  ;;  %v327_v14 = vmax.f32 %v263_v6, 0.0  ;;  %v1358_v26 = vunpack.c.l.bf16 %v1996_v5  ;;  %v1359_v31 = vunpack.c.h.bf16 %v1996_v5  ;;  %v2199_v7 = vld [vmem:[%s2679_s1 + $0xf0] sm:$0xff]   ;;  %v2204_v6 = vld [vmem:[%s2680_s5] ss:$0 sm:$0xff] }
  0x4a   :  { %1619 = vmatmul.mubr.bf16.gmra.mrb[20].mxu0 %v372_v15  ;;  %1651 = vmatmul.mubr.bf16.gmra.mrb[20].mxu1 %v388_v29  ;;  %v391_v12 = vpack.c.bf16 %v358_v8, %v357_v2  ;;  %v296_v13 = vadd.f32 %v1758_v11, %v225_v9  ;;  %v328_v15 = vmax.f32 %v264_v54, 0.0  ;;  %v2001_v11 = vld [vmem:[%s2679_s1 + $0x88] sm:$0xff]   ;;  %v1418_v29 = vunpack.c.l.bf16 %v2011_v21  ;;  %v2133_v8 = vld [vmem:[%s2679_s1 + $0xd8] sm:$0xff]   ;;  %v2138_v9 = vld [vmem:[%s2679_s1 + $0x50] sm:$0xff]  }
  0x4b   :  { %1622 = vmatprep.mubr.bf16.mxu0 %v373_v39  ;;  %1654 = vmatprep.mubr.bf16.mxu1 %v389_v40  ;;  %v359_v16 = vmax.f32 %v295_v10, 0.0  ;;  %v1422_v27 = vunpack.c.l.bf16 %v2001_v11  ;;  %v1423_v32 = vunpack.c.h.bf16 %v2001_v11  ;;  %v1355_v33 = vunpack.c.h.bf16 %v2006_v20  ;;  %v2143_v10 = vld [vmem:[%s2679_s1 + $0xd0] sm:$0xff]  }
  0x4c   :  { %v360_v17 = vmax.f32 %v296_v13, 0.0  ;;  %v376_v18 = vpack.c.bf16 %v328_v15, %v327_v14  ;;  %v1419_v35 = vunpack.c.h.bf16 %v2011_v21  ;;  %v1366_v39 = vunpack.c.l.bf16 %v2016_v22  ;;  %v2161_v13 = vld [vmem:[%s2679_s1 + $0xe8] sm:$0xff]   ;;  %v2166_v15 = vld [vmem:[%s2679_s1 + $0x60] sm:$0xff]   ;;  %v2194_v14 = vld [vmem:[%s2679_s1 + $0x70] sm:$0xff]  }
  0x4d   :  { %v1430_v40 = vunpack.c.l.bf16 %v2021_v23  ;;  %v1362_v41 = vunpack.c.l.bf16 %v2026_v24  ;;  %v1426_v42 = vunpack.c.l.bf16 %v2031_v25 }
  0x4e   :  { %v392_v19 = vpack.c.bf16 %v360_v17, %v359_v16  ;;  %v2152_v16 = vld [vmem:[%s2679_s1 + $0x68] sm:$0xff]   ;;  %v2171_v17 = vld [vmem:[%s2679_s1 + $0xe0] sm:$0xff]  }
  0x52   :  { %1623 = vmatmul.mubr.bf16.gmra.mrb[24].mxu0 %v374_v0  ;;  %1655 = vmatmul.mubr.bf16.gmra.mrb[24].mxu1 %v390_v4  ;;  %v2124_v4 = vld [vmem:[%s2679_s1 + $0x58] sm:$0xff]  }
  0x53   :  { %1626 = vmatprep.mubr.bf16.mxu0 %v375_v59  ;;  %1658 = vmatprep.mubr.bf16.mxu1 %v391_v12  ;;  %v2180_v12 = vld [vmem:[%s2679_s1 + $0x78] sm:$0xff]  }
  0x5a   :  { %1627 = vmatmul.mubr.bf16.gmra.mrb[28].mxu0 %v376_v18  ;;  %1659 = vmatmul.mubr.bf16.gmra.mrb[28].mxu1 %v392_v19  ;;  %v2189_v19 = vld [vmem:[%s2679_s1 + $0xf8] sm:$0xff]  }
  0xf5   :  { %v1600_v58 = vpop.f32.mrb[0].mxu0  ;;  %v1632_v3 = vpop.f32.mrb[0].mxu1 }
  0xf6   :  { %v755_v1 = vmul.f32 %v1600_v58, %v2204_v6  ;;  %v787_v0 = vmul.f32 %v1632_v3, %v2204_v6  ;;  %v491_v60 = vpop.f32.mrb[1].mxu0  ;;  %v619_v56 = vpop.f32.mrb[1].mxu1 }
  0xf7   :  { %v753_v51 = vmul.f32 %v2204_v6, %v491_v60  ;;  %v785_v54 = vmul.f32 %v2204_v6, %v619_v56  ;;  %v1601_v50 = vpop.f32.mrb[2].mxu0  ;;  %v1633_v59 = vpop.f32.mrb[2].mxu1 }
  0xf8   :  { %v826_v58 = vadd.f32 %v2217_v57, %v755_v1  ;;  %v858_v3 = vadd.f32 %v2217_v57, %v787_v0  ;;  %v756_v43 = vmul.f32 %v1601_v50, %v2204_v6  ;;  %v788_v52 = vmul.f32 %v1633_v59, %v2204_v6  ;;  %v494_v34 = vpop.f32.mrb[3].mxu0  ;;  %v622_v53 = vpop.f32.mrb[3].mxu1 }
  0xf9   :  { %v824_v60 = vadd.f32 %v2217_v57, %v753_v51  ;;  %v856_v56 = vadd.f32 %v2217_v57, %v785_v54  ;;  %v754_v46 = vmul.f32 %v2204_v6, %v494_v34  ;;  %v786_v18 = vmul.f32 %v2204_v6, %v622_v53 }
  0xfa   :  { %v1018_v2 = vadd.f32 %v1358_v26, %v826_v58  ;;  %v1050_v0 = vadd.f32 %v1422_v27, %v858_v3  ;;  %v827_v50 = vadd.f32 %v2217_v57, %v756_v43  ;;  %v859_v1 = vadd.f32 %v2217_v57, %v788_v52 }
  0xfb   :  { %v1016_v59 = vadd.f32 %v1354_v28, %v824_v60  ;;  %v1048_v51 = vadd.f32 %v1418_v29, %v856_v56  ;;  %v825_v34 = vadd.f32 %v2217_v57, %v754_v46  ;;  %v857_v53 = vadd.f32 %v2217_v57, %v786_v18 }
  0xfc   :  { %v1082_v54 = vmax.f32 %v1018_v2, 0.0  ;;  %v1114_v45 = vmax.f32 %v1050_v0, 0.0  ;;  %v1019_v26 = vadd.f32 %v1359_v31, %v827_v50  ;;  %v1051_v27 = vadd.f32 %v1423_v32, %v859_v1 }
  0xfd   :  { %v1080_v43 = vmax.f32 %v1016_v59, 0.0  ;;  %v1112_v52 = vmax.f32 %v1048_v51, 0.0  ;;  %v1017_v28 = vadd.f32 %v1355_v33, %v825_v34  ;;  %v1049_v29 = vadd.f32 %v1419_v35, %v857_v53  ;;  %v1604_v58 = vpop.f32.mrb[4].mxu0  ;;  %v1636_v46 = vpop.f32.mrb[4].mxu1 }
  0xfe   :  { %1146 = vst [vmem:[%s2682_s7 + $0x10] sm:$0xff] %v1082_v54  ;;  %1178 = vst [vmem:[%s2682_s7 + $0x110] sm:$0xff] %v1114_v45  ;;  %v1083_v5 = vmax.f32 %v1019_v26, 0.0  ;;  %v1115_v11 = vmax.f32 %v1051_v27, 0.0  ;;  %v759_v31 = vmul.f32 %v1604_v58, %v2204_v6  ;;  %v791_v20 = vmul.f32 %v1636_v46, %v2204_v6  ;;  %v507_v32 = vpop.f32.mrb[5].mxu0  ;;  %v635_v33 = vpop.f32.mrb[5].mxu1 }
  0xff   :  { %1144 = vst [vmem:[%s2682_s7] sm:$0xff] %v1080_v43  ;;  %1176 = vst [vmem:[%s2682_s7 + $0x100] sm:$0xff] %v1112_v52  ;;  %v1081_v21 = vmax.f32 %v1017_v28, 0.0  ;;  %v1113_v35 = vmax.f32 %v1049_v29, 0.0  ;;  %v757_v45 = vmul.f32 %v2204_v6, %v507_v32  ;;  %v789_v2 = vmul.f32 %v2204_v6, %v635_v33  ;;  %v1605_v18 = vpop.f32.mrb[6].mxu0  ;;  %v1637_v3 = vpop.f32.mrb[6].mxu1 }
 0x100   :  { %1147 = vst [vmem:[%s2682_s7 + $0x18] sm:$0xff] %v1083_v5  ;;  %1179 = vst [vmem:[%s2682_s7 + $0x118] sm:$0xff] %v1115_v11  ;;  %v830_v60 = vadd.f32 %v2217_v57, %v759_v31  ;;  %v862_v56 = vadd.f32 %v2217_v57, %v791_v20  ;;  %v760_v0 = vmul.f32 %v1605_v18, %v2204_v6  ;;  %v510_v1 = vpop.f32.mrb[7].mxu0  ;;  %v638_v59 = vpop.f32.mrb[7].mxu1 }
 0x101   :  { %v792_v50 = vmul.f32 %v1637_v3, %v2204_v6  ;;  %1145 = vst [vmem:[%s2682_s7 + $0x8] sm:$0xff] %v1081_v21  ;;  %1177 = vst [vmem:[%s2682_s7 + $0x108] sm:$0xff] %v1113_v35  ;;  %v828_v51 = vadd.f32 %v2217_v57, %v757_v45  ;;  %v860_v34 = vadd.f32 %v2217_v57, %v789_v2  ;;  %v2685_v21 = vunpack.c.h.bf16 %v2026_v24 }
 0x102   :  { %v758_v53 = vmul.f32 %v2204_v6, %v510_v1  ;;  %v790_v54 = vmul.f32 %v2204_v6, %v638_v59  ;;  %v1022_v26 = vadd.f32 %v1366_v39, %v830_v60  ;;  %v1054_v27 = vadd.f32 %v1430_v40, %v862_v56 }
 0x103   :  { %v831_v43 = vadd.f32 %v2217_v57, %v760_v0  ;;  %v863_v52 = vadd.f32 %v2217_v57, %v792_v50  ;;  %v1020_v28 = vadd.f32 %v1362_v41, %v828_v51  ;;  %v1052_v29 = vadd.f32 %v1426_v42, %v860_v34 }
 0x104   :  { %v829_v58 = vadd.f32 %v2217_v57, %v758_v53  ;;  %v861_v46 = vadd.f32 %v2217_v57, %v790_v54  ;;  %v1086_v5 = vmax.f32 %v1022_v26, 0.0  ;;  %v1118_v11 = vmax.f32 %v1054_v27, 0.0 }
 0x105   :  { %v2683_v39 = vunpack.c.h.bf16 %v2016_v22  ;;  %v2684_v40 = vunpack.c.h.bf16 %v2021_v23  ;;  %v1084_v32 = vmax.f32 %v1020_v28, 0.0  ;;  %v1116_v33 = vmax.f32 %v1052_v29, 0.0  ;;  %v1608_v45 = vpop.f32.mrb[8].mxu0  ;;  %v1640_v2 = vpop.f32.mrb[8].mxu1 }
 0x106   :  { %v1021_v41 = vadd.f32 %v2685_v21, %v829_v58  ;;  %v2686_v35 = vunpack.c.h.bf16 %v2031_v25  ;;  %1150 = vst [vmem:[%s2682_s7 + $0x30] sm:$0xff] %v1086_v5  ;;  %1182 = vst [vmem:[%s2682_s7 + $0x130] sm:$0xff] %v1118_v11  ;;  %v763_v18 = vmul.f32 %v1608_v45, %v2204_v6  ;;  %v795_v24 = vmul.f32 %v1640_v2, %v2204_v6  ;;  %v523_v3 = vpop.f32.mrb[9].mxu0  ;;  %v651_v60 = vpop.f32.mrb[9].mxu1 }
 0x107   :  { %v1023_v31 = vadd.f32 %v2683_v39, %v831_v43  ;;  %v1055_v20 = vadd.f32 %v2684_v40, %v863_v52  ;;  %1148 = vst [vmem:[%s2682_s7 + $0x20] sm:$0xff] %v1084_v32  ;;  %1180 = vst [vmem:[%s2682_s7 + $0x120] sm:$0xff] %v1116_v33  ;;  %v761_v0 = vmul.f32 %v2204_v6, %v523_v3  ;;  %v1609_v1 = vpop.f32.mrb[10].mxu0  ;;  %v1641_v59 = vpop.f32.mrb[10].mxu1  ;;  %v2687_v58 = vunpack.c.l.bf16 %v2040_v30 }
 0x108   :  { %v1053_v42 = vadd.f32 %v2686_v35, %v861_v46  ;;  %v1085_v25 = vmax.f32 %v1021_v41, 0.0  ;;  %v793_v50 = vmul.f32 %v2204_v6, %v651_v60  ;;  %v834_v51 = vadd.f32 %v2217_v57, %v763_v18  ;;  %v526_v26 = vpop.f32.mrb[11].mxu0  ;;  %v654_v27 = vpop.f32.mrb[11].mxu1 }
 0x109   :  { %v1087_v22 = vmax.f32 %v1023_v31, 0.0  ;;  %v1119_v23 = vmax.f32 %v1055_v20, 0.0  ;;  %v866_v34 = vadd.f32 %v2217_v57, %v795_v24  ;;  %v764_v53 = vmul.f32 %v1609_v1, %v2204_v6 }
 0x10a   :  { %v1117_v56 = vmax.f32 %v1053_v42, 0.0  ;;  %v796_v54 = vmul.f32 %v1641_v59, %v2204_v6  ;;  %1149 = vst [vmem:[%s2682_s7 + $0x28] sm:$0xff] %v1085_v25  ;;  %v832_v43 = vadd.f32 %v2217_v57, %v761_v0  ;;  %v864_v52 = vadd.f32 %v2217_v57, %v793_v50 }
 0x10b   :  { %1151 = vst [vmem:[%s2682_s7 + $0x38] sm:$0xff] %v1087_v22  ;;  %1183 = vst [vmem:[%s2682_s7 + $0x138] sm:$0xff] %v1119_v23  ;;  %v762_v28 = vmul.f32 %v2204_v6, %v526_v26  ;;  %v794_v29 = vmul.f32 %v2204_v6, %v654_v27  ;;  %v1026_v46 = vadd.f32 %v2687_v58, %v834_v51  ;;  %v2688_v5 = vunpack.c.l.bf16 %v2049_v36 }
 0x10c   :  { %1181 = vst [vmem:[%s2682_s7 + $0x128] sm:$0xff] %v1117_v56  ;;  %v835_v39 = vadd.f32 %v2217_v57, %v764_v53  ;;  %v867_v31 = vadd.f32 %v2217_v57, %v796_v54  ;;  %v2689_v40 = vunpack.c.l.bf16 %v2054_v37  ;;  %v2690_v32 = vunpack.c.l.bf16 %v2059_v38 }
 0x10d   :  { %v1058_v11 = vadd.f32 %v2688_v5, %v866_v34  ;;  %v833_v21 = vadd.f32 %v2217_v57, %v762_v28  ;;  %v865_v41 = vadd.f32 %v2217_v57, %v794_v29  ;;  %v1090_v35 = vmax.f32 %v1026_v46, 0.0  ;;  %v1612_v0 = vpop.f32.mrb[12].mxu0  ;;  %v1644_v50 = vpop.f32.mrb[12].mxu1 }
 0x10e   :  { %v1024_v20 = vadd.f32 %v2689_v40, %v832_v43  ;;  %v1056_v33 = vadd.f32 %v2690_v32, %v864_v52  ;;  %v2691_v45 = vunpack.c.h.bf16 %v2040_v30  ;;  %v2692_v22 = vunpack.c.h.bf16 %v2049_v36  ;;  %v539_v59 = vpop.f32.mrb[13].mxu0  ;;  %v667_v51 = vpop.f32.mrb[13].mxu1 }
 0x10f   :  { %v1122_v42 = vmax.f32 %v1058_v11, 0.0  ;;  %v2693_v3 = vunpack.c.h.bf16 %v2054_v37  ;;  %v2694_v25 = vunpack.c.h.bf16 %v2059_v38  ;;  %1154 = vst [vmem:[%s2682_s7 + $0x50] sm:$0xff] %v1090_v35  ;;  %v767_v1 = vmul.f32 %v1612_v0, %v2204_v6  ;;  %v1613_v26 = vpop.f32.mrb[14].mxu0  ;;  %v1645_v27 = vpop.f32.mrb[14].mxu1 }
 0x110   :  { %v1027_v2 = vadd.f32 %v2691_v45, %v835_v39  ;;  %v1059_v23 = vadd.f32 %v2692_v22, %v867_v31  ;;  %v1088_v18 = vmax.f32 %v1024_v20, 0.0  ;;  %v1120_v24 = vmax.f32 %v1056_v33, 0.0  ;;  %v542_v58 = vpop.f32.mrb[15].mxu0  ;;  %v670_v46 = vpop.f32.mrb[15].mxu1 }
 0x111   :  { %v1025_v60 = vadd.f32 %v2693_v3, %v833_v21  ;;  %v1057_v56 = vadd.f32 %v2694_v25, %v865_v41  ;;  %1186 = vst [vmem:[%s2682_s7 + $0x150] sm:$0xff] %v1122_v42  ;;  %v799_v37 = vmul.f32 %v1644_v50, %v2204_v6  ;;  %v765_v53 = vmul.f32 %v2204_v6, %v539_v59 }
 0x112   :  { %v1091_v30 = vmax.f32 %v1027_v2, 0.0  ;;  %v1123_v36 = vmax.f32 %v1059_v23, 0.0  ;;  %1152 = vst [vmem:[%s2682_s7 + $0x40] sm:$0xff] %v1088_v18  ;;  %1184 = vst [vmem:[%s2682_s7 + $0x140] sm:$0xff] %v1120_v24  ;;  %v797_v54 = vmul.f32 %v2204_v6, %v667_v51  ;;  %v838_v43 = vadd.f32 %v2217_v57, %v767_v1 }
 0x113   :  { %v1089_v38 = vmax.f32 %v1025_v60, 0.0  ;;  %v1121_v34 = vmax.f32 %v1057_v56, 0.0  ;;  %v870_v52 = vadd.f32 %v2217_v57, %v799_v37  ;;  %v768_v28 = vmul.f32 %v1613_v26, %v2204_v6 }
 0x114   :  { %1155 = vst [vmem:[%s2682_s7 + $0x58] sm:$0xff] %v1091_v30  ;;  %1187 = vst [vmem:[%s2682_s7 + $0x158] sm:$0xff] %v1123_v36  ;;  %v800_v29 = vmul.f32 %v1645_v27, %v2204_v6  ;;  %v836_v5 = vadd.f32 %v2217_v57, %v765_v53  ;;  %v868_v11 = vadd.f32 %v2217_v57, %v797_v54  ;;  %v2695_v40 = vunpack.c.l.bf16 %v2068_v44 }
 0x115   :  { %1153 = vst [vmem:[%s2682_s7 + $0x48] sm:$0xff] %v1089_v38  ;;  %1185 = vst [vmem:[%s2682_s7 + $0x148] sm:$0xff] %v1121_v34  ;;  %v766_v39 = vmul.f32 %v2204_v6, %v542_v58  ;;  %v798_v31 = vmul.f32 %v2204_v6, %v670_v46  ;;  %v2696_v32 = vunpack.c.l.bf16 %v2077_v47  ;;  %v839_v21 = vadd.f32 %v2217_v57, %v768_v28  ;;  %v1616_v59 = vpop.f32.mrb[16].mxu0  ;;  %v1648_v51 = vpop.f32.mrb[16].mxu1 }
 0x116   :  { %v1030_v20 = vadd.f32 %v2695_v40, %v838_v43  ;;  %v871_v41 = vadd.f32 %v2217_v57, %v800_v29  ;;  %v2697_v35 = vunpack.c.l.bf16 %v2082_v48  ;;  %v2698_v45 = vunpack.c.l.bf16 %v2087_v49  ;;  %v555_v34 = vpop.f32.mrb[17].mxu0  ;;  %v683_v53 = vpop.f32.mrb[17].mxu1 }
 0x117   :  { %v1062_v33 = vadd.f32 %v2696_v32, %v870_v52  ;;  %v837_v22 = vadd.f32 %v2217_v57, %v766_v39  ;;  %v869_v23 = vadd.f32 %v2217_v57, %v798_v31  ;;  %v2699_v3 = vunpack.c.h.bf16 %v2068_v44  ;;  %v1617_v43 = vpop.f32.mrb[18].mxu0  ;;  %v1649_v52 = vpop.f32.mrb[18].mxu1 }
 0x118   :  { %v1028_v42 = vadd.f32 %v2697_v35, %v836_v5  ;;  %v1060_v2 = vadd.f32 %v2698_v45, %v868_v11  ;;  %v1094_v18 = vmax.f32 %v1030_v20, 0.0  ;;  %v2700_v25 = vunpack.c.h.bf16 %v2077_v47  ;;  %v558_v5 = vpop.f32.mrb[19].mxu0  ;;  %v686_v11 = vpop.f32.mrb[19].mxu1 }
 0x119   :  { %v1126_v24 = vmax.f32 %v1062_v33, 0.0  ;;  %v1031_v60 = vadd.f32 %v2699_v3, %v839_v21  ;;  %v2701_v30 = vunpack.c.h.bf16 %v2082_v48  ;;  %v2702_v1 = vunpack.c.h.bf16 %v2087_v49 }
 0x11a   :  { %v1063_v56 = vadd.f32 %v2700_v25, %v871_v41  ;;  %v1092_v0 = vmax.f32 %v1028_v42, 0.0  ;;  %v1124_v50 = vmax.f32 %v1060_v2, 0.0  ;;  %1158 = vst [vmem:[%s2682_s7 + $0x70] sm:$0xff] %v1094_v18  ;;  %v771_v38 = vmul.f32 %v1616_v59, %v2204_v6 }
 0x11b   :  { %v1029_v36 = vadd.f32 %v2701_v30, %v837_v22  ;;  %v1061_v37 = vadd.f32 %v2702_v1, %v869_v23  ;;  %1190 = vst [vmem:[%s2682_s7 + $0x170] sm:$0xff] %v1126_v24  ;;  %v1095_v44 = vmax.f32 %v1031_v60, 0.0  ;;  %v803_v48 = vmul.f32 %v1648_v51, %v2204_v6 }
 0x11c   :  { %v1127_v47 = vmax.f32 %v1063_v56, 0.0  ;;  %1156 = vst [vmem:[%s2682_s7 + $0x60] sm:$0xff] %v1092_v0  ;;  %1188 = vst [vmem:[%s2682_s7 + $0x160] sm:$0xff] %v1124_v50  ;;  %v769_v26 = vmul.f32 %v2204_v6, %v555_v34  ;;  %v801_v27 = vmul.f32 %v2204_v6, %v683_v53  ;;  %v842_v28 = vadd.f32 %v2217_v57, %v771_v38 }
 0x11d   :  { %v1093_v49 = vmax.f32 %v1029_v36, 0.0  ;;  %v1125_v54 = vmax.f32 %v1061_v37, 0.0  ;;  %1159 = vst [vmem:[%s2682_s7 + $0x78] sm:$0xff] %v1095_v44  ;;  %v874_v29 = vadd.f32 %v2217_v57, %v803_v48  ;;  %v772_v58 = vmul.f32 %v1617_v43, %v2204_v6  ;;  %v1620_v44 = vpop.f32.mrb[20].mxu0 }
 0x11e   :  { %1191 = vst [vmem:[%s2682_s7 + $0x178] sm:$0xff] %v1127_v47  ;;  %v804_v46 = vmul.f32 %v1649_v52, %v2204_v6  ;;  %v840_v39 = vadd.f32 %v2217_v57, %v769_v26  ;;  %v872_v31 = vadd.f32 %v2217_v57, %v801_v27  ;;  %v770_v40 = vmul.f32 %v2204_v6, %v558_v5  ;;  %v1652_v47 = vpop.f32.mrb[20].mxu1  ;;  %v571_v48 = vpop.f32.mrb[21].mxu0 }
 0x11f   :  { %1157 = vst [vmem:[%s2682_s7 + $0x68] sm:$0xff] %v1093_v49  ;;  %1189 = vst [vmem:[%s2682_s7 + $0x168] sm:$0xff] %v1125_v54  ;;  %v802_v20 = vmul.f32 %v2204_v6, %v686_v11  ;;  %v2703_v32 = vunpack.c.l.bf16 %v2096_v55  ;;  %v2704_v21 = vunpack.c.l.bf16 %v2105_v61  ;;  %v843_v35 = vadd.f32 %v2217_v57, %v772_v58  ;;  %v699_v34 = vpop.f32.mrb[21].mxu1  ;;  %v1621_v26 = vpop.f32.mrb[22].mxu0 }
 0x120   :  { %v875_v42 = vadd.f32 %v2217_v57, %v804_v46  ;;  %v2705_v45 = vunpack.c.l.bf16 %v2110_v62  ;;  %v2706_v22 = vunpack.c.l.bf16 %v2115_v63  ;;  %v841_v18 = vadd.f32 %v2217_v57, %v770_v40  ;;  %v1653_v27 = vpop.f32.mrb[22].mxu1  ;;  %v574_v58 = vpop.f32.mrb[23].mxu0 }
 0x121   :  { %v1034_v33 = vadd.f32 %v2703_v32, %v842_v28  ;;  %v1066_v41 = vadd.f32 %v2704_v21, %v874_v29  ;;  %v873_v24 = vadd.f32 %v2217_v57, %v802_v20  ;;  %v2707_v25 = vunpack.c.h.bf16 %v2096_v55  ;;  %v702_v46 = vpop.f32.mrb[23].mxu1 }
 0x122   :  { %v1032_v2 = vadd.f32 %v2705_v45, %v840_v39  ;;  %v1064_v23 = vadd.f32 %v2706_v22, %v872_v31  ;;  %v2708_v0 = vunpack.c.h.bf16 %v2105_v61  ;;  %v2709_v1 = vunpack.c.h.bf16 %v2110_v62 }
 0x123   :  { %v1098_v3 = vmax.f32 %v1034_v33, 0.0  ;;  %v1130_v60 = vmax.f32 %v1066_v41, 0.0  ;;  %v1035_v56 = vadd.f32 %v2707_v25, %v843_v35  ;;  %v2710_v59 = vunpack.c.h.bf16 %v2115_v63 }
 0x124   :  { %v1067_v50 = vadd.f32 %v2708_v0, %v875_v42  ;;  %v1096_v30 = vmax.f32 %v1032_v2, 0.0  ;;  %v1128_v36 = vmax.f32 %v1064_v23, 0.0  ;;  %v1033_v37 = vadd.f32 %v2709_v1, %v841_v18 }
 0x125   :  { %v1065_v51 = vadd.f32 %v2710_v59, %v873_v24  ;;  %1162 = vst [vmem:[%s2682_s7 + $0x90] sm:$0xff] %v1098_v3  ;;  %1194 = vst [vmem:[%s2682_s7 + $0x190] sm:$0xff] %v1130_v60  ;;  %v1099_v55 = vmax.f32 %v1035_v56, 0.0  ;;  %v775_v38 = vmul.f32 %v1620_v44, %v2204_v6  ;;  %v807_v62 = vmul.f32 %v1652_v47, %v2204_v6  ;;  %v1624_v59 = vpop.f32.mrb[24].mxu0 }
 0x126   :  { %v1131_v61 = vmax.f32 %v1067_v50, 0.0  ;;  %1160 = vst [vmem:[%s2682_s7 + $0x80] sm:$0xff] %v1096_v30  ;;  %1192 = vst [vmem:[%s2682_s7 + $0x180] sm:$0xff] %v1128_v36  ;;  %v1097_v63 = vmax.f32 %v1033_v37, 0.0  ;;  %v773_v49 = vmul.f32 %v2204_v6, %v571_v48  ;;  %v805_v54 = vmul.f32 %v2204_v6, %v699_v34  ;;  %v587_v47 = vpop.f32.mrb[25].mxu0 }
 0x127   :  { %v1129_v53 = vmax.f32 %v1065_v51, 0.0  ;;  %1163 = vst [vmem:[%s2682_s7 + $0x98] sm:$0xff] %v1099_v55  ;;  %v846_v43 = vadd.f32 %v2217_v57, %v775_v38  ;;  %v878_v52 = vadd.f32 %v2217_v57, %v807_v62  ;;  %v776_v28 = vmul.f32 %v1621_v26, %v2204_v6  ;;  %v1656_v51 = vpop.f32.mrb[24].mxu1  ;;  %v1625_v48 = vpop.f32.mrb[26].mxu0 }
 0x128   :  { %1195 = vst [vmem:[%s2682_s7 + $0x198] sm:$0xff] %v1131_v61  ;;  %v808_v29 = vmul.f32 %v1653_v27, %v2204_v6  ;;  %1161 = vst [vmem:[%s2682_s7 + $0x88] sm:$0xff] %v1097_v63  ;;  %v844_v5 = vadd.f32 %v2217_v57, %v773_v49  ;;  %v876_v11 = vadd.f32 %v2217_v57, %v805_v54  ;;  %v2711_v40 = vunpack.c.l.bf16 %v2124_v4  ;;  %v715_v55 = vpop.f32.mrb[25].mxu1  ;;  %v590_v26 = vpop.f32.mrb[27].mxu0 }
 0x129   :  { %1193 = vst [vmem:[%s2682_s7 + $0x188] sm:$0xff] %v1129_v53  ;;  %v774_v39 = vmul.f32 %v2204_v6, %v574_v58  ;;  %v806_v31 = vmul.f32 %v2204_v6, %v702_v46  ;;  %v2712_v32 = vunpack.c.l.bf16 %v2133_v8  ;;  %v847_v21 = vadd.f32 %v2217_v57, %v776_v28  ;;  %v1657_v34 = vpop.f32.mrb[26].mxu1 }
 0x12a   :  { %v1038_v20 = vadd.f32 %v2711_v40, %v846_v43  ;;  %v879_v41 = vadd.f32 %v2217_v57, %v808_v29  ;;  %v2713_v35 = vunpack.c.l.bf16 %v2138_v9  ;;  %v2714_v45 = vunpack.c.l.bf16 %v2143_v10  ;;  %v718_v27 = vpop.f32.mrb[27].mxu1 }
 0x12b   :  { %v1070_v33 = vadd.f32 %v2712_v32, %v878_v52  ;;  %v845_v22 = vadd.f32 %v2217_v57, %v774_v39  ;;  %v877_v23 = vadd.f32 %v2217_v57, %v806_v31  ;;  %v2715_v3 = vunpack.c.h.bf16 %v2124_v4 }
 0x12c   :  { %v1036_v42 = vadd.f32 %v2713_v35, %v844_v5  ;;  %v1068_v2 = vadd.f32 %v2714_v45, %v876_v11  ;;  %v1102_v18 = vmax.f32 %v1038_v20, 0.0  ;;  %v2716_v25 = vunpack.c.h.bf16 %v2133_v8 }
 0x12d   :  { %v1134_v24 = vmax.f32 %v1070_v33, 0.0  ;;  %v1039_v60 = vadd.f32 %v2715_v3, %v847_v21  ;;  %v2717_v30 = vunpack.c.h.bf16 %v2138_v9  ;;  %v2718_v1 = vunpack.c.h.bf16 %v2143_v10 }
 0x12e   :  { %v1071_v56 = vadd.f32 %v2716_v25, %v879_v41  ;;  %v1100_v0 = vmax.f32 %v1036_v42, 0.0  ;;  %v1132_v50 = vmax.f32 %v1068_v2, 0.0  ;;  %1166 = vst [vmem:[%s2682_s7 + $0xb0] sm:$0xff] %v1102_v18  ;;  %v779_v44 = vmul.f32 %v1624_v59, %v2204_v6 }
 0x12f   :  { %v1037_v36 = vadd.f32 %v2717_v30, %v845_v22  ;;  %v1069_v37 = vadd.f32 %v2718_v1, %v877_v23  ;;  %1198 = vst [vmem:[%s2682_s7 + $0x1b0] sm:$0xff] %v1134_v24  ;;  %v1103_v4 = vmax.f32 %v1039_v60, 0.0  ;;  %v811_v9 = vmul.f32 %v1656_v51, %v2204_v6 }
 0x130   :  { %v1135_v8 = vmax.f32 %v1071_v56, 0.0  ;;  %1164 = vst [vmem:[%s2682_s7 + $0xa0] sm:$0xff] %v1100_v0  ;;  %1196 = vst [vmem:[%s2682_s7 + $0x1a0] sm:$0xff] %v1132_v50  ;;  %v777_v38 = vmul.f32 %v2204_v6, %v587_v47  ;;  %v809_v62 = vmul.f32 %v2204_v6, %v715_v55  ;;  %v850_v63 = vadd.f32 %v2217_v57, %v779_v44  ;;  %v1628_v0 = vpop.f32.mrb[28].mxu0  ;;  %v1660_v50 = vpop.f32.mrb[28].mxu1 }
 0x131   :  { %v1101_v10 = vmax.f32 %v1037_v36, 0.0  ;;  %v1133_v61 = vmax.f32 %v1069_v37, 0.0  ;;  %1167 = vst [vmem:[%s2682_s7 + $0xb8] sm:$0xff] %v1103_v4  ;;  %v882_v53 = vadd.f32 %v2217_v57, %v811_v9  ;;  %v780_v49 = vmul.f32 %v1625_v48, %v2204_v6  ;;  %v603_v36 = vpop.f32.mrb[29].mxu0  ;;  %v731_v1 = vpop.f32.mrb[29].mxu1 }
 0x132   :  { %1199 = vst [vmem:[%s2682_s7 + $0x1b8] sm:$0xff] %v1135_v8  ;;  %v812_v54 = vmul.f32 %v1657_v34, %v2204_v6  ;;  %v848_v43 = vadd.f32 %v2217_v57, %v777_v38  ;;  %v880_v52 = vadd.f32 %v2217_v57, %v809_v62  ;;  %v778_v28 = vmul.f32 %v2204_v6, %v590_v26  ;;  %v1629_v4 = vpop.f32.mrb[30].mxu0  ;;  %v1661_v8 = vpop.f32.mrb[30].mxu1 }
 0x133   :  { %1165 = vst [vmem:[%s2682_s7 + $0xa8] sm:$0xff] %v1101_v10  ;;  %1197 = vst [vmem:[%s2682_s7 + $0x1a8] sm:$0xff] %v1133_v61  ;;  %v810_v29 = vmul.f32 %v2204_v6, %v718_v27  ;;  %v2719_v58 = vunpack.c.l.bf16 %v2152_v16  ;;  %v2720_v5 = vunpack.c.l.bf16 %v2161_v13  ;;  %v851_v39 = vadd.f32 %v2217_v57, %v780_v49  ;;  %v606_v10 = vpop.f32.mrb[31].mxu0  ;;  %v734_v61 = vpop.f32.mrb[31].mxu1 }
 0x134   :  { %v883_v31 = vadd.f32 %v2217_v57, %v812_v54  ;;  %v2721_v40 = vunpack.c.l.bf16 %v2166_v15  ;;  %v2722_v32 = vunpack.c.l.bf16 %v2171_v17  ;;  %v849_v21 = vadd.f32 %v2217_v57, %v778_v28 }
 0x135   :  { %v1042_v46 = vadd.f32 %v2719_v58, %v850_v63  ;;  %v1074_v11 = vadd.f32 %v2720_v5, %v882_v53  ;;  %v881_v41 = vadd.f32 %v2217_v57, %v810_v29  ;;  %v2723_v45 = vunpack.c.h.bf16 %v2152_v16 }
 0x136   :  { %v1040_v20 = vadd.f32 %v2721_v40, %v848_v43  ;;  %v1072_v33 = vadd.f32 %v2722_v32, %v880_v52  ;;  %v2724_v22 = vunpack.c.h.bf16 %v2161_v13  ;;  %v2725_v3 = vunpack.c.h.bf16 %v2166_v15 }
 0x137   :  { %v1106_v35 = vmax.f32 %v1042_v46, 0.0  ;;  %v1138_v42 = vmax.f32 %v1074_v11, 0.0  ;;  %v1043_v2 = vadd.f32 %v2723_v45, %v851_v39  ;;  %v2726_v25 = vunpack.c.h.bf16 %v2171_v17 }
 0x138   :  { %v1075_v23 = vadd.f32 %v2724_v22, %v883_v31  ;;  %v1104_v18 = vmax.f32 %v1040_v20, 0.0  ;;  %v1136_v24 = vmax.f32 %v1072_v33, 0.0  ;;  %v1041_v60 = vadd.f32 %v2725_v3, %v849_v21 }
 0x139   :  { %v1073_v56 = vadd.f32 %v2726_v25, %v881_v41  ;;  %1170 = vst [vmem:[%s2682_s7 + $0xd0] sm:$0xff] %v1106_v35  ;;  %1202 = vst [vmem:[%s2682_s7 + $0x1d0] sm:$0xff] %v1138_v42  ;;  %v1107_v13 = vmax.f32 %v1043_v2, 0.0  ;;  %v783_v30 = vmul.f32 %v1628_v0, %v2204_v6  ;;  %v815_v15 = vmul.f32 %v1660_v50, %v2204_v6 }
 0x13a   :  { %v1139_v16 = vmax.f32 %v1075_v23, 0.0  ;;  %1168 = vst [vmem:[%s2682_s7 + $0xc0] sm:$0xff] %v1104_v18  ;;  %1200 = vst [vmem:[%s2682_s7 + $0x1c0] sm:$0xff] %v1136_v24  ;;  %v1105_v17 = vmax.f32 %v1041_v60, 0.0  ;;  %v781_v59 = vmul.f32 %v2204_v6, %v603_v36  ;;  %v813_v51 = vmul.f32 %v2204_v6, %v731_v1 }
 0x13b   :  { %v1137_v37 = vmax.f32 %v1073_v56, 0.0  ;;  %1171 = vst [vmem:[%s2682_s7 + $0xd8] sm:$0xff] %v1107_v13  ;;  %v854_v44 = vadd.f32 %v2217_v57, %v783_v30  ;;  %v886_v9 = vadd.f32 %v2217_v57, %v815_v15  ;;  %v784_v47 = vmul.f32 %v1629_v4, %v2204_v6 }
 0x13c   :  { %1203 = vst [vmem:[%s2682_s7 + $0x1d8] sm:$0xff] %v1139_v16  ;;  %v816_v55 = vmul.f32 %v1661_v8, %v2204_v6  ;;  %1169 = vst [vmem:[%s2682_s7 + $0xc8] sm:$0xff] %v1105_v17  ;;  %v852_v38 = vadd.f32 %v2217_v57, %v781_v59  ;;  %v884_v62 = vadd.f32 %v2217_v57, %v813_v51  ;;  %v2727_v63 = vunpack.c.l.bf16 %v2180_v12 }
 0x13d   :  { %1201 = vst [vmem:[%s2682_s7 + $0x1c8] sm:$0xff] %v1137_v37  ;;  %v782_v48 = vmul.f32 %v2204_v6, %v606_v10  ;;  %v814_v34 = vmul.f32 %v2204_v6, %v734_v61  ;;  %v2728_v49 = vunpack.c.l.bf16 %v2189_v19  ;;  %v855_v26 = vadd.f32 %v2217_v57, %v784_v47 }
 0x13e   :  { %v1046_v53 = vadd.f32 %v2727_v63, %v854_v44  ;;  %v887_v27 = vadd.f32 %v2217_v57, %v816_v55  ;;  %v2729_v43 = vunpack.c.l.bf16 %v2194_v14  ;;  %v2730_v28 = vunpack.c.l.bf16 %v2199_v7 }
 0x13f   :  { %v1078_v54 = vadd.f32 %v2728_v49, %v886_v9  ;;  %v853_v58 = vadd.f32 %v2217_v57, %v782_v48  ;;  %v885_v6 = vadd.f32 %v2217_v57, %v814_v34  ;;  %v2731_v11 = vunpack.c.h.bf16 %v2180_v12 }
 0x140   :  { %v1044_v52 = vadd.f32 %v2729_v43, %v852_v38  ;;  %v1076_v29 = vadd.f32 %v2730_v28, %v884_v62  ;;  %v1110_v46 = vmax.f32 %v1046_v53, 0.0  ;;  %v2732_v31 = vunpack.c.h.bf16 %v2189_v19 }
 0x141   :  { %v1142_v5 = vmax.f32 %v1078_v54, 0.0  ;;  %v1047_v39 = vadd.f32 %v2731_v11, %v855_v26  ;;  %v2733_v33 = vunpack.c.h.bf16 %v2194_v14  ;;  %v2734_v41 = vunpack.c.h.bf16 %v2199_v7 }
 0x142   :  { %v1079_v40 = vadd.f32 %v2732_v31, %v887_v27  ;;  %v1108_v20 = vmax.f32 %v1044_v52, 0.0  ;;  %v1140_v32 = vmax.f32 %v1076_v29, 0.0  ;;  %1174 = vst [vmem:[%s2682_s7 + $0xf0] sm:$0xff] %v1110_v46 }
 0x143   :  { %v1045_v21 = vadd.f32 %v2733_v33, %v853_v58  ;;  %v1077_v35 = vadd.f32 %v2734_v41, %v885_v6  ;;  %1206 = vst [vmem:[%s2682_s7 + $0x1f0] sm:$0xff] %v1142_v5  ;;  %v1111_v57 = vmax.f32 %v1047_v39, 0.0 }
 0x144   :  { %v1143_v12 = vmax.f32 %v1079_v40, 0.0  ;;  %1172 = vst [vmem:[%s2682_s7 + $0xe0] sm:$0xff] %v1108_v20  ;;  %1204 = vst [vmem:[%s2682_s7 + $0x1e0] sm:$0xff] %v1140_v32 }
 0x145   :  { %v1109_v7 = vmax.f32 %v1045_v21, 0.0  ;;  %v1141_v14 = vmax.f32 %v1077_v35, 0.0  ;;  %1175 = vst [vmem:[%s2682_s7 + $0xf8] sm:$0xff] %v1111_v57 }
 0x146   :  { %1207 = vst [vmem:[%s2682_s7 + $0x1f8] sm:$0xff] %v1143_v12 }
 0x147   :  { %1173 = vst [vmem:[%s2682_s7 + $0xe8] sm:$0xff] %v1109_v7  ;;  %1205 = vst [vmem:[%s2682_s7 + $0x1e8] sm:$0xff] %v1141_v14 }

// kernel: bottleneck_forward.6
= control target key start
LH: loop header
LB: loop body
LE: loop exit
PB: predicated region body
PF: predicated region fallthrough
CT: control target
= control target key end

     0   :  { %s1752_s3 = inlined_call_operand.vmem [shape: bf16[128,128], index: 3, kind: input, shape index: {}]   ;;  %s1753_s0 = inlined_call_operand.vmem [shape: bf16[512,128], index: 0, kind: input, shape index: {}]   ;;  %s1754_s1 = inlined_call_operand.vmem [shape: f32[1,128], index: 1, kind: input, shape index: {}]   ;;  %s1755_s2 = inlined_call_operand.vmem [shape: f32[1,128], index: 2, kind: input, shape index: {}]   ;;  %s1756_s4 = inlined_call_operand.vmem [shape: f32[1,1,128], index: 4, kind: output, shape index: {0}]   ;;  %s1757_s5 = inlined_call_operand.vmem [shape: f32[1,1,128], index: 5, kind: output, shape index: {1}]  }
   0x1   :  { %v1256_v0 = vld [vmem:[%s1752_s3] sm:$0xff]   ;;  %v1257_v1 = vld [vmem:[%s1752_s3 + $0x8] sm:$0xff]   ;;  %v1258_v2 = vld [vmem:[%s1752_s3 + $0x10] sm:$0xff]  }
   0x2   :  { %1160 = vmatprep.subr.bf16.mxu0 %v1256_v0  ;;  %1240 = vmatprep.subr.bf16.mxu1 %v1256_v0  ;;  %v1259_v3 = vld [vmem:[%s1752_s3 + $0x18] sm:$0xff]   ;;  %v962_v4 = vld [vmem:[%s1753_s0] sm:$0xff]   ;;  %v1089_v8 = vld [vmem:[%s1753_s0 + $0x8] sm:$0xff]  }
   0x3   :  { %1161 = vmatpush3.bf16.msra.mxu0 %v1256_v0  ;;  %1248 = vmatpush3.bf16.msra.mxu1 %v1256_v0  ;;  %v1312_v5 = vld [vmem:[%s1754_s1] ss:$0 sm:$0xff]  ;;  %v963_v6 = vunpack.c.l.bf16 %v962_v4  ;;  %v964_v7 = vunpack.c.h.bf16 %v962_v4  ;;  %v1090_v9 = vld [vmem:[%s1753_s0 + $0x10] sm:$0xff]   ;;  %v967_v14 = vunpack.c.l.bf16 %v1089_v8  ;;  %v968_v15 = vunpack.c.h.bf16 %v1089_v8  ;;  %v1261_v22 = vld [vmem:[%s1752_s3 + $0x28] sm:$0xff]  }
   0x4   :  { %1162 = vmatprep.subr.bf16.mxu0 %v1257_v1  ;;  %1241 = vmatprep.subr.bf16.mxu1 %v1257_v1  ;;  %v1323_v10 = vld [vmem:[%s1755_s2] ss:$0 sm:$0xff]  ;;  %v971_v16 = vunpack.c.l.bf16 %v1090_v9  ;;  %v972_v19 = vunpack.c.h.bf16 %v1090_v9  ;;  %v1091_v26 = vld [vmem:[%s1753_s0 + $0x18] sm:$0xff]   ;;  %v1262_v31 = vld [vmem:[%s1752_s3 + $0x30] sm:$0xff]  }
   0x5   :  { %v155_v11 = vmul.f32 %v963_v6, %v1312_v5  ;;  %v156_v12 = vmul.f32 %v964_v7, %v1312_v5  ;;  %v1260_v13 = vld [vmem:[%s1752_s3 + $0x20] sm:$0xff]   ;;  %v157_v23 = vmul.f32 %v967_v14, %v1312_v5  ;;  %v158_v24 = vmul.f32 %v968_v15, %v1312_v5  ;;  %v1093_v38 = vld [vmem:[%s1753_s0 + $0x28] sm:$0xff]   ;;  %v1094_v41 = vld [vmem:[%s1753_s0 + $0x30] sm:$0xff]  }
   0x6   :  { %v159_v25 = vmul.f32 %v971_v16, %v1312_v5  ;;  %v160_v28 = vmul.f32 %v972_v19, %v1312_v5  ;;  %v1092_v29 = vld [vmem:[%s1753_s0 + $0x20] sm:$0xff]   ;;  %v975_v30 = vunpack.c.l.bf16 %v1091_v26  ;;  %v976_v35 = vunpack.c.h.bf16 %v1091_v26  ;;  %v1095_v42 = vld [vmem:[%s1753_s0 + $0x38] sm:$0xff]   ;;  %v1097_v63 = vld [vmem:[%s1753_s0 + $0x48] sm:$0xff]  }
   0x7   :  { %1163 = vmatpush3.bf16.msra.mxu0 %v1257_v1  ;;  %1249 = vmatpush3.bf16.msra.mxu1 %v1257_v1  ;;  %v226_v17 = vadd.f32 %v1323_v10, %v155_v11  ;;  %v227_v18 = vadd.f32 %v1323_v10, %v156_v12  ;;  %v228_v32 = vadd.f32 %v1323_v10, %v157_v23  ;;  %v979_v37 = vunpack.c.l.bf16 %v1092_v29  ;;  %v1263_v43 = vld [vmem:[%s1752_s3 + $0x38] sm:$0xff]   ;;  %v1096_v48 = vld [vmem:[%s1753_s0 + $0x40] sm:$0xff]   ;;  %v1098_v4 = vld [vmem:[%s1753_s0 + $0x50] sm:$0xff]  }
   0x8   :  { %1164 = vmatprep.subr.bf16.mxu0 %v1258_v2  ;;  %1242 = vmatprep.subr.bf16.mxu1 %v1258_v2  ;;  %v229_v33 = vadd.f32 %v1323_v10, %v158_v24  ;;  %v230_v34 = vadd.f32 %v1323_v10, %v159_v25  ;;  %v231_v36 = vadd.f32 %v1323_v10, %v160_v28  ;;  %v980_v40 = vunpack.c.h.bf16 %v1092_v29  ;;  %v1099_v23 = vld [vmem:[%s1753_s0 + $0x58] sm:$0xff]  }
   0x9   :  { %v290_v20 = vmax.f32 %v226_v17, 0.0  ;;  %v291_v21 = vmax.f32 %v227_v18, 0.0  ;;  %v161_v39 = vmul.f32 %v975_v30, %v1312_v5  ;;  %v292_v44 = vmax.f32 %v228_v32, 0.0 }
   0xa   :  { %v293_v45 = vmax.f32 %v229_v33, 0.0  ;;  %v294_v46 = vmax.f32 %v230_v34, 0.0  ;;  %v162_v47 = vmul.f32 %v976_v35, %v1312_v5  ;;  %v295_v49 = vmax.f32 %v231_v36, 0.0 }
   0xb   :  { %1165 = vmatpush3.bf16.msra.mxu0 %v1258_v2  ;;  %1250 = vmatpush3.bf16.msra.mxu1 %v1258_v2  ;;  %v354_v27 = vpack.c.bf16 %v291_v21, %v290_v20  ;;  %v163_v50 = vmul.f32 %v979_v37, %v1312_v5  ;;  %v983_v51 = vunpack.c.l.bf16 %v1093_v38  ;;  %v984_v52 = vunpack.c.h.bf16 %v1093_v38 }
   0xc   :  { %1166 = vmatprep.subr.bf16.mxu0 %v1259_v3  ;;  %1243 = vmatprep.subr.bf16.mxu1 %v1259_v3  ;;  %v987_v53 = vunpack.c.l.bf16 %v1094_v41  ;;  %v988_v54 = vunpack.c.h.bf16 %v1094_v41  ;;  %v991_v55 = vunpack.c.l.bf16 %v1095_v42  ;;  %v992_v56 = vunpack.c.h.bf16 %v1095_v42 }
   0xd   :  { %1176 = vmatprep.mubr.bf16.mxu0 %v354_v27  ;;  %v164_v57 = vmul.f32 %v980_v40, %v1312_v5  ;;  %v995_v58 = vunpack.c.l.bf16 %v1096_v48  ;;  %v996_v59 = vunpack.c.h.bf16 %v1096_v48  ;;  %v355_v60 = vpack.c.bf16 %v293_v45, %v292_v44  ;;  %v1104_v44 = vld [vmem:[%s1753_s0 + $0x80] sm:$0xff]  }
   0xe   :  { %v232_v61 = vadd.f32 %v1323_v10, %v161_v39  ;;  %v233_v62 = vadd.f32 %v1323_v10, %v162_v47  ;;  %v356_v0 = vpack.c.bf16 %v295_v49, %v294_v46  ;;  %v234_v1 = vadd.f32 %v1323_v10, %v163_v50 }
   0xf   :  { %1167 = vmatpush3.bf16.msra.mxu0 %v1259_v3  ;;  %1251 = vmatpush3.bf16.msra.mxu1 %v1259_v3  ;;  %v165_v2 = vmul.f32 %v983_v51, %v1312_v5  ;;  %v166_v3 = vmul.f32 %v984_v52, %v1312_v5  ;;  %v167_v6 = vmul.f32 %v987_v53, %v1312_v5  ;;  %v999_v14 = vunpack.c.l.bf16 %v1097_v63  ;;  %v1416_v52 = vld [vmem:[%s1753_s0 + $0x60] sm:$0xff]  }
  0x10   :  { %1168 = vmatprep.subr.bf16.mxu0 %v1260_v13  ;;  %1244 = vmatprep.subr.bf16.mxu1 %v1260_v13  ;;  %v168_v7 = vmul.f32 %v988_v54, %v1312_v5  ;;  %v169_v8 = vmul.f32 %v991_v55, %v1312_v5  ;;  %v170_v9 = vmul.f32 %v992_v56, %v1312_v5  ;;  %v296_v15 = vmax.f32 %v232_v61, 0.0 }
  0x11   :  { %v235_v11 = vadd.f32 %v1323_v10, %v164_v57  ;;  %v171_v12 = vmul.f32 %v995_v58, %v1312_v5  ;;  %v297_v16 = vmax.f32 %v233_v62, 0.0  ;;  %v1000_v17 = vunpack.c.h.bf16 %v1097_v63 }
  0x12   :  { %v1003_v18 = vunpack.c.l.bf16 %v1098_v4  ;;  %v298_v19 = vmax.f32 %v234_v1, 0.0  ;;  %v236_v20 = vadd.f32 %v1323_v10, %v165_v2  ;;  %v237_v21 = vadd.f32 %v1323_v10, %v166_v3 }
  0x13   :  { %1169 = vmatpush3.bf16.msra.mxu0 %v1260_v13  ;;  %1252 = vmatpush3.bf16.msra.mxu1 %v1260_v13  ;;  %v172_v13 = vmul.f32 %v996_v59, %v1312_v5  ;;  %v238_v24 = vadd.f32 %v1323_v10, %v167_v6  ;;  %v239_v25 = vadd.f32 %v1323_v10, %v168_v7  ;;  %v299_v28 = vmax.f32 %v235_v11, 0.0  ;;  %v1105_v59 = vld [vmem:[%s1753_s0 + $0x88] sm:$0xff]   ;;  %v1107_v11 = vld [vmem:[%s1753_s0 + $0x98] sm:$0xff]  }
  0x14   :  { %1170 = vmatprep.subr.bf16.mxu0 %v1261_v22  ;;  %1245 = vmatprep.subr.bf16.mxu1 %v1261_v22  ;;  %v240_v26 = vadd.f32 %v1323_v10, %v169_v8  ;;  %v241_v27 = vadd.f32 %v1323_v10, %v170_v9  ;;  %v242_v29 = vadd.f32 %v1323_v10, %v171_v12  ;;  %v1007_v35 = vunpack.c.l.bf16 %v1099_v23 }
  0x15   :  { %v243_v30 = vadd.f32 %v1323_v10, %v172_v13  ;;  %v357_v32 = vpack.c.bf16 %v297_v16, %v296_v15  ;;  %v174_v33 = vmul.f32 %v1000_v17, %v1312_v5  ;;  %v175_v34 = vmul.f32 %v1003_v18, %v1312_v5 }
  0x16   :  { %v300_v36 = vmax.f32 %v236_v20, 0.0  ;;  %v301_v37 = vmax.f32 %v237_v21, 0.0  ;;  %v1008_v39 = vunpack.c.h.bf16 %v1099_v23  ;;  %v302_v40 = vmax.f32 %v238_v24, 0.0  ;;  %v1108_v24 = vld [vmem:[%s1753_s0 + $0xa0] sm:$0xff]  }
  0x17   :  { %1171 = vmatpush3.bf16.msra.mxu0 %v1261_v22  ;;  %1253 = vmatpush3.bf16.msra.mxu1 %v1261_v22  ;;  %v1004_v22 = vunpack.c.h.bf16 %v1098_v4  ;;  %v303_v41 = vmax.f32 %v239_v25, 0.0  ;;  %v304_v42 = vmax.f32 %v240_v26, 0.0  ;;  %v358_v45 = vpack.c.bf16 %v299_v28, %v298_v19 }
  0x18   :  { %1172 = vmatprep.subr.bf16.mxu0 %v1262_v31  ;;  %1246 = vmatprep.subr.bf16.mxu1 %v1262_v31  ;;  %v306_v46 = vmax.f32 %v242_v29, 0.0  ;;  %v307_v47 = vmax.f32 %v243_v30, 0.0  ;;  %v245_v49 = vadd.f32 %v1323_v10, %v174_v33  ;;  %v1410_v50 = vadd.f32 %v1323_v10, %v175_v34  ;;  %v1109_v33 = vld [vmem:[%s1753_s0 + $0xa8] sm:$0xff]  }
  0x19   :  { %v176_v38 = vmul.f32 %v1004_v22, %v1312_v5  ;;  %v177_v51 = vmul.f32 %v1007_v35, %v1312_v5  ;;  %v178_v54 = vmul.f32 %v1008_v39, %v1312_v5  ;;  %v1027_v55 = vunpack.c.l.bf16 %v1104_v44 }
  0x1a   :  { %v359_v56 = vpack.c.bf16 %v301_v37, %v300_v36  ;;  %v360_v57 = vpack.c.bf16 %v303_v41, %v302_v40  ;;  %v1011_v62 = vunpack.c.l.bf16 %v1416_v52  ;;  %v1028_v63 = vunpack.c.h.bf16 %v1104_v44 }
  0x1b   :  { %1173 = vmatpush3.bf16.msra.mxu0 %v1262_v31  ;;  %1254 = vmatpush3.bf16.msra.mxu1 %v1262_v31  ;;  %v173_v31 = vmul.f32 %v999_v14, %v1312_v5  ;;  %v1419_v53 = vadd.f32 %v1323_v10, %v176_v38  ;;  %v309_v1 = vmax.f32 %v245_v49, 0.0  ;;  %v310_v2 = vmax.f32 %v1410_v50, 0.0 }
  0x1c   :  { %1174 = vmatprep.subr.bf16.mxu0 %v1263_v43  ;;  %1247 = vmatprep.subr.bf16.mxu1 %v1263_v43  ;;  %v1435_v3 = vadd.f32 %v1323_v10, %v177_v51  ;;  %v187_v4 = vmul.f32 %v1027_v55, %v1312_v5  ;;  %v1440_v7 = vadd.f32 %v1323_v10, %v178_v54  ;;  %v1031_v9 = vunpack.c.l.bf16 %v1105_v59 }
  0x1d   :  { %v244_v48 = vadd.f32 %v1323_v10, %v173_v31  ;;  %v311_v6 = vmax.f32 %v1419_v53, 0.0  ;;  %v188_v8 = vmul.f32 %v1028_v63, %v1312_v5  ;;  %v1012_v12 = vunpack.c.h.bf16 %v1416_v52 }
  0x1e   :  { %v258_v13 = vadd.f32 %v1323_v10, %v187_v4  ;;  %v1032_v14 = vunpack.c.h.bf16 %v1105_v59  ;;  %v1449_v16 = vmul.f32 %v1011_v62, %v1312_v5  ;;  %v189_v18 = vmul.f32 %v1031_v9, %v1312_v5 }
  0x1f   :  { %1175 = vmatpush3.bf16.msra.mxu0 %v1263_v43  ;;  %1255 = vmatpush3.bf16.msra.mxu1 %v1263_v43  ;;  %v305_v43 = vmax.f32 %v241_v27, 0.0  ;;  %v308_v61 = vmax.f32 %v244_v48, 0.0  ;;  %v259_v17 = vadd.f32 %v1323_v10, %v188_v8  ;;  %v1039_v23 = vunpack.c.l.bf16 %v1107_v11 }
  0x20   :  { %v322_v20 = vmax.f32 %v258_v13, 0.0  ;;  %v190_v21 = vmul.f32 %v1032_v14, %v1312_v5  ;;  %v260_v27 = vadd.f32 %v1323_v10, %v189_v18  ;;  %v1040_v31 = vunpack.c.h.bf16 %v1107_v11  ;;  %v1112_v18 = vld [vmem:[%s1753_s0 + $0xc0] sm:$0xff]  }
  0x21   :  { %v1422_v58 = vpack.c.bf16 %v305_v43, %v304_v42  ;;  %v1458_v25 = vpack.c.bf16 %v309_v1, %v308_v61  ;;  %v323_v26 = vmax.f32 %v259_v17, 0.0  ;;  %v1043_v37 = vunpack.c.l.bf16 %v1108_v24  ;;  %v1111_v1 = vld [vmem:[%s1753_s0 + $0xb8] sm:$0xff]  }
  0x22   :  { %1177 = vmatmul.mubr.bf16.vlgmr.msra.gmra.mrb[0].mxu0 %v355_v60  ;;  %v1427_v60 = vpack.c.bf16 %v307_v47, %v306_v46  ;;  %v261_v29 = vadd.f32 %v1323_v10, %v190_v21  ;;  %v324_v35 = vmax.f32 %v260_v27, 0.0  ;;  %v194_v40 = vmul.f32 %v1040_v31, %v1312_v5  ;;  %v1110_v46 = vld [vmem:[%s1753_s0 + $0xb0] sm:$0xff]   ;;  %v1101_v47 = vld [vmem:[%s1753_s0 + $0x68] sm:$0xff]  }
  0x23   :  { %1180 = vmatprep.mubr.bf16.mxu0 %v356_v0  ;;  %v1106_v0 = vld [vmem:[%s1753_s0 + $0x90] sm:$0xff]   ;;  %v370_v34 = vpack.c.bf16 %v323_v26, %v322_v20  ;;  %v1044_v43 = vunpack.c.h.bf16 %v1108_v24  ;;  %v195_v44 = vmul.f32 %v1043_v37, %v1312_v5  ;;  %v1048_v54 = vunpack.c.h.bf16 %v1109_v33 }
  0x24   :  { %v1035_v15 = vunpack.c.l.bf16 %v1106_v0  ;;  %v1036_v19 = vunpack.c.h.bf16 %v1106_v0  ;;  %v325_v38 = vmax.f32 %v261_v29, 0.0  ;;  %v265_v49 = vadd.f32 %v1323_v10, %v194_v40  ;;  %v1114_v40 = vld [vmem:[%s1753_s0 + $0xd0] sm:$0xff]  }
  0x25   :  { %1208 = vmatprep.mubr.bf16.mxu1 %v370_v34  ;;  %v198_v62 = vmul.f32 %v1048_v54, %v1312_v5  ;;  %v1051_v63 = vunpack.c.l.bf16 %v1110_v46  ;;  %v1052_v0 = vunpack.c.h.bf16 %v1110_v46  ;;  %v312_v4 = vmax.f32 %v1435_v3, 0.0 }
  0x26   :  { %v191_v22 = vmul.f32 %v1035_v15, %v1312_v5  ;;  %v192_v28 = vmul.f32 %v1036_v19, %v1312_v5  ;;  %v371_v48 = vpack.c.bf16 %v325_v38, %v324_v35  ;;  %v329_v61 = vmax.f32 %v265_v49, 0.0 }
  0x27   :  { %v1015_v8 = vunpack.c.l.bf16 %v1101_v47  ;;  %v313_v13 = vmax.f32 %v1440_v7, 0.0  ;;  %v1016_v14 = vunpack.c.h.bf16 %v1101_v47  ;;  %v199_v15 = vmul.f32 %v1051_v63, %v1312_v5 }
  0x28   :  { %v262_v30 = vadd.f32 %v1323_v10, %v191_v22  ;;  %v263_v36 = vadd.f32 %v1323_v10, %v192_v28  ;;  %1209 = vmatmul.mubr.bf16.vlgmr.msra.gmra.mrb[0].mxu1 %v371_v48  ;;  %v200_v17 = vmul.f32 %v1052_v0, %v1312_v5  ;;  %v180_v3 = vmul.f32 %v1012_v12, %v1312_v5 }
  0x29   :  { %v1055_v19 = vunpack.c.l.bf16 %v1111_v1  ;;  %v1056_v20 = vunpack.c.h.bf16 %v1111_v1  ;;  %v270_v24 = vadd.f32 %v1323_v10, %v199_v15  ;;  %v1059_v27 = vunpack.c.l.bf16 %v1112_v18  ;;  %v1115_v15 = vld [vmem:[%s1753_s0 + $0xd8] sm:$0xff]  }
  0x2a   :  { %1181 = vmatmul.mubr.bf16.gmra.mrb[4].mxu0 %v357_v32  ;;  %v193_v32 = vmul.f32 %v1039_v23, %v1312_v5  ;;  %v326_v39 = vmax.f32 %v262_v30, 0.0  ;;  %v327_v42 = vmax.f32 %v263_v36, 0.0  ;;  %v269_v23 = vadd.f32 %v1323_v10, %v198_v62 }
  0x2b   :  { %1184 = vmatprep.mubr.bf16.mxu0 %v358_v45  ;;  %v1047_v45 = vunpack.c.l.bf16 %v1109_v33  ;;  %v1060_v52 = vunpack.c.h.bf16 %v1112_v18  ;;  %v364_v12 = vpack.c.bf16 %v311_v6, %v310_v2  ;;  %v250_v28 = vadd.f32 %v1323_v10, %v1449_v16  ;;  %v1103_v33 = vld [vmem:[%s1753_s0 + $0x78] sm:$0xff]   ;;  %v1113_v16 = vld [vmem:[%s1753_s0 + $0xc8] sm:$0xff]  }
  0x2c   :  { %v264_v41 = vadd.f32 %v1323_v10, %v193_v32  ;;  %v372_v55 = vpack.c.bf16 %v327_v42, %v326_v39  ;;  %v251_v31 = vadd.f32 %v1323_v10, %v180_v3  ;;  %v181_v32 = vmul.f32 %v1015_v8, %v1312_v5 }
  0x2d   :  { %v197_v59 = vmul.f32 %v1047_v45, %v1312_v5  ;;  %v201_v34 = vmul.f32 %v1055_v19, %v1312_v5  ;;  %v202_v50 = vmul.f32 %v1056_v20, %v1312_v5  ;;  %v365_v35 = vpack.c.bf16 %v313_v13, %v312_v4 }
  0x2e   :  { %v328_v51 = vmax.f32 %v264_v41, 0.0  ;;  %1212 = vmatprep.mubr.bf16.mxu1 %v372_v55  ;;  %v182_v53 = vmul.f32 %v1016_v14, %v1312_v5  ;;  %v333_v6 = vmax.f32 %v269_v23, 0.0  ;;  %v334_v36 = vmax.f32 %v270_v24, 0.0 }
  0x2f   :  { %v268_v22 = vadd.f32 %v1323_v10, %v197_v59  ;;  %v203_v38 = vmul.f32 %v1059_v27, %v1312_v5  ;;  %v204_v39 = vmul.f32 %v1060_v52, %v1312_v5  ;;  %v314_v41 = vmax.f32 %v250_v28, 0.0 }
  0x30   :  { %v373_v21 = vpack.c.bf16 %v329_v61, %v328_v51  ;;  %v315_v45 = vmax.f32 %v251_v31, 0.0  ;;  %v272_v46 = vadd.f32 %v1323_v10, %v201_v34  ;;  %v273_v47 = vadd.f32 %v1323_v10, %v202_v50 }
  0x31   :  { %v332_v2 = vmax.f32 %v268_v22, 0.0  ;;  %v1063_v48 = vunpack.c.l.bf16 %v1113_v16  ;;  %v1064_v51 = vunpack.c.h.bf16 %v1113_v16  ;;  %v1067_v54 = vunpack.c.l.bf16 %v1114_v40 }
  0x32   :  { %1185 = vmatmul.mubr.bf16.gmra.mrb[8].mxu0 %v359_v56  ;;  %v196_v56 = vmul.f32 %v1044_v43, %v1312_v5  ;;  %1213 = vmatmul.mubr.bf16.gmra.mrb[4].mxu1 %v373_v21  ;;  %v1068_v55 = vunpack.c.h.bf16 %v1114_v40  ;;  %v275_v59 = vadd.f32 %v1323_v10, %v204_v39  ;;  %v253_v61 = vadd.f32 %v1323_v10, %v182_v53  ;;  %v1116_v21 = vld [vmem:[%s1753_s0 + $0xe0] sm:$0xff]  }
  0x33   :  { %1188 = vmatprep.mubr.bf16.mxu0 %v360_v57  ;;  %v266_v57 = vadd.f32 %v1323_v10, %v195_v44  ;;  %v1023_v44 = vunpack.c.l.bf16 %v1103_v33  ;;  %v375_v49 = vpack.c.bf16 %v333_v6, %v332_v2  ;;  %v1024_v0 = vunpack.c.h.bf16 %v1103_v33 }
  0x34   :  { %v267_v9 = vadd.f32 %v1323_v10, %v196_v56  ;;  %v252_v56 = vadd.f32 %v1323_v10, %v181_v32  ;;  %v366_v1 = vpack.c.bf16 %v315_v45, %v314_v41  ;;  %v336_v4 = vmax.f32 %v272_v46, 0.0  ;;  %v1118_v41 = vld [vmem:[%s1753_s0 + $0xf0] sm:$0xff]  }
  0x35   :  { %v330_v11 = vmax.f32 %v266_v57, 0.0  ;;  %v274_v57 = vadd.f32 %v1323_v10, %v203_v38  ;;  %v337_v8 = vmax.f32 %v273_v47, 0.0  ;;  %v207_v13 = vmul.f32 %v1067_v54, %v1312_v5 }
  0x36   :  { %v331_v7 = vmax.f32 %v267_v9, 0.0  ;;  %v205_v9 = vmul.f32 %v1063_v48, %v1312_v5  ;;  %v208_v14 = vmul.f32 %v1068_v55, %v1312_v5  ;;  %v339_v3 = vmax.f32 %v275_v59, 0.0 }
  0x37   :  { %v338_v18 = vmax.f32 %v274_v57, 0.0  ;;  %v186_v20 = vmul.f32 %v1024_v0, %v1312_v5  ;;  %v377_v23 = vpack.c.bf16 %v337_v8, %v336_v4  ;;  %v278_v27 = vadd.f32 %v1323_v10, %v207_v13 }
  0x38   :  { %v374_v26 = vpack.c.bf16 %v331_v7, %v330_v11  ;;  %v206_v11 = vmul.f32 %v1064_v51, %v1312_v5  ;;  %v317_v7 = vmax.f32 %v253_v61, 0.0  ;;  %v276_v24 = vadd.f32 %v1323_v10, %v205_v9 }
  0x39   :  { %v279_v52 = vadd.f32 %v1323_v10, %v208_v14  ;;  %v378_v28 = vpack.c.bf16 %v339_v3, %v338_v18  ;;  %v257_v33 = vadd.f32 %v1323_v10, %v186_v20  ;;  %v342_v2 = vmax.f32 %v278_v27, 0.0 }
  0x3a   :  { %1189 = vmatmul.mubr.bf16.gmra.mrb[12].mxu0 %v1422_v58  ;;  %v1102_v58 = vld [vmem:[%s1753_s0 + $0x70] sm:$0xff]   ;;  %1216 = vmatprep.mubr.bf16.mxu1 %v374_v26  ;;  %v1071_v26 = vunpack.c.l.bf16 %v1115_v15  ;;  %v340_v50 = vmax.f32 %v276_v24, 0.0  ;;  %v1083_v51 = vunpack.c.l.bf16 %v1118_v41  ;;  %v1084_v54 = vunpack.c.h.bf16 %v1118_v41 }
  0x3b   :  { %1192 = vmatprep.mubr.bf16.mxu0 %v1427_v60  ;;  %v271_v60 = vadd.f32 %v1323_v10, %v200_v17  ;;  %v1019_v29 = vunpack.c.l.bf16 %v1102_v58  ;;  %v1020_v30 = vunpack.c.h.bf16 %v1102_v58  ;;  %1217 = vmatmul.mubr.bf16.gmra.mrb[8].mxu1 %v375_v49  ;;  %v185_v17 = vmul.f32 %v1023_v44, %v1312_v5 }
  0x3c   :  { %v316_v58 = vmax.f32 %v252_v56, 0.0  ;;  %v343_v6 = vmax.f32 %v279_v52, 0.0  ;;  %v321_v40 = vmax.f32 %v257_v33, 0.0  ;;  %v216_v0 = vmul.f32 %v1084_v54, %v1312_v5 }
  0x3d   :  { %v335_v37 = vmax.f32 %v271_v60, 0.0  ;;  %v183_v42 = vmul.f32 %v1019_v29, %v1312_v5  ;;  %v184_v43 = vmul.f32 %v1020_v30, %v1312_v5  ;;  %v277_v60 = vadd.f32 %v1323_v10, %v206_v11 }
  0x3e   :  { %v1075_v29 = vunpack.c.l.bf16 %v1116_v21  ;;  %v1076_v30 = vunpack.c.h.bf16 %v1116_v21  ;;  %v367_v31 = vpack.c.bf16 %v317_v7, %v316_v58  ;;  %v256_v32 = vadd.f32 %v1323_v10, %v185_v17 }
  0x3f   :  { %v254_v62 = vadd.f32 %v1323_v10, %v183_v42  ;;  %v255_v63 = vadd.f32 %v1323_v10, %v184_v43  ;;  %v341_v53 = vmax.f32 %v277_v60, 0.0  ;;  %v380_v45 = vpack.c.bf16 %v343_v6, %v342_v2 }
  0x40   :  { %v212_v38 = vmul.f32 %v1076_v30, %v1312_v5  ;;  %v320_v39 = vmax.f32 %v256_v32, 0.0  ;;  %v287_v17 = vadd.f32 %v1323_v10, %v216_v0 }
  0x41   :  { %v318_v19 = vmax.f32 %v254_v62, 0.0  ;;  %v319_v22 = vmax.f32 %v255_v63, 0.0  ;;  %v379_v44 = vpack.c.bf16 %v341_v53, %v340_v50  ;;  %v215_v63 = vmul.f32 %v1083_v51, %v1312_v5 }
  0x42   :  { %1193 = vmatmul.mubr.bf16.gmra.mrb[16].mxu0 %v1458_v25  ;;  %v376_v25 = vpack.c.bf16 %v335_v37, %v334_v36  ;;  %v1117_v36 = vld [vmem:[%s1753_s0 + $0xe8] sm:$0xff]   ;;  %v211_v37 = vmul.f32 %v1075_v29, %v1312_v5  ;;  %v283_v49 = vadd.f32 %v1323_v10, %v212_v38  ;;  %v369_v55 = vpack.c.bf16 %v321_v40, %v320_v39 }
  0x43   :  { %1196 = vmatprep.mubr.bf16.mxu0 %v364_v12  ;;  %v1072_v12 = vunpack.c.h.bf16 %v1115_v15  ;;  %v368_v34 = vpack.c.bf16 %v319_v22, %v318_v19  ;;  %v1079_v43 = vunpack.c.l.bf16 %v1117_v36  ;;  %v1080_v47 = vunpack.c.h.bf16 %v1117_v36 }
  0x44   :  { %1220 = vmatprep.mubr.bf16.mxu1 %v376_v25  ;;  %v282_v48 = vadd.f32 %v1323_v10, %v211_v37  ;;  %v347_v62 = vmax.f32 %v283_v49, 0.0  ;;  %v286_v15 = vadd.f32 %v1323_v10, %v215_v63  ;;  %v351_v20 = vmax.f32 %v287_v17, 0.0 }
  0x45   :  { %1221 = vmatmul.mubr.bf16.gmra.mrb[12].mxu1 %v377_v23  ;;  %v210_v16 = vmul.f32 %v1072_v12, %v1312_v5  ;;  %v213_v56 = vmul.f32 %v1079_v43, %v1312_v5  ;;  %v214_v59 = vmul.f32 %v1080_v47, %v1312_v5 }
  0x46   :  { %1224 = vmatprep.mubr.bf16.mxu1 %v378_v28  ;;  %v346_v61 = vmax.f32 %v282_v48, 0.0  ;;  %v350_v19 = vmax.f32 %v286_v15, 0.0 }
  0x47   :  { %v281_v46 = vadd.f32 %v1323_v10, %v210_v16  ;;  %v284_v4 = vadd.f32 %v1323_v10, %v213_v56  ;;  %v285_v9 = vadd.f32 %v1323_v10, %v214_v59 }
  0x48   :  { %v382_v14 = vpack.c.bf16 %v347_v62, %v346_v61  ;;  %v384_v24 = vpack.c.bf16 %v351_v20, %v350_v19 }
  0x49   :  { %v345_v57 = vmax.f32 %v281_v46, 0.0  ;;  %v348_v18 = vmax.f32 %v284_v4, 0.0  ;;  %v349_v3 = vmax.f32 %v285_v9, 0.0 }
  0x4a   :  { %1197 = vmatmul.mubr.bf16.gmra.mrb[20].mxu0 %v365_v35  ;;  %v209_v35 = vmul.f32 %v1071_v26, %v1312_v5 }
  0x4b   :  { %1200 = vmatprep.mubr.bf16.mxu0 %v366_v1  ;;  %v1119_v1 = vld [vmem:[%s1753_s0 + $0xf8] sm:$0xff]   ;;  %v383_v21 = vpack.c.bf16 %v349_v3, %v348_v18 }
  0x4c   :  { %v280_v42 = vadd.f32 %v1323_v10, %v209_v35  ;;  %v1087_v11 = vunpack.c.l.bf16 %v1119_v1  ;;  %v1088_v13 = vunpack.c.h.bf16 %v1119_v1 }
  0x4d   :  { %1225 = vmatmul.mubr.bf16.gmra.mrb[16].mxu1 %v379_v44 }
  0x4e   :  { %v344_v25 = vmax.f32 %v280_v42, 0.0  ;;  %1228 = vmatprep.mubr.bf16.mxu1 %v380_v45  ;;  %v217_v58 = vmul.f32 %v1087_v11, %v1312_v5  ;;  %v218_v7 = vmul.f32 %v1088_v13, %v1312_v5 }
  0x50   :  { %v381_v8 = vpack.c.bf16 %v345_v57, %v344_v25  ;;  %v288_v22 = vadd.f32 %v1323_v10, %v217_v58  ;;  %v289_v23 = vadd.f32 %v1323_v10, %v218_v7 }
  0x52   :  { %1201 = vmatmul.mubr.bf16.gmra.mrb[24].mxu0 %v367_v31  ;;  %v352_v26 = vmax.f32 %v288_v22, 0.0  ;;  %v353_v60 = vmax.f32 %v289_v23, 0.0 }
  0x53   :  { %1204 = vmatprep.mubr.bf16.mxu0 %v368_v34 }
  0x54   :  { %v385_v27 = vpack.c.bf16 %v353_v60, %v352_v26 }
  0x55   :  { %1229 = vmatmul.mubr.bf16.gmra.mrb[20].mxu1 %v381_v8 }
  0x56   :  { %1232 = vmatprep.mubr.bf16.mxu1 %v382_v14 }
  0x5a   :  { %1205 = vmatmul.mubr.bf16.gmra.mrb[28].mxu0 %v369_v55 }
  0x5d   :  { %1233 = vmatmul.mubr.bf16.gmra.mrb[24].mxu1 %v383_v21 }
  0x5e   :  { %1236 = vmatprep.mubr.bf16.mxu1 %v384_v24 }
  0x65   :  { %1237 = vmatmul.mubr.bf16.gmra.mrb[28].mxu1 %v385_v27 }
  0xf5   :  { %v1178_v52 = vpop.f32.mrb[0].mxu0 }
  0xf6   :  { %v484_v12 = vpop.f32.mrb[1].mxu0  ;;  %v811_v32 = vmul.f32 %v1178_v52, %v1178_v52 }
  0xf7   :  { %v1179_v28 = vpop.f32.mrb[2].mxu0  ;;  %v809_v5 = vmul.f32 %v484_v12, %v484_v12 }
  0xf8   :  { %v487_v29 = vpop.f32.mrb[3].mxu0  ;;  %v812_v50 = vmul.f32 %v1179_v28, %v1179_v28 }
  0xf9   :  { %v739_v30 = vadd.f32 %v487_v29, %v484_v12  ;;  %v810_v31 = vmul.f32 %v487_v29, %v487_v29 }
  0xfb   :  { %v740_v33 = vadd.f32 %v1178_v52, %v739_v30  ;;  %v873_v34 = vadd.f32 %v810_v31, %v809_v5  ;;  %v1586_v1 = vpop.f32.mrb[0].mxu1 }
  0xfc   :  { %v1588_v4 = vpop.f32.mrb[1].mxu1 }
  0xfd   :  { %v874_v35 = vadd.f32 %v873_v34, %v811_v32  ;;  %v1182_v10 = vpop.f32.mrb[4].mxu0  ;;  %v741_v53 = vadd.f32 %v1179_v28, %v740_v33  ;;  %v1590_v14 = vpop.f32.mrb[2].mxu1 }
  0xfe   :  { %v500_v2 = vpop.f32.mrb[5].mxu0  ;;  %v815_v42 = vmul.f32 %v1182_v10, %v1182_v10  ;;  %v1592_v17 = vpop.f32.mrb[3].mxu1 }
  0xff   :  { %v742_v6 = vadd.f32 %v741_v53, %v500_v2  ;;  %v813_v16 = vmul.f32 %v500_v2, %v500_v2  ;;  %v875_v36 = vadd.f32 %v874_v35, %v812_v50  ;;  %v1183_v37 = vpop.f32.mrb[6].mxu0 }
 0x100   :  { %v503_v38 = vpop.f32.mrb[7].mxu0  ;;  %v816_v45 = vmul.f32 %v1183_v37, %v1183_v37 }
 0x101   :  { %v876_v39 = vadd.f32 %v875_v36, %v813_v16  ;;  %v743_v40 = vadd.f32 %v742_v6, %v503_v38  ;;  %v814_v41 = vmul.f32 %v503_v38, %v503_v38 }
 0x103   :  { %v744_v43 = vadd.f32 %v1182_v10, %v743_v40  ;;  %v877_v44 = vadd.f32 %v876_v39, %v814_v41 }
 0x105   :  { %v878_v46 = vadd.f32 %v877_v44, %v815_v42  ;;  %v1186_v47 = vpop.f32.mrb[8].mxu0  ;;  %v745_v48 = vadd.f32 %v1183_v37, %v744_v43  ;;  %v1594_v60 = vpop.f32.mrb[4].mxu1 }
 0x106   :  { %v516_v49 = vpop.f32.mrb[9].mxu0  ;;  %v819_v62 = vmul.f32 %v1186_v47, %v1186_v47  ;;  %v1596_v27 = vpop.f32.mrb[5].mxu1 }
 0x107   :  { %v746_v51 = vadd.f32 %v745_v48, %v516_v49  ;;  %v817_v54 = vmul.f32 %v516_v49, %v516_v49  ;;  %v879_v55 = vadd.f32 %v878_v46, %v816_v45  ;;  %v1187_v56 = vpop.f32.mrb[10].mxu0  ;;  %v1598_v5 = vpop.f32.mrb[6].mxu1 }
 0x108   :  { %v519_v25 = vpop.f32.mrb[11].mxu0  ;;  %v820_v8 = vmul.f32 %v1187_v56, %v1187_v56  ;;  %v1600_v31 = vpop.f32.mrb[7].mxu1 }
 0x109   :  { %v880_v57 = vadd.f32 %v879_v55, %v817_v54  ;;  %v747_v59 = vadd.f32 %v746_v51, %v519_v25  ;;  %v818_v61 = vmul.f32 %v519_v25, %v519_v25 }
 0x10b   :  { %v748_v63 = vadd.f32 %v1186_v47, %v747_v59  ;;  %v881_v0 = vadd.f32 %v880_v57, %v818_v61 }
 0x10d   :  { %v882_v9 = vadd.f32 %v881_v0, %v819_v62  ;;  %v1190_v11 = vpop.f32.mrb[12].mxu0  ;;  %v749_v13 = vadd.f32 %v1187_v56, %v748_v63 }
 0x10e   :  { %v532_v15 = vpop.f32.mrb[13].mxu0  ;;  %v823_v23 = vmul.f32 %v1190_v11, %v1190_v11  ;;  %v1602_v37 = vpop.f32.mrb[8].mxu1 }
 0x10f   :  { %v750_v18 = vadd.f32 %v749_v13, %v532_v15  ;;  %v821_v3 = vmul.f32 %v532_v15, %v532_v15  ;;  %v883_v58 = vadd.f32 %v882_v9, %v820_v8  ;;  %v1191_v7 = vpop.f32.mrb[14].mxu0  ;;  %v1604_v38 = vpop.f32.mrb[9].mxu1 }
 0x110   :  { %v535_v19 = vpop.f32.mrb[15].mxu0  ;;  %v824_v52 = vmul.f32 %v1191_v7, %v1191_v7  ;;  %v1606_v43 = vpop.f32.mrb[10].mxu1 }
 0x111   :  { %v884_v20 = vadd.f32 %v883_v58, %v821_v3  ;;  %v751_v21 = vadd.f32 %v750_v18, %v535_v19  ;;  %v822_v22 = vmul.f32 %v535_v19, %v535_v19  ;;  %v1608_v45 = vpop.f32.mrb[11].mxu1 }
 0x113   :  { %v752_v24 = vadd.f32 %v1190_v11, %v751_v21  ;;  %v885_v26 = vadd.f32 %v884_v20, %v822_v22 }
 0x115   :  { %v886_v12 = vadd.f32 %v885_v26, %v823_v23  ;;  %v1194_v28 = vpop.f32.mrb[16].mxu0  ;;  %v753_v29 = vadd.f32 %v1191_v7, %v752_v24 }
 0x116   :  { %v548_v30 = vpop.f32.mrb[17].mxu0  ;;  %v827_v6 = vmul.f32 %v1194_v28, %v1194_v28 }
 0x117   :  { %v754_v32 = vadd.f32 %v753_v29, %v548_v30  ;;  %v825_v33 = vmul.f32 %v548_v30, %v548_v30  ;;  %v887_v34 = vadd.f32 %v886_v12, %v824_v52  ;;  %v1195_v50 = vpop.f32.mrb[18].mxu0 }
 0x118   :  { %v551_v35 = vpop.f32.mrb[19].mxu0  ;;  %v828_v39 = vmul.f32 %v1195_v50, %v1195_v50  ;;  %v1610_v61 = vpop.f32.mrb[12].mxu1 }
 0x119   :  { %v888_v10 = vadd.f32 %v887_v34, %v825_v33  ;;  %v755_v53 = vadd.f32 %v754_v32, %v551_v35  ;;  %v826_v2 = vmul.f32 %v551_v35, %v551_v35  ;;  %v1612_v62 = vpop.f32.mrb[13].mxu1 }
 0x11a   :  { %v1614_v11 = vpop.f32.mrb[14].mxu1 }
 0x11b   :  { %v756_v16 = vadd.f32 %v1194_v28, %v755_v53  ;;  %v889_v36 = vadd.f32 %v888_v10, %v826_v2  ;;  %v1616_v15 = vpop.f32.mrb[15].mxu1 }
 0x11d   :  { %v890_v40 = vadd.f32 %v889_v36, %v827_v6  ;;  %v1198_v41 = vpop.f32.mrb[20].mxu0  ;;  %v757_v42 = vadd.f32 %v1195_v50, %v756_v16 }
 0x11e   :  { %v564_v44 = vpop.f32.mrb[21].mxu0  ;;  %v831_v25 = vmul.f32 %v1198_v41, %v1198_v41 }
 0x11f   :  { %v758_v46 = vadd.f32 %v757_v42, %v564_v44  ;;  %v829_v47 = vmul.f32 %v564_v44, %v564_v44  ;;  %v891_v48 = vadd.f32 %v890_v40, %v828_v39  ;;  %v1199_v49 = vpop.f32.mrb[22].mxu0 }
 0x120   :  { %v567_v51 = vpop.f32.mrb[23].mxu0  ;;  %v832_v63 = vmul.f32 %v1199_v49, %v1199_v49  ;;  %v1618_v52 = vpop.f32.mrb[16].mxu1 }
 0x121   :  { %v892_v54 = vadd.f32 %v891_v48, %v829_v47  ;;  %v759_v55 = vadd.f32 %v758_v46, %v567_v51  ;;  %v830_v56 = vmul.f32 %v567_v51, %v567_v51  ;;  %v1620_v12 = vpop.f32.mrb[17].mxu1  ;;  %v841_v51 = vmul.f32 %v1588_v4, %v1588_v4 }
 0x122   :  { %v1622_v33 = vpop.f32.mrb[18].mxu1 }
 0x123   :  { %v760_v57 = vadd.f32 %v1198_v41, %v759_v55  ;;  %v893_v59 = vadd.f32 %v892_v54, %v830_v56  ;;  %v1624_v50 = vpop.f32.mrb[19].mxu1 }
 0x125   :  { %v894_v0 = vadd.f32 %v893_v59, %v831_v25  ;;  %v1202_v8 = vpop.f32.mrb[24].mxu0  ;;  %v761_v9 = vadd.f32 %v1199_v49, %v760_v57 }
 0x126   :  { %v580_v13 = vpop.f32.mrb[25].mxu0  ;;  %v835_v23 = vmul.f32 %v1202_v8, %v1202_v8 }
 0x127   :  { %v762_v18 = vadd.f32 %v761_v9, %v580_v13  ;;  %v833_v3 = vmul.f32 %v580_v13, %v580_v13  ;;  %v895_v58 = vadd.f32 %v894_v0, %v832_v63  ;;  %v1203_v7 = vpop.f32.mrb[26].mxu0  ;;  %v842_v63 = vmul.f32 %v1592_v17, %v1592_v17 }
 0x128   :  { %v583_v19 = vpop.f32.mrb[27].mxu0  ;;  %v836_v28 = vmul.f32 %v1203_v7, %v1203_v7  ;;  %v1626_v44 = vpop.f32.mrb[20].mxu1  ;;  %v843_v0 = vmul.f32 %v1586_v1, %v1586_v1 }
 0x129   :  { %v896_v20 = vadd.f32 %v895_v58, %v833_v3  ;;  %v763_v21 = vadd.f32 %v762_v18, %v583_v19  ;;  %v834_v22 = vmul.f32 %v583_v19, %v583_v19  ;;  %v1628_v46 = vpop.f32.mrb[21].mxu1 }
 0x12a   :  { %v1632_v54 = vpop.f32.mrb[22].mxu1 }
 0x12b   :  { %v764_v24 = vadd.f32 %v1202_v8, %v763_v21  ;;  %v897_v26 = vadd.f32 %v896_v20, %v834_v22  ;;  %v1634_v55 = vpop.f32.mrb[23].mxu1 }
 0x12d   :  { %v898_v29 = vadd.f32 %v897_v26, %v835_v23  ;;  %v1206_v30 = vpop.f32.mrb[28].mxu0  ;;  %v765_v32 = vadd.f32 %v1203_v7, %v764_v24  ;;  %v845_v7 = vmul.f32 %v1596_v27, %v1596_v27  ;;  %v846_v23 = vmul.f32 %v1600_v31, %v1600_v31 }
 0x12e   :  { %v596_v34 = vpop.f32.mrb[29].mxu0  ;;  %v839_v40 = vmul.f32 %v1206_v30, %v1206_v30  ;;  %v847_v24 = vmul.f32 %v1594_v60, %v1594_v60 }
 0x12f   :  { %v766_v35 = vadd.f32 %v765_v32, %v596_v34  ;;  %v837_v10 = vmul.f32 %v596_v34, %v596_v34  ;;  %v899_v53 = vadd.f32 %v898_v29, %v836_v28  ;;  %v1207_v2 = vpop.f32.mrb[30].mxu0  ;;  %v849_v34 = vmul.f32 %v1604_v38, %v1604_v38 }
 0x130   :  { %v599_v6 = vpop.f32.mrb[31].mxu0  ;;  %v840_v47 = vmul.f32 %v1207_v2, %v1207_v2  ;;  %v1643_v13 = vpop.f32.mrb[24].mxu1 }
 0x131   :  { %v900_v16 = vadd.f32 %v899_v53, %v837_v10  ;;  %v767_v36 = vadd.f32 %v766_v35, %v599_v6  ;;  %v838_v39 = vmul.f32 %v599_v6, %v599_v6  ;;  %v1645_v18 = vpop.f32.mrb[25].mxu1  ;;  %v850_v6 = vmul.f32 %v1608_v45, %v1608_v45 }
 0x133   :  { %v768_v41 = vadd.f32 %v1206_v30, %v767_v36  ;;  %v901_v42 = vadd.f32 %v900_v16, %v838_v39  ;;  %v851_v16 = vmul.f32 %v1602_v37, %v1602_v37  ;;  %v852_v39 = vmul.f32 %v1606_v43, %v1606_v43 }
 0x135   :  { %v902_v48 = vadd.f32 %v901_v42, %v839_v40  ;;  %v769_v49 = vadd.f32 %v1207_v2, %v768_v41 }
 0x137   :  { %v770_v56 = vadd.f32 %v769_v49, %v1588_v4  ;;  %v903_v25 = vadd.f32 %v902_v48, %v840_v47  ;;  %v844_v4 = vmul.f32 %v1590_v14, %v1590_v14  ;;  %v854_v49 = vmul.f32 %v1616_v15, %v1616_v15 }
 0x139   :  { %v904_v57 = vadd.f32 %v903_v25, %v841_v51  ;;  %v771_v59 = vadd.f32 %v770_v56, %v1592_v17  ;;  %v1652_v17 = vpop.f32.mrb[26].mxu1 }
 0x13a   :  { %v1654_v19 = vpop.f32.mrb[27].mxu1 }
 0x13b   :  { %v772_v8 = vadd.f32 %v1586_v1, %v771_v59  ;;  %v905_v9 = vadd.f32 %v904_v57, %v842_v63  ;;  %v1663_v28 = vpop.f32.mrb[28].mxu1 }
 0x13c   :  { %v1665_v29 = vpop.f32.mrb[29].mxu1 }
 0x13d   :  { %v906_v3 = vadd.f32 %v905_v9, %v843_v0  ;;  %v773_v58 = vadd.f32 %v1590_v14, %v772_v8  ;;  %v858_v8 = vmul.f32 %v1624_v50, %v1624_v50 }
 0x13f   :  { %v774_v1 = vadd.f32 %v773_v58, %v1596_v27  ;;  %v907_v20 = vadd.f32 %v906_v3, %v844_v4  ;;  %v848_v27 = vmul.f32 %v1598_v5, %v1598_v5 }
 0x141   :  { %v908_v21 = vadd.f32 %v907_v20, %v845_v7  ;;  %v775_v22 = vadd.f32 %v774_v1, %v1600_v31  ;;  %v1672_v31 = vpop.f32.mrb[30].mxu1 }
 0x142   :  { %v1674_v35 = vpop.f32.mrb[31].mxu1 }
 0x143   :  { %v776_v14 = vadd.f32 %v1594_v60, %v775_v22  ;;  %v909_v26 = vadd.f32 %v908_v21, %v846_v23  ;;  %v862_v21 = vmul.f32 %v1634_v55, %v1634_v55 }
 0x145   :  { %v910_v30 = vadd.f32 %v909_v26, %v847_v24  ;;  %v777_v32 = vadd.f32 %v1598_v5, %v776_v14 }
 0x147   :  { %v778_v60 = vadd.f32 %v777_v32, %v1604_v38  ;;  %v911_v10 = vadd.f32 %v910_v30, %v848_v27  ;;  %v853_v38 = vmul.f32 %v1612_v62, %v1612_v62  ;;  %v866_v32 = vmul.f32 %v1654_v19, %v1654_v19 }
 0x149   :  { %v912_v53 = vadd.f32 %v911_v10, %v849_v34  ;;  %v779_v2 = vadd.f32 %v778_v60, %v1608_v45 }
 0x14b   :  { %v780_v5 = vadd.f32 %v1602_v37, %v779_v2  ;;  %v913_v36 = vadd.f32 %v912_v53, %v850_v6  ;;  %v855_v37 = vmul.f32 %v1610_v61, %v1610_v61 }
 0x14d   :  { %v914_v40 = vadd.f32 %v913_v36, %v851_v16  ;;  %v781_v41 = vadd.f32 %v1606_v43, %v780_v5  ;;  %v856_v43 = vmul.f32 %v1614_v11, %v1614_v11  ;;  %v870_v5 = vmul.f32 %v1674_v35, %v1674_v35 }
 0x14f   :  { %v782_v42 = vadd.f32 %v781_v41, %v1612_v62  ;;  %v915_v47 = vadd.f32 %v914_v40, %v852_v39  ;;  %v857_v62 = vmul.f32 %v1620_v12, %v1620_v12 }
 0x151   :  { %v916_v48 = vadd.f32 %v915_v47, %v853_v38  ;;  %v783_v45 = vadd.f32 %v782_v42, %v1616_v15 }
 0x153   :  { %v784_v51 = vadd.f32 %v1610_v61, %v783_v45  ;;  %v917_v56 = vadd.f32 %v916_v48, %v854_v49  ;;  %v859_v61 = vmul.f32 %v1618_v52, %v1618_v52 }
 0x155   :  { %v918_v25 = vadd.f32 %v917_v56, %v855_v37  ;;  %v785_v57 = vadd.f32 %v1614_v11, %v784_v51  ;;  %v860_v11 = vmul.f32 %v1622_v33, %v1622_v33 }
 0x157   :  { %v786_v59 = vadd.f32 %v785_v57, %v1620_v12  ;;  %v919_v63 = vadd.f32 %v918_v25, %v856_v43  ;;  %v861_v12 = vmul.f32 %v1628_v46, %v1628_v46 }
 0x159   :  { %v920_v0 = vadd.f32 %v919_v63, %v857_v62  ;;  %v787_v15 = vadd.f32 %v786_v59, %v1624_v50 }
 0x15b   :  { %v788_v9 = vadd.f32 %v1618_v52, %v787_v15  ;;  %v921_v4 = vadd.f32 %v920_v0, %v858_v8  ;;  %v863_v52 = vmul.f32 %v1626_v44, %v1626_v44 }
 0x15d   :  { %v922_v3 = vadd.f32 %v921_v4, %v859_v61  ;;  %v789_v58 = vadd.f32 %v1622_v33, %v788_v9  ;;  %v864_v33 = vmul.f32 %v1632_v54, %v1632_v54 }
 0x15f   :  { %v790_v7 = vadd.f32 %v789_v58, %v1628_v46  ;;  %v923_v1 = vadd.f32 %v922_v3, %v860_v11  ;;  %v865_v46 = vmul.f32 %v1645_v18, %v1645_v18 }
 0x161   :  { %v924_v20 = vadd.f32 %v923_v1, %v861_v12  ;;  %v791_v50 = vadd.f32 %v790_v7, %v1634_v55 }
 0x163   :  { %v792_v22 = vadd.f32 %v1626_v44, %v791_v50  ;;  %v925_v23 = vadd.f32 %v924_v20, %v862_v21  ;;  %v867_v44 = vmul.f32 %v1643_v13, %v1643_v13 }
 0x165   :  { %v926_v24 = vadd.f32 %v925_v23, %v863_v52  ;;  %v793_v14 = vadd.f32 %v1632_v54, %v792_v22  ;;  %v868_v54 = vmul.f32 %v1652_v17, %v1652_v17 }
 0x167   :  { %v794_v26 = vadd.f32 %v793_v14, %v1645_v18  ;;  %v927_v27 = vadd.f32 %v926_v24, %v864_v33  ;;  %v869_v18 = vmul.f32 %v1665_v29, %v1665_v29 }
 0x169   :  { %v928_v30 = vadd.f32 %v927_v27, %v865_v46  ;;  %v795_v55 = vadd.f32 %v794_v26, %v1654_v19 }
 0x16b   :  { %v796_v34 = vadd.f32 %v1643_v13, %v795_v55  ;;  %v929_v60 = vadd.f32 %v928_v30, %v866_v32  ;;  %v871_v13 = vmul.f32 %v1663_v28, %v1663_v28 }
 0x16d   :  { %v930_v10 = vadd.f32 %v929_v60, %v867_v44  ;;  %v797_v53 = vadd.f32 %v1652_v17, %v796_v34  ;;  %v872_v17 = vmul.f32 %v1672_v31, %v1672_v31 }
 0x16f   :  { %v798_v2 = vadd.f32 %v797_v53, %v1665_v29  ;;  %v931_v6 = vadd.f32 %v930_v10, %v868_v54 }
 0x171   :  { %v932_v16 = vadd.f32 %v931_v6, %v869_v18  ;;  %v799_v19 = vadd.f32 %v798_v2, %v1674_v35 }
 0x173   :  { %v800_v36 = vadd.f32 %v1663_v28, %v799_v19  ;;  %v933_v39 = vadd.f32 %v932_v16, %v870_v5 }
 0x175   :  { %v801_v40 = vadd.f32 %v1672_v31, %v800_v36  ;;  %v934_v41 = vadd.f32 %v933_v39, %v871_v13 }
 0x177   :  { %v802_v29 = vrot.slane %v801_v40, 4  ;;  %v935_v38 = vadd.f32 %v934_v41, %v872_v17 }
 0x179   :  { %v803_v42 = vadd.f32 %v802_v29, %v801_v40  ;;  %v936_v47 = vrot.slane %v935_v38, 4 }
 0x17b   :  { %v804_v48 = vrot.slane %v803_v42, 2  ;;  %v937_v45 = vadd.f32 %v936_v47, %v935_v38 }
 0x17d   :  { %v805_v49 = vadd.f32 %v804_v48, %v803_v42  ;;  %v938_v35 = vrot.slane %v937_v45, 2 }
 0x17f   :  { %v806_v37 = vrot.slane %v805_v49, 1  ;;  %v939_v51 = vadd.f32 %v938_v35, %v937_v45 }
 0x181   :  { %v807_v56 = vadd.f32 %v806_v37, %v805_v49  ;;  %v940_v43 = vrot.slane %v939_v51, 1 }
 0x183   :  { %808 = vst [vmem:[%s1756_s4] sm:$0x1] %v807_v56  ;;  %v941_v28 = vadd.f32 %v940_v43, %v939_v51 }
 0x185   :  { %942 = vst [vmem:[%s1757_s5] sm:$0x1] %v941_v28 }

// kernel: bottleneck_forward.5
= control target key start
LH: loop header
LB: loop body
LE: loop exit
PB: predicated region body
PF: predicated region fallthrough
CT: control target
= control target key end

     0   :  { %s5605_s21 = smov 0   ;;  %s7072_s0 = inlined_call_operand.vmem [shape: bf16[512,128], index: 0, kind: input, shape index: {}]   ;;  %s7073_s1 = inlined_call_operand.vmem [shape: f32[1,128], index: 1, kind: input, shape index: {}]   ;;  %s7074_s2 = inlined_call_operand.vmem [shape: f32[1,128], index: 2, kind: input, shape index: {}]   ;;  %s7075_s3 = inlined_call_operand.vmem [shape: bf16[3,384,128], index: 3, kind: input, shape index: {}]   ;;  %s7076_s4 = inlined_call_operand.vmem [shape: bf16[512,128], index: 4, kind: output, shape index: {0}]   ;;  %s7077_s5 = inlined_call_operand.vmem [shape: f32[2,1,128], index: 5, kind: output, shape index: {1}]   ;;  %s7078_s6 = inlined_call_operand.vmem [shape: f32[2,1,128], index: 6, kind: output, shape index: {2}]  }
   0x1 LB: > { %s5611_s22 = sadd.s32 4294967295, %s5566_s21   ;;  %p3667_p0 = scmp.ge.s32.totalorder %s5566_s21, 1  ;;  %s5566_s21 = sphi %s5605_s21, %s17_s21  }
   0x2   : > { %p218_p1 = scmp.lt.s32.totalorder %s5566_s21, 3 }
   0x4   : > { %p219_p2 = pnand %p3667_p0, %p218_p1 }
   0x5   : > { %v5414_v0 = vld [vmem:[%s7075_s3 + $0x100] sm:$0xff] (!%p219_p2)   ;;  %v5568_v4 = vmov (!%p219_p2), 0   ;;  %v5418_v5 = vld [vmem:[%s7075_s3 + $0x108] sm:$0xff] (!%p219_p2)   ;;  %v5422_v9 = vld [vmem:[%s7075_s3 + $0x110] sm:$0xff] (!%p219_p2)   ;;  %s3668_s9 = sshll.u32 (!%p219_p2), %s5611_s22, 5  ;;  %vm390_vm0 = vcmask (!%p219_p2), 1040384  }
   0x6   : > { %222 = sbr.rel (%p219_p2) target bundleno = 564 (0x234), region = 36  ;;  %v5415_v1 = vld [vmem:[%s7075_s3 + $0x40] sm:$0xff] (!%p219_p2)   ;;  %4572 = vmatprep.subr.bf16.mxu0 (!%p219_p2), %v5414_v0  ;;  %1437 = vmatprep.mubr.bf16.mxu1 (!%p219_p2), %v5568_v4  ;;  %v5419_v6 = vld [vmem:[%s7075_s3 + $0x48] sm:$0xff] (!%p219_p2)   ;;  %v5423_v10 = vld [vmem:[%s7075_s3 + $0x50] sm:$0xff] (!%p219_p2)   ;;  %p255_p3 = scmp.lt.s32.totalorder (!%p219_p2), %s3668_s9, 63  ;;  %vm5569_vm2 = vmmov (!%p219_p2), 1  }
   0x7   : > { %v5416_v2 = vld [vmem:[%s7075_s3 + $0xc0] sm:$0xff] (!%p219_p2)   ;;  %4652 = vmatprep.subr.bf16.mxu1 (!%p219_p2), %v5415_v1  ;;  %v5420_v7 = vld [vmem:[%s7075_s3 + $0xc8] sm:$0xff] (!%p219_p2)   ;;  %v5424_v11 = vld [vmem:[%s7075_s3 + $0xd0] sm:$0xff] (!%p219_p2)   ;;  %vm439_vm4 = vcmask (!%p219_p2), 1046528   ;;  %p266_p4 = scmp.lt.s32.totalorder (!%p219_p2), %s5611_s22, 1 }
   0x8   : > { %v5417_v3 = vld [vmem:[%s7075_s3] sm:$0xff] (!%p219_p2)   ;;  %4573 = vmatpush3.bf16.msra.mxu0 (!%p219_p2), %v5416_v2  ;;  %v5421_v8 = vld [vmem:[%s7075_s3 + $0x8] sm:$0xff] (!%p219_p2)   ;;  %v5425_v12 = vld [vmem:[%s7075_s3 + $0x10] sm:$0xff] (!%p219_p2)  }
   0x9   : > { %4653 = vmatpush3.bf16.msra.mxu1 (!%p219_p2), %v5417_v3  ;;  %4574 = vmatprep.subr.bf16.mxu0 (!%p219_p2), %v5418_v5  ;;  %v5426_v13 = vld [vmem:[%s7075_s3 + $0x118] sm:$0xff] (!%p219_p2)   ;;  %v5430_v17 = vld [vmem:[%s7075_s3 + $0x120] sm:$0xff] (!%p219_p2)   ;;  %v5434_v21 = vld [vmem:[%s7075_s3 + $0x128] sm:$0xff] (!%p219_p2)  }
   0xa   : > { %4654 = vmatprep.subr.bf16.mxu1 (!%p219_p2), %v5419_v6  ;;  %v5427_v14 = vld [vmem:[%s7075_s3 + $0x58] sm:$0xff] (!%p219_p2)   ;;  %v5431_v18 = vld [vmem:[%s7075_s3 + $0x60] sm:$0xff] (!%p219_p2)   ;;  %v5435_v22 = vld [vmem:[%s7075_s3 + $0x68] sm:$0xff] (!%p219_p2)  }
   0xb   : > { %v5428_v15 = vld [vmem:[%s7075_s3 + $0xd8] sm:$0xff] (!%p219_p2)   ;;  %v5432_v19 = vld [vmem:[%s7075_s3 + $0xe0] sm:$0xff] (!%p219_p2)   ;;  %v5436_v23 = vld [vmem:[%s7075_s3 + $0xe8] sm:$0xff] (!%p219_p2)  }
   0xc   : > { %4575 = vmatpush3.bf16.msra.mxu0 (!%p219_p2), %v5420_v7  ;;  %v5429_v16 = vld [vmem:[%s7075_s3 + $0x18] sm:$0xff] (!%p219_p2)   ;;  %v5433_v20 = vld [vmem:[%s7075_s3 + $0x20] sm:$0xff] (!%p219_p2)   ;;  %v5437_v24 = vld [vmem:[%s7075_s3 + $0x28] sm:$0xff] (!%p219_p2)  }
   0xd   : > { %4655 = vmatpush3.bf16.msra.mxu1 %v5421_v8  ;;  %4576 = vmatprep.subr.bf16.mxu0 %v5422_v9  ;;  %s7086_s9 = smov (!%p255_p3, %s3668_s9), 63  ;;  %v5438_v25 = vld [vmem:[%s7075_s3 + $0x130] sm:$0xff]   ;;  %v5442_v29 = vld [vmem:[%s7075_s3 + $0x138] sm:$0xff]   ;;  %v5726_v33 = vld [vmem:[%s7073_s1] ss:$0 sm:$0xff]  ;;  %s7088_s22 = smov (!%p266_p4, %s5611_s22), 1 }
   0xe   : > { %4656 = vmatprep.subr.bf16.mxu1 %v5423_v10  ;;  %v5439_v26 = vld [vmem:[%s7075_s3 + $0x70] sm:$0xff]   ;;  %s3669_s11 = sshll.u32 %s7086_s9, 2  ;;  %v5443_v30 = vld [vmem:[%s7075_s3 + $0x78] sm:$0xff]   ;;  %v5732_v37 = vld [vmem:[%s7074_s2] ss:$0 sm:$0xff]  ;;  %s268_s28 = scalar_lea.vmem %s7077_s5, %s7088_s22 }
   0xf   : > { %v5440_v27 = vld [vmem:[%s7075_s3 + $0xf0] sm:$0xff]   ;;  %s5715_s20 = scalar_lea.vmem %s7072_s0, %s3669_s11  ;;  %v5444_v31 = vld [vmem:[%s7075_s3 + $0xf8] sm:$0xff]   ;;  %v5446_v38 = vld [vmem:[%s7075_s3 + $0x140] sm:$0xff]   ;;  %s6902_s27 = scalar_lea.vmem %s7076_s4, %s3669_s11 }
  0x10   : > { %4577 = vmatpush3.bf16.msra.mxu0 %v5424_v11  ;;  %v5441_v28 = vld [vmem:[%s7075_s3 + $0x30] sm:$0xff]   ;;  %v5445_v32 = vld [vmem:[%s7075_s3 + $0x38] sm:$0xff]   ;;  %v4077_v34 = vld [vmem:[%s5715_s20] sm:$0xff]   ;;  %s271_s7 = scalar_lea.vmem %s7078_s6, %s7088_s22 }
  0x11   : > { %4657 = vmatpush3.bf16.msra.mxu1 %v5425_v12  ;;  %4578 = vmatprep.subr.bf16.mxu0 %v5426_v13  ;;  %v4078_v35 = vunpack.c.l.bf16 %v4077_v34  ;;  %v4079_v36 = vunpack.c.h.bf16 %v4077_v34  ;;  %v5447_v41 = vld [vmem:[%s7075_s3 + $0x80] sm:$0xff]   ;;  %v4220_v42 = vld [vmem:[%s5715_s20 + $0x8] sm:$0xff]   ;;  %v4221_v50 = vld [vmem:[%s5715_s20 + $0x10] sm:$0xff]  }
  0x12   : > { %4658 = vmatprep.subr.bf16.mxu1 %v5427_v14  ;;  %v4082_v43 = vunpack.c.l.bf16 %v4220_v42  ;;  %v4083_v44 = vunpack.c.h.bf16 %v4220_v42  ;;  %v5449_v49 = vld [vmem:[%s7075_s3 + $0x88] sm:$0xff]   ;;  %vm5757_vm1 = vmneg %vm390_vm0  ;;  %v4086_v54 = vunpack.c.l.bf16 %v4221_v50  ;;  %v4087_v55 = vunpack.c.h.bf16 %v4221_v50  ;;  %v5451_v56 = vld [vmem:[%s7075_s3 + $0x90] sm:$0xff]  }
  0x13   : > { %v320_v39 = vmul.f32 %v4078_v35, %v5726_v33  ;;  %v321_v40 = vmul.f32 %v4079_v36, %v5726_v33  ;;  %v4222_v59 = vld [vmem:[%s5715_s20 + $0x18] sm:$0xff]   ;;  %vm5781_vm3 = vmpackc.low %vm5569_vm2, %vm5757_vm1  ;;  %v5448_v10 = vld [vmem:[%s7075_s3 + $0x148] sm:$0xff]  }
  0x14   : > { %4579 = vmatpush3.bf16.msra.mxu0 %v5428_v15  ;;  %v322_v47 = vmul.f32 %v4082_v43, %v5726_v33  ;;  %v323_v48 = vmul.f32 %v4083_v44, %v5726_v33  ;;  %v324_v1 = vmul.f32 %v4086_v54, %v5726_v33  ;;  %v325_v2 = vmul.f32 %v4087_v55, %v5726_v33  ;;  %v5454_v35 = vld [vmem:[%s7075_s3 + $0x160] sm:$0xff]   ;;  %v5457_v42 = vld [vmem:[%s7075_s3 + $0xa8] sm:$0xff]   ;;  %v5459_v54 = vld [vmem:[%s7075_s3 + $0xb0] sm:$0xff]  }
  0x15   : > { %4659 = vmatpush3.bf16.msra.mxu1 %v5429_v16  ;;  %4580 = vmatprep.subr.bf16.mxu0 %v5430_v17  ;;  %v342_v45 = vadd.f32 %v5732_v37, %v320_v39  ;;  %v343_v46 = vadd.f32 %v5732_v37, %v321_v40  ;;  %v4090_v6 = vunpack.c.l.bf16 %v4222_v59  ;;  %v4091_v7 = vunpack.c.h.bf16 %v4222_v59  ;;  %v5453_v17 = vld [vmem:[%s7075_s3 + $0x98] sm:$0xff]   ;;  %v5456_v53 = vld [vmem:[%s7075_s3 + $0x168] sm:$0xff]   ;;  %vm6005_vm5 = vmpackc.low %vm439_vm4, %vm5569_vm2 }
  0x16   : > { %4660 = vmatprep.subr.bf16.mxu1 %v5431_v18  ;;  %v344_v57 = vadd.f32 %v5732_v37, %v322_v47  ;;  %v345_v58 = vadd.f32 %v5732_v37, %v323_v48  ;;  %v346_v13 = vadd.f32 %v5732_v37, %v324_v1  ;;  %v347_v14 = vadd.f32 %v5732_v37, %v325_v2 }
  0x17   : > { %v5752_v51 = vmax.f32 %v342_v45, 0.0  ;;  %v5754_v52 = vmax.f32 %v343_v46, 0.0  ;;  %v326_v15 = vmul.f32 %v4090_v6, %v5726_v33  ;;  %v327_v16 = vmul.f32 %v4091_v7, %v5726_v33 }
  0x18   : > { %4581 = vmatpush3.bf16.msra.mxu0 %v5432_v19  ;;  %v5771_v63 = vmax.f32 %v344_v57, 0.0  ;;  %v5773_v0 = vmax.f32 %v345_v58, 0.0  ;;  %v5807_v19 = vmax.f32 %v346_v13, 0.0  ;;  %v5908_v13 = vld [vmem:[%s7075_s3 + $0x200] sm:$0xff]  }
  0x19   : > { %4661 = vmatpush3.bf16.msra.mxu1 %v5433_v20  ;;  %4582 = vmatprep.subr.bf16.mxu0 %v5434_v21  ;;  %v392_v60 = vrot.slane %v5754_v52, 7  ;;  %v489_v61 = vpack.c.bf16 %v5754_v52, %v5752_v51  ;;  %v391_v62 = vrot.slane %v5752_v51, 7  ;;  %v5809_v20 = vmax.f32 %v347_v14, 0.0  ;;  %v4223_v21 = vld [vmem:[%s5715_s20 + $0x20] sm:$0xff]  }
  0x1a   : > { %4662 = vmatprep.subr.bf16.mxu1 %v5435_v22  ;;  %v5787_v9 = vpack.c.bf16 %v5773_v0, %v5771_v63  ;;  %v394_v11 = vrot.slane %v5771_v63, 7  ;;  %v395_v12 = vrot.slane %v5773_v0, 7  ;;  %v5450_v22 = vld [vmem:[%s7075_s3 + $0x150] sm:$0xff]  }
  0x1b   : > { %1099 = vmatprep.mubr.bf16.mxu0 %v489_v61  ;;  %v393_v3 = vsel %vm390_vm0, %v391_v62, %v392_v60  ;;  %v4225_v60 = vld [vmem:[%s5715_s20 + $0x30] sm:$0xff]  }
  0x1c   : > { %4583 = vmatpush3.bf16.msra.mxu0 %v5436_v23  ;;  %v4252_v8 = vpack.c.bf16 %v393_v3, %v391_v62  ;;  %v396_v18 = vsel %vm390_vm0, %v394_v11, %v395_v12  ;;  %v5461_v62 = vld [vmem:[%s7075_s3 + $0xb8] sm:$0xff]   ;;  %v4102_v3 = vunpack.c.l.bf16 %v4225_v60  ;;  %v4103_v6 = vunpack.c.h.bf16 %v4225_v60 }
  0x1d   : > { %4663 = vmatpush3.bf16.msra.mxu1 %v5437_v24  ;;  %4584 = vmatprep.subr.bf16.mxu0 %v5438_v25  ;;  %v5816_v23 = vpack.c.bf16 %v396_v18, %v394_v11  ;;  %v348_v24 = vadd.f32 %v5732_v37, %v326_v15  ;;  %v349_v25 = vadd.f32 %v5732_v37, %v327_v16  ;;  %v5460_v12 = vld [vmem:[%s7075_s3 + $0x178] sm:$0xff]  }
  0x1e   : > { %4664 = vmatprep.subr.bf16.mxu1 %v5439_v26  ;;  %v4094_v26 = vunpack.c.l.bf16 %v4223_v21  ;;  %v332_v14 = vmul.f32 %v4102_v3, %v5726_v33  ;;  %v4226_v15 = vld [vmem:[%s5715_s20 + $0x38] sm:$0xff]  }
  0x1f   : > { %v5846_v39 = vmax.f32 %v349_v25, 0.0 }
  0x20   : > { %4585 = vmatpush3.bf16.msra.mxu0 %v5440_v27  ;;  %v5822_v27 = vpack.c.bf16 %v5809_v20, %v5807_v19  ;;  %v328_v34 = vmul.f32 %v4094_v26, %v5726_v33  ;;  %v354_v25 = vadd.f32 %v5732_v37, %v332_v14  ;;  %v4106_v26 = vunpack.c.l.bf16 %v4226_v15 }
  0x21   : > { %4665 = vmatpush3.bf16.msra.mxu1 %v5441_v28  ;;  %4586 = vmatprep.subr.bf16.mxu0 %v5442_v29  ;;  %v397_v28 = vrot.slane %v5807_v19, 7  ;;  %v398_v29 = vrot.slane %v5809_v20, 7 }
  0x22   : > { %4666 = vmatprep.subr.bf16.mxu1 %v5443_v30  ;;  %v4095_v30 = vunpack.c.h.bf16 %v4223_v21  ;;  %v350_v44 = vadd.f32 %v5732_v37, %v328_v34  ;;  %v333_v21 = vmul.f32 %v4103_v6, %v5726_v33  ;;  %v334_v34 = vmul.f32 %v4106_v26, %v5726_v33  ;;  %v5465_v26 = vld [vmem:[%s7075_s3 + $0x1c8] sm:$0xff]  }
  0x23   : > { %v399_v36 = vsel %vm390_vm0, %v397_v28, %v398_v29 }
  0x24   : > { %4587 = vmatpush3.bf16.msra.mxu0 %v5444_v31  ;;  %v5452_v31 = vld [vmem:[%s7075_s3 + $0x158] sm:$0xff]   ;;  %v329_v40 = vmul.f32 %v4095_v30, %v5726_v33  ;;  %v5854_v43 = vpack.c.bf16 %v399_v36, %v397_v28  ;;  %v5876_v55 = vmax.f32 %v350_v44, 0.0  ;;  %v4107_v28 = vunpack.c.h.bf16 %v4226_v15 }
  0x25   : > { %4667 = vmatpush3.bf16.msra.mxu1 %v5445_v32  ;;  %5052 = vmatprep.subr.bf16.mxu0 %v5446_v38  ;;  %v5455_v32 = vld [vmem:[%s7075_s3 + $0xa0] sm:$0xff]   ;;  %v5949_v36 = vmax.f32 %v354_v25, 0.0  ;;  %v356_v44 = vadd.f32 %v5732_v37, %v334_v34 }
  0x26   : > { %5084 = vmatprep.subr.bf16.mxu1 %v5447_v41  ;;  %v351_v50 = vadd.f32 %v5732_v37, %v329_v40  ;;  %v403_v2 = vrot.slane %v5876_v55, 7 }
  0x27   : > { %4253 = vmatmul.mubr.msk.bf16.vlgmr.msra.gmra.mrb[0].mxu0 %vm5781_vm3, %v4252_v8 }
  0x28   : > { %1438 = vmatmul.mubr.bf16.vlgmr.msra.gmra.mrb[0].mxu1 %v5568_v4  ;;  %5053 = vmatpush3.bf16.msra.mxu0 %v5446_v38  ;;  %v5844_v38 = vmax.f32 %v348_v24, 0.0  ;;  %v5880_v57 = vmax.f32 %v351_v50, 0.0 }
  0x29   : > { %5085 = vmatpush3.bf16.msra.mxu1 %v5447_v41  ;;  %1445 = vmatprep.mubr.bf16.mxu1 %v489_v61  ;;  %v4224_v41 = vld [vmem:[%s5715_s20 + $0x28] sm:$0xff]   ;;  %v5458_v61 = vld [vmem:[%s7075_s3 + $0x170] sm:$0xff]  }
  0x2a   : > { %5086 = vmatprep.subr.bf16.mxu1 %v5449_v49  ;;  %1107 = vmatprep.mubr.bf16.mxu0 %v5787_v9  ;;  %v4098_v45 = vunpack.c.l.bf16 %v4224_v41  ;;  %v4099_v46 = vunpack.c.h.bf16 %v4224_v41  ;;  %v5859_v47 = vpack.c.bf16 %v5846_v39, %v5844_v38  ;;  %v400_v48 = vrot.slane %v5844_v38, 7 }
  0x2b   : > { %5054 = vmatprep.subr.bf16.mxu0 %v5448_v10  ;;  %v5897_v7 = vpack.c.bf16 %v5880_v57, %v5876_v55  ;;  %v335_v41 = vmul.f32 %v4107_v28, %v5726_v33  ;;  %v449_v15 = vrot.slane %v5844_v38, 1  ;;  %v453_v25 = vrot.slane %v5880_v57, 1  ;;  %v5472_v38 = vld [vmem:[%s7075_s3 + $0x218] sm:$0xff]  }
  0x2c   : > { %5055 = vmatpush3.bf16.msra.mxu0 %v5448_v10  ;;  %v330_v58 = vmul.f32 %v4098_v45, %v5726_v33  ;;  %v331_v59 = vmul.f32 %v4099_v46, %v5726_v33  ;;  %v409_v46 = vrot.slane %v5949_v36, 7 }
  0x2d   : > { %5087 = vmatpush3.bf16.msra.mxu1 %v5449_v49  ;;  %5056 = vmatprep.subr.bf16.mxu0 %v5450_v22  ;;  %v401_v49 = vrot.slane %v5846_v39, 7 }
  0x2e   : > { %5088 = vmatprep.subr.bf16.mxu1 %v5451_v56  ;;  %v352_v10 = vadd.f32 %v5732_v37, %v330_v58  ;;  %v353_v11 = vadd.f32 %v5732_v37, %v331_v59 }
  0x2f   : > { %4257 = vmatmul.mubr.msk.bf16.gmra.mrb[4].mxu0 %vm5781_vm3, %v5816_v23 }
  0x30   : > { %4309 = vmatmul.mubr.msk.bf16.gmra.mrb[4].mxu1 %vm5781_vm3, %v4252_v8  ;;  %1115 = vmatprep.mubr.bf16.mxu0 %v5822_v27  ;;  %v404_v8 = vrot.slane %v5880_v57, 7  ;;  %v5922_v18 = vmax.f32 %v353_v11, 0.0 }
  0x31   : > { %1453 = vmatprep.mubr.bf16.mxu1 %v5787_v9  ;;  %5089 = vmatpush3.bf16.msra.mxu1 %v5451_v56  ;;  %v402_v56 = vsel %vm390_vm0, %v400_v48, %v401_v49  ;;  %v357_v49 = vadd.f32 %v5732_v37, %v335_v41 }
  0x32   : > { %5090 = vmatprep.subr.bf16.mxu1 %v5453_v17  ;;  %5057 = vmatpush3.bf16.msra.mxu0 %v5450_v22  ;;  %v5892_v1 = vpack.c.bf16 %v402_v56, %v400_v48  ;;  %v405_v16 = vsel %vm390_vm0, %v403_v2, %v404_v8  ;;  %v5462_v22 = vld [vmem:[%s7075_s3 + $0x1c0] sm:$0xff]   ;;  %v440_v56 = vrot.slane %v5752_v51, 1  ;;  %v443_v51 = vrot.slane %v5771_v63, 1 }
  0x33   : > { %5058 = vmatprep.subr.bf16.mxu0 %v5452_v31  ;;  %v5930_v24 = vpack.c.bf16 %v405_v16, %v403_v2  ;;  %v444_v2 = vrot.slane %v5773_v0, 1  ;;  %v446_v63 = vrot.slane %v5807_v19, 1  ;;  %v447_v0 = vrot.slane %v5809_v20, 1  ;;  %v5469_v20 = vld [vmem:[%s7075_s3 + $0x210] sm:$0xff]  }
  0x34   : > { %v450_v16 = vrot.slane %v5846_v39, 1  ;;  %v5467_v39 = vld [vmem:[%s7075_s3 + $0x188] sm:$0xff]  }
  0x35   : > { %5091 = vmatpush3.bf16.msra.mxu1 %v5453_v17  ;;  %v5920_v17 = vmax.f32 %v352_v10, 0.0  ;;  %v445_v10 = vsel %vm439_vm4, %v443_v51, %v444_v2  ;;  %v448_v19 = vsel %vm439_vm4, %v446_v63, %v447_v0 }
  0x36   : > { %5092 = vmatprep.subr.bf16.mxu1 %v5455_v32  ;;  %5059 = vmatpush3.bf16.msra.mxu0 %v5452_v31  ;;  %v407_v31 = vrot.slane %v5922_v18, 7  ;;  %v6014_v14 = vpack.c.bf16 %v444_v2, %v445_v10  ;;  %v451_v28 = vsel %vm439_vm4, %v449_v15, %v450_v16 }
  0x37   : > { %5060 = vmatprep.subr.bf16.mxu0 %v5454_v35  ;;  %4261 = vmatmul.mubr.msk.bf16.gmra.mrb[8].mxu0 %vm5781_vm3, %v5854_v43  ;;  %v5935_v29 = vpack.c.bf16 %v5922_v18, %v5920_v17  ;;  %v406_v30 = vrot.slane %v5920_v17, 7  ;;  %v6060_v57 = vpack.c.bf16 %v450_v16, %v451_v28  ;;  %v455_v34 = vrot.slane %v5920_v17, 1  ;;  %v5484_v28 = vld [vmem:[%s7075_s3 + $0x238] sm:$0xff]  }
  0x38   : > { %4313 = vmatmul.mubr.msk.bf16.gmra.mrb[8].mxu1 %vm5781_vm3, %v5816_v23  ;;  %1123 = vmatprep.mubr.bf16.mxu0 %v5859_v47 }
  0x39   : > { %1461 = vmatprep.mubr.bf16.mxu1 %v5822_v27  ;;  %5093 = vmatpush3.bf16.msra.mxu1 %v5455_v32  ;;  %v355_v32 = vadd.f32 %v5732_v37, %v333_v21  ;;  %v6036_v21 = vpack.c.bf16 %v447_v0, %v448_v19 }
  0x3a   : > { %5094 = vmatprep.subr.bf16.mxu1 %v5457_v42  ;;  %5061 = vmatpush3.bf16.msra.mxu0 %v5454_v35  ;;  %v408_v35 = vsel %vm390_vm0, %v406_v30, %v407_v31 }
  0x3b   : > { %5062 = vmatprep.subr.bf16.mxu0 %v5456_v53  ;;  %v5951_v40 = vmax.f32 %v355_v32, 0.0 }
  0x3d   : > { %5095 = vmatpush3.bf16.msra.mxu1 %v5457_v42  ;;  %v5955_v42 = vpack.c.bf16 %v408_v35, %v406_v30  ;;  %v5960_v45 = vpack.c.bf16 %v5951_v40, %v5949_v36  ;;  %v410_v48 = vrot.slane %v5951_v40, 7  ;;  %v5468_v30 = vld [vmem:[%s7075_s3 + $0x1d0] sm:$0xff]   ;;  %v456_v35 = vrot.slane %v5922_v18, 1 }
  0x3e   : > { %5096 = vmatprep.subr.bf16.mxu1 %v5459_v54  ;;  %5063 = vmatpush3.bf16.msra.mxu0 %v5456_v53  ;;  %v5973_v53 = vmax.f32 %v356_v44, 0.0  ;;  %v5470_v44 = vld [vmem:[%s7075_s3 + $0x190] sm:$0xff]  }
  0x3f   : > { %5064 = vmatprep.subr.bf16.mxu0 %v5458_v61  ;;  %4265 = vmatmul.mubr.msk.bf16.gmra.mrb[12].mxu0 %vm5781_vm3, %v5892_v1  ;;  %v411_v50 = vsel %vm390_vm0, %v409_v46, %v410_v48 }
  0x40   : > { %4317 = vmatmul.mubr.msk.bf16.gmra.mrb[12].mxu1 %vm5781_vm3, %v5854_v43  ;;  %1131 = vmatprep.mubr.bf16.mxu0 %v5897_v7  ;;  %v5979_v58 = vpack.c.bf16 %v411_v50, %v409_v46  ;;  %v412_v60 = vrot.slane %v5973_v53, 7  ;;  %v5475_v46 = vld [vmem:[%s7075_s3 + $0x220] sm:$0xff]   ;;  %v458_v50 = vrot.slane %v5949_v36, 1 }
  0x41   : > { %1469 = vmatprep.mubr.bf16.mxu1 %v5859_v47  ;;  %5097 = vmatpush3.bf16.msra.mxu1 %v5459_v54  ;;  %v5975_v54 = vmax.f32 %v357_v49, 0.0  ;;  %v4234_v49 = vld [vmem:[%s5715_s20 + $0x78] sm:$0xff]  }
  0x42   : > { %5098 = vmatprep.subr.bf16.mxu1 %v5461_v62  ;;  %5065 = vmatpush3.bf16.msra.mxu0 %v5458_v61  ;;  %v4138_v36 = vunpack.c.l.bf16 %v4234_v49 }
  0x43   : > { %5066 = vmatprep.subr.bf16.mxu0 %v5460_v12  ;;  %v5983_v59 = vpack.c.bf16 %v5975_v54, %v5973_v53  ;;  %v413_v61 = vrot.slane %v5975_v54, 7 }
  0x44   : > { %v583_v19 = vmul.f32 %v4138_v36, %v5726_v33  ;;  %v5491_v36 = vld [vmem:[%s7075_s3 + $0x150] sm:$0xff]  }
  0x45   : > { %5099 = vmatpush3.bf16.msra.mxu1 %v5461_v62  ;;  %v441_v62 = vrot.slane %v5754_v52, 1  ;;  %v414_v3 = vsel %vm390_vm0, %v412_v60, %v413_v61  ;;  %v457_v61 = vsel %vm439_vm4, %v455_v34, %v456_v35  ;;  %v5482_v34 = vld [vmem:[%s7075_s3 + $0x1b0] sm:$0xff]  }
  0x46   : > { %5116 = vmatprep.subr.bf16.mxu1 %v5908_v13  ;;  %5067 = vmatpush3.bf16.msra.mxu0 %v5460_v12  ;;  %v6000_v52 = vpack.c.bf16 %v414_v3, %v412_v60  ;;  %v5466_v12 = vld [vmem:[%s7075_s3 + $0x208] sm:$0xff]   ;;  %v5471_v60 = vld [vmem:[%s7075_s3 + $0x1d8] sm:$0xff]   ;;  %v4139_v3 = vunpack.c.h.bf16 %v4234_v49 }
  0x47   : > { %4732 = vmatprep.subr.bf16.mxu0 %v5462_v22  ;;  %4269 = vmatmul.mubr.msk.bf16.gmra.mrb[16].mxu0 %vm5781_vm3, %v5930_v24  ;;  %v442_v6 = vsel %vm439_vm4, %v440_v56, %v441_v62  ;;  %v452_v22 = vrot.slane %v5876_v55, 1  ;;  %v4233_v55 = vld [vmem:[%s5715_s20 + $0x70] sm:$0xff]   ;;  %v459_v56 = vrot.slane %v5951_v40, 1  ;;  %v5473_v40 = vld [vmem:[%s7075_s3 + $0x198] sm:$0xff]  }
  0x48   : > { %4321 = vmatmul.mubr.msk.bf16.gmra.mrb[16].mxu1 %vm5781_vm3, %v5892_v1  ;;  %1139 = vmatprep.mubr.bf16.mxu0 %v5935_v29  ;;  %v4283_v8 = vpack.c.bf16 %v441_v62, %v442_v6  ;;  %v4134_v32 = vunpack.c.l.bf16 %v4233_v55  ;;  %v4135_v41 = vunpack.c.h.bf16 %v4233_v55  ;;  %v5478_v62 = vld [vmem:[%s7075_s3 + $0x228] sm:$0xff]   ;;  %v6105_v6 = vpack.c.bf16 %v456_v35, %v457_v61  ;;  %v4227_v55 = vld [vmem:[%s5715_s20 + $0x40] sm:$0xff]  }
  0x49   : > { %1477 = vmatprep.mubr.bf16.mxu1 %v5897_v7  ;;  %v454_v31 = vsel %vm439_vm4, %v452_v22, %v453_v25  ;;  %v460_v10 = vsel %vm439_vm4, %v458_v50, %v459_v56  ;;  %v5477_v22 = vld [vmem:[%s7075_s3 + $0x1e8] sm:$0xff]   ;;  %v5486_v50 = vld [vmem:[%s7075_s3 + $0x100] sm:$0xff]  }
  0x4a   : > { %v6077_v48 = vpack.c.bf16 %v453_v25, %v454_v31  ;;  %v581_v17 = vmul.f32 %v4134_v32, %v5726_v33  ;;  %v582_v18 = vmul.f32 %v4135_v41, %v5726_v33  ;;  %v6123_v15 = vpack.c.bf16 %v459_v56, %v460_v10  ;;  %v6202_v56 = vld [vmem:[%s7073_s1] ss:$0 sm:$0xff] }
  0x4b   : > { %v461_v25 = vrot.slane %v5973_v53, 1  ;;  %v5480_v53 = vld [vmem:[%s7075_s3 + $0x1f0] sm:$0xff]   ;;  %v4110_v41 = vunpack.c.l.bf16 %v4227_v55  ;;  %v5488_v61 = vld [vmem:[%s7075_s3 + $0xc0] sm:$0xff]  }
  0x4c   : > { %v597_v51 = vadd.f32 %v5732_v37, %v581_v17  ;;  %v598_v2 = vadd.f32 %v5732_v37, %v582_v18  ;;  %v5485_v18 = vld [vmem:[%s7075_s3 + $0x1b8] sm:$0xff]   ;;  %v6229_v10 = vld [vmem:[%s7074_s2] ss:$0 sm:$0xff] }
  0x4e   : > { %v6111_v63 = vmax.f32 %v597_v51, 0.0  ;;  %v6113_v0 = vmax.f32 %v598_v2, 0.0 }
  0x4f   : > { %4273 = vmatmul.mubr.msk.bf16.gmra.mrb[20].mxu0 %vm5781_vm3, %v5955_v42 }
  0x50   : > { %4325 = vmatmul.mubr.msk.bf16.gmra.mrb[20].mxu1 %vm5781_vm3, %v5930_v24  ;;  %1147 = vmatprep.mubr.bf16.mxu0 %v5960_v45  ;;  %v6127_v16 = vpack.c.bf16 %v6113_v0, %v6111_v63  ;;  %v651_v17 = vrot.slane %v6111_v63, 7  ;;  %v652_v49 = vrot.slane %v6113_v0, 7 }
  0x51   : > { %1485 = vmatprep.mubr.bf16.mxu1 %v5935_v29 }
  0x52   : > { %v653_v51 = vsel %vm390_vm0, %v651_v17, %v652_v49 }
  0x57   : > { %4277 = vmatmul.mubr.msk.bf16.gmra.mrb[24].mxu0 %vm5781_vm3, %v5979_v58 }
  0x58   : > { %4329 = vmatmul.mubr.msk.bf16.gmra.mrb[24].mxu1 %vm5781_vm3, %v5955_v42  ;;  %1155 = vmatprep.mubr.bf16.mxu0 %v5983_v59 }
  0x59   : > { %1493 = vmatprep.mubr.bf16.mxu1 %v5960_v45 }
  0x5f   : > { %4281 = vmatmul.mubr.msk.bf16.gmra.mrb[28].mxu0 %vm5781_vm3, %v6000_v52 }
  0x60   : > { %4333 = vmatmul.mubr.msk.bf16.gmra.mrb[28].mxu1 %vm5781_vm3, %v5979_v58  ;;  %5068 = vmatprep.mubr.msk.bf16.mxu0 %vm6005_vm5, %v4283_v8 }
  0x61   : > { %5100 = vmatprep.mubr.bf16.mxu1 %v5568_v4 }
  0x67   : > { %5069 = vmatmul.mubr.msk.bf16.vlgmr.msra.gmra.mrb[32].mxu0 %vm6005_vm5, %v6014_v14 }
  0x68   : > { %5101 = vmatmul.mubr.msk.bf16.vlgmr.msra.gmra.mrb[32].mxu1 %vm6005_vm5, %v4283_v8  ;;  %5072 = vmatprep.mubr.msk.bf16.mxu0 %vm6005_vm5, %v6036_v21  ;;  %v5474_v8 = vld [vmem:[%s7075_s3 + $0x1e0] sm:$0xff]  }
  0x69   : > { %5117 = vmatpush3.bf16.msra.mxu1 %v5908_v13  ;;  %5104 = vmatprep.mubr.msk.bf16.mxu1 %vm6005_vm5, %v6014_v14  ;;  %v5464_v13 = vld [vmem:[%s7075_s3 + $0x180] sm:$0xff]  }
  0x6a   : > { %5118 = vmatprep.subr.bf16.mxu1 %v5466_v12  ;;  %4733 = vmatpush3.bf16.msra.mxu0 %v5464_v13  ;;  %v5476_v13 = vld [vmem:[%s7075_s3 + $0x1a0] sm:$0xff]  }
  0x6b   : > { %4734 = vmatprep.subr.bf16.mxu0 %v5465_v26  ;;  %v462_v26 = vrot.slane %v5975_v54, 1 }
  0x6d   : > { %5119 = vmatpush3.bf16.msra.mxu1 %v5466_v12  ;;  %v5481_v12 = vld [vmem:[%s7075_s3 + $0x230] sm:$0xff]   ;;  %v463_v54 = vsel %vm439_vm4, %v461_v25, %v462_v26 }
  0x6e   : > { %5120 = vmatprep.subr.bf16.mxu1 %v5469_v20  ;;  %4735 = vmatpush3.bf16.msra.mxu0 %v5467_v39  ;;  %v6169_v32 = vpack.c.bf16 %v462_v26, %v463_v54  ;;  %v5493_v26 = vld [vmem:[%s7075_s3 + $0x158] sm:$0xff]  }
  0x6f   : > { %4736 = vmatprep.subr.bf16.mxu0 %v5468_v30  ;;  %5073 = vmatmul.mubr.msk.bf16.gmra.mrb[36].mxu0 %vm6005_vm5, %v6060_v57 }
  0x70   : > { %5105 = vmatmul.mubr.msk.bf16.gmra.mrb[36].mxu1 %vm6005_vm5, %v6036_v21  ;;  %5076 = vmatprep.mubr.msk.bf16.mxu0 %vm6005_vm5, %v6077_v48 }
  0x71   : > { %5121 = vmatpush3.bf16.msra.mxu1 %v5469_v20  ;;  %5108 = vmatprep.mubr.msk.bf16.mxu1 %vm6005_vm5, %v6060_v57  ;;  %v584_v20 = vmul.f32 %v4139_v3, %v5726_v33  ;;  %v5479_v33 = vld [vmem:[%s7075_s3 + $0x1a8] sm:$0xff]   ;;  %v6219_v3 = vpack.c.bf16 %v653_v51, %v651_v17  ;;  %v5502_v51 = vld [vmem:[%s7075_s3 + $0x120] sm:$0xff]  }
  0x72   : > { %5122 = vmatprep.subr.bf16.mxu1 %v5472_v38  ;;  %4737 = vmatpush3.bf16.msra.mxu0 %v5470_v44  ;;  %v4111_v44 = vunpack.c.h.bf16 %v4227_v55 }
  0x73   : > { %4738 = vmatprep.subr.bf16.mxu0 %v5471_v60  ;;  %v600_v39 = vadd.f32 %v5732_v37, %v584_v20  ;;  %v569_v60 = vmul.f32 %v6202_v56, %v4110_v41 }
  0x75   : > { %5123 = vmatpush3.bf16.msra.mxu1 %v5472_v38  ;;  %v599_v38 = vadd.f32 %v5732_v37, %v583_v19  ;;  %v5487_v37 = vld [vmem:[%s7075_s3 + $0x140] sm:$0xff]   ;;  %v6167_v31 = vmax.f32 %v600_v39, 0.0 }
  0x76   : > { %5124 = vmatprep.subr.bf16.mxu1 %v5475_v46  ;;  %4739 = vmatpush3.bf16.msra.mxu0 %v5473_v40  ;;  %v4229_v40 = vld [vmem:[%s5715_s20 + $0x50] sm:$0xff]  }
  0x77   : > { %4740 = vmatprep.subr.bf16.mxu0 %v5474_v8  ;;  %5077 = vmatmul.mubr.msk.bf16.gmra.mrb[40].mxu0 %vm6005_vm5, %v6105_v6  ;;  %v6165_v30 = vmax.f32 %v599_v38, 0.0  ;;  %v655_v2 = vrot.slane %v6167_v31, 7  ;;  %v5494_v38 = vld [vmem:[%s7075_s3 + $0x110] sm:$0xff]  }
  0x78   : > { %5109 = vmatmul.mubr.msk.bf16.gmra.mrb[40].mxu1 %vm6005_vm5, %v6077_v48  ;;  %5080 = vmatprep.mubr.msk.bf16.mxu0 %vm6005_vm5, %v6123_v15 }
  0x79   : > { %5125 = vmatpush3.bf16.msra.mxu1 %v5475_v46  ;;  %5112 = vmatprep.mubr.msk.bf16.mxu1 %vm6005_vm5, %v6105_v6  ;;  %v6176_v35 = vpack.c.bf16 %v6167_v31, %v6165_v30  ;;  %v5489_v46 = vld [vmem:[%s7075_s3 + $0x148] sm:$0xff]  }
  0x7a   : > { %5126 = vmatprep.subr.bf16.mxu1 %v5478_v62  ;;  %4741 = vmatpush3.bf16.msra.mxu0 %v5476_v13  ;;  %v5492_v13 = vld [vmem:[%s7075_s3 + $0xc8] sm:$0xff]  }
  0x7b   : > { %4742 = vmatprep.subr.bf16.mxu0 %v5477_v22 }
  0x7d   : > { %5127 = vmatpush3.bf16.msra.mxu1 %v5478_v62  ;;  %v4228_v62 = vld [vmem:[%s5715_s20 + $0x48] sm:$0xff]  }
  0x7e   : > { %5128 = vmatprep.subr.bf16.mxu1 %v5481_v12  ;;  %4743 = vmatpush3.bf16.msra.mxu0 %v5479_v33  ;;  %v4114_v19 = vunpack.c.l.bf16 %v4228_v62  ;;  %v4115_v25 = vunpack.c.h.bf16 %v4228_v62  ;;  %v4118_v33 = vunpack.c.l.bf16 %v4229_v40  ;;  %v5500_v62 = vld [vmem:[%s7075_s3 + $0xd8] sm:$0xff]  }
  0x7f   : > { %4744 = vmatprep.subr.bf16.mxu0 %v5480_v53  ;;  %5081 = vmatmul.mubr.msk.bf16.gmra.mrb[44].mxu0 %vm6005_vm5, %v6169_v32 }
  0x80   : > { %5113 = vmatmul.mubr.msk.bf16.gmra.mrb[44].mxu1 %vm6005_vm5, %v6123_v15  ;;  %1849 = vmatprep.mubr.bf16.mxu0 %v5787_v9  ;;  %v654_v9 = vrot.slane %v6165_v30, 7  ;;  %v571_v53 = vmul.f32 %v6202_v56, %v4114_v19  ;;  %v572_v54 = vmul.f32 %v6202_v56, %v4115_v25  ;;  %v573_v55 = vmul.f32 %v6202_v56, %v4118_v33  ;;  %v5506_v33 = vld [vmem:[%s7075_s3 + $0x128] sm:$0xff]  }
  0x81   : > { %5129 = vmatpush3.bf16.msra.mxu1 %v5481_v12  ;;  %5132 = vmatprep.mubr.msk.bf16.mxu1 %vm6005_vm5, %v6014_v14  ;;  %v5483_v14 = vld [vmem:[%s7075_s3 + $0x1f8] sm:$0xff]   ;;  %v585_v12 = vadd.f32 %v6229_v10, %v569_v60 }
  0x82   : > { %5130 = vmatprep.subr.bf16.mxu1 %v5484_v28  ;;  %4745 = vmatpush3.bf16.msra.mxu0 %v5482_v34  ;;  %v656_v8 = vsel %vm390_vm0, %v654_v9, %v655_v2  ;;  %v587_v41 = vadd.f32 %v6229_v10, %v571_v53  ;;  %v589_v60 = vadd.f32 %v6229_v10, %v573_v55 }
  0x83   : > { %4746 = vmatprep.subr.bf16.mxu0 %v5483_v14  ;;  %v6232_v20 = vpack.c.bf16 %v656_v8, %v654_v9  ;;  %v6254_v39 = vmax.f32 %v585_v12, 0.0  ;;  %v4231_v14 = vld [vmem:[%s5715_s20 + $0x60] sm:$0xff]   ;;  %v4232_v8 = vld [vmem:[%s5715_s20 + $0x68] sm:$0xff]  }
  0x84   : > { %v6298_v2 = vmax.f32 %v587_v41, 0.0  ;;  %v4130_v53 = vunpack.c.l.bf16 %v4232_v8  ;;  %v5510_v41 = vld [vmem:[%s7075_s3 + $0x130] sm:$0xff]  }
  0x85   : > { %5131 = vmatpush3.bf16.msra.mxu1 %v5484_v28  ;;  %v4119_v28 = vunpack.c.h.bf16 %v4229_v40 }
  0x86   : > { %5148 = vmatprep.subr.bf16.mxu1 %v5487_v37  ;;  %4747 = vmatpush3.bf16.msra.mxu0 %v5485_v18  ;;  %v588_v18 = vadd.f32 %v6229_v10, %v572_v54  ;;  %v4131_v54 = vunpack.c.h.bf16 %v4232_v8 }
  0x87   : > { %4812 = vmatprep.subr.bf16.mxu0 %v5486_v50  ;;  %v574_v34 = vmul.f32 %v6202_v56, %v4119_v28  ;;  %v5497_v50 = vld [vmem:[%s7075_s3 + $0x168] sm:$0xff]  }
  0x88   : > { %5133 = vmatmul.mubr.msk.bf16.vlgmr.msra.gmra.mrb[32].mxu1 %vm6005_vm5, %v6036_v21  ;;  %v570_v21 = vmul.f32 %v6202_v56, %v4111_v44 }
  0x89   : > { %5149 = vmatpush3.bf16.msra.mxu1 %v5487_v37  ;;  %5136 = vmatprep.mubr.msk.bf16.mxu1 %vm6005_vm5, %v6060_v57  ;;  %v5490_v57 = vld [vmem:[%s7075_s3 + $0x108] sm:$0xff]   ;;  %v4230_v37 = vld [vmem:[%s5715_s20 + $0x58] sm:$0xff]   ;;  %v590_v9 = vadd.f32 %v6229_v10, %v574_v34 }
  0x8a   : > { %5150 = vmatprep.subr.bf16.mxu1 %v5489_v46  ;;  %v586_v22 = vadd.f32 %v6229_v10, %v570_v21  ;;  %4358 = vmatmul.mubr.msk.bf16.vlgmr.msra.gmra.mrb[48].mxu0 %vm5781_vm3, %v5816_v23  ;;  %v5495_v23 = vld [vmem:[%s7075_s3 + $0x160] sm:$0xff]   ;;  %v4122_v44 = vunpack.c.l.bf16 %v4230_v37  ;;  %v4123_v49 = vunpack.c.h.bf16 %v4230_v37  ;;  %v4127_v21 = vunpack.c.h.bf16 %v4231_v14  ;;  %v5501_v37 = vld [vmem:[%s7075_s3 + $0x178] sm:$0xff]  }
  0x8b   : > { %4813 = vmatpush3.bf16.msra.mxu0 %v5488_v61  ;;  %1857 = vmatprep.mubr.bf16.mxu0 %v5822_v27  ;;  %v4126_v61 = vunpack.c.l.bf16 %v4231_v14  ;;  %v6311_v12 = vmax.f32 %v590_v9, 0.0  ;;  %v5512_v9 = vld [vmem:[%s7075_s3 + $0xf0] sm:$0xff]  }
  0x8c   : > { %4814 = vmatprep.subr.bf16.mxu0 %v5490_v57  ;;  %v6260_v27 = vmax.f32 %v586_v22, 0.0  ;;  %v576_v40 = vmul.f32 %v6202_v56, %v4123_v49  ;;  %v6309_v57 = vmax.f32 %v589_v60, 0.0  ;;  %v5504_v22 = vld [vmem:[%s7075_s3 + $0xe0] sm:$0xff]  }
  0x8d   : > { %5151 = vmatpush3.bf16.msra.mxu1 %v5489_v46  ;;  %v681_v46 = vrot.slane %v6254_v39, 1  ;;  %v577_v19 = vmul.f32 %v6202_v56, %v4126_v61  ;;  %v688_v55 = vrot.slane %v6311_v12, 1 }
  0x8e   : > { %5152 = vmatprep.subr.bf16.mxu1 %v5491_v36  ;;  %v682_v17 = vrot.slane %v6260_v27, 1 }
  0x8f   : > { %4815 = vmatpush3.bf16.msra.mxu0 %v5492_v13  ;;  %v578_v13 = vmul.f32 %v6202_v56, %v4127_v21  ;;  %v593_v34 = vadd.f32 %v6229_v10, %v577_v19  ;;  %v5514_v21 = vld [vmem:[%s7075_s3 + $0x138] sm:$0xff]  }
  0x90   : > { %5137 = vmatmul.mubr.msk.bf16.gmra.mrb[36].mxu1 %vm6005_vm5, %v6077_v48  ;;  %v5496_v48 = vld [vmem:[%s7075_s3 + $0xd0] sm:$0xff]   ;;  %4816 = vmatprep.subr.bf16.mxu0 %v5494_v38 }
  0x91   : > { %5153 = vmatpush3.bf16.msra.mxu1 %v5491_v36  ;;  %5140 = vmatprep.mubr.msk.bf16.mxu1 %vm6005_vm5, %v6105_v6  ;;  %v5498_v6 = vld [vmem:[%s7075_s3 + $0x118] sm:$0xff]   ;;  %v6305_v36 = vmax.f32 %v588_v18, 0.0  ;;  %v594_v14 = vadd.f32 %v6229_v10, %v578_v13  ;;  %v5503_v18 = vld [vmem:[%s7075_s3 + $0x80] sm:$0xff]  }
  0x92   : > { %5154 = vmatprep.subr.bf16.mxu1 %v5493_v26  ;;  %4362 = vmatmul.mubr.msk.bf16.gmra.mrb[52].mxu0 %vm5781_vm3, %v5854_v43  ;;  %v5499_v43 = vld [vmem:[%s7075_s3 + $0x170] sm:$0xff]  }
  0x93   : > { %1865 = vmatprep.mubr.bf16.mxu0 %v5859_v47  ;;  %4817 = vmatpush3.bf16.msra.mxu0 %v5496_v48  ;;  %v575_v47 = vmul.f32 %v6202_v56, %v4122_v44  ;;  %v685_v38 = vrot.slane %v6305_v36, 1  ;;  %v687_v48 = vrot.slane %v6309_v57, 1  ;;  %v6363_v60 = vmax.f32 %v594_v14, 0.0  ;;  %v5513_v14 = vld [vmem:[%s7075_s3 + $0xa8] sm:$0xff]  }
  0x94   : > { %4818 = vmatprep.subr.bf16.mxu0 %v5498_v6 }
  0x95   : > { %5155 = vmatpush3.bf16.msra.mxu1 %v5493_v26  ;;  %v684_v26 = vrot.slane %v6298_v2, 1  ;;  %v591_v28 = vadd.f32 %v6229_v10, %v575_v47  ;;  %v689_v49 = vsel %vm439_vm4, %v687_v48, %v688_v55  ;;  %v694_v8 = vrot.slane %v6363_v60, 1 }
  0x96   : > { %5156 = vmatprep.subr.bf16.mxu1 %v5495_v23 }
  0x97   : > { %4819 = vmatpush3.bf16.msra.mxu0 %v5500_v62  ;;  %v6344_v6 = vmax.f32 %v591_v28, 0.0  ;;  %v6374_v62 = vpack.c.bf16 %v688_v55, %v689_v49  ;;  %v702_v55 = vrot.slane %v6165_v30, 1  ;;  %v5523_v49 = vld [vmem:[%s7075_s3 + $0x188] sm:$0xff]  }
  0x98   : > { %5141 = vmatmul.mubr.msk.bf16.gmra.mrb[40].mxu1 %vm6005_vm5, %v6123_v15  ;;  %v683_v15 = vsel %vm439_vm4, %v681_v46, %v682_v17  ;;  %4820 = vmatprep.subr.bf16.mxu0 %v5502_v51  ;;  %v579_v46 = vmul.f32 %v6202_v56, %v4130_v53  ;;  %v5509_v53 = vld [vmem:[%s7075_s3 + $0x98] sm:$0xff]  }
  0x99   : > { %5157 = vmatpush3.bf16.msra.mxu1 %v5495_v23  ;;  %5144 = vmatprep.mubr.msk.bf16.mxu1 %vm6005_vm5, %v6169_v32  ;;  %v6318_v25 = vpack.c.bf16 %v682_v17, %v683_v15  ;;  %v592_v23 = vadd.f32 %v6229_v10, %v576_v40  ;;  %v580_v17 = vmul.f32 %v6202_v56, %v4131_v54  ;;  %v690_v56 = vrot.slane %v6344_v6, 1  ;;  %v5505_v15 = vld [vmem:[%s7075_s3 + $0x88] sm:$0xff]  }
  0x9a   : > { %5158 = vmatprep.subr.bf16.mxu1 %v5497_v50  ;;  %4366 = vmatmul.mubr.msk.bf16.gmra.mrb[56].mxu0 %vm5781_vm3, %v5892_v1  ;;  %v5508_v1 = vld [vmem:[%s7075_s3 + $0xe8] sm:$0xff]   ;;  %v595_v51 = vadd.f32 %v6229_v10, %v579_v46  ;;  %v699_v54 = vrot.slane %v6111_v63, 1  ;;  %v5511_v63 = vld [vmem:[%s7075_s3 + $0xa0] sm:$0xff]   ;;  %v5517_v46 = vld [vmem:[%s7075_s3 + $0xb8] sm:$0xff]  }
  0x9b   : > { %1873 = vmatprep.mubr.bf16.mxu0 %v5897_v7  ;;  %4821 = vmatpush3.bf16.msra.mxu0 %v5504_v22  ;;  %v686_v7 = vsel %vm439_vm4, %v684_v26, %v685_v38  ;;  %v6353_v44 = vmax.f32 %v592_v23, 0.0  ;;  %v596_v47 = vadd.f32 %v6229_v10, %v580_v17  ;;  %v5516_v10 = vld [vmem:[%s7075_s3 + $0xf8] sm:$0xff]   ;;  %v5507_v22 = vld [vmem:[%s7075_s3 + $0x90] sm:$0xff]  }
  0x9c   : > { %4822 = vmatprep.subr.bf16.mxu0 %v5506_v33  ;;  %v6368_v61 = vpack.c.bf16 %v685_v38, %v686_v7  ;;  %v6401_v19 = vmax.f32 %v595_v51, 0.0  ;;  %v5524_v51 = vld [vmem:[%s7075_s3 + $0x48] sm:$0xff]  }
  0x9d   : > { %5159 = vmatpush3.bf16.msra.mxu1 %v5497_v50  ;;  %v6361_v50 = vmax.f32 %v593_v34, 0.0  ;;  %v6403_v13 = vmax.f32 %v596_v47, 0.0  ;;  %v703_v34 = vrot.slane %v6167_v31, 1  ;;  %v6460_v31 = vpack.c.bf16 %v6260_v27, %v6254_v39  ;;  %v5527_v47 = vld [vmem:[%s7075_s3 + $0x190] sm:$0xff]  }
  0x9e   : > { %5160 = vmatprep.subr.bf16.mxu1 %v5499_v43  ;;  %v696_v38 = vrot.slane %v6401_v19, 1 }
  0x9f   : > { %4823 = vmatpush3.bf16.msra.mxu0 %v5508_v1  ;;  %v693_v40 = vrot.slane %v6361_v50, 1  ;;  %v697_v23 = vrot.slane %v6403_v13, 1  ;;  %v704_v30 = vsel %vm439_vm4, %v702_v55, %v703_v34  ;;  %v633_v1 = vrot.slane %v6254_v39, 7 }
  0xa0   : > { %5145 = vmatmul.mubr.msk.bf16.gmra.mrb[44].mxu1 %vm6005_vm5, %v6318_v25  ;;  %4824 = vmatprep.subr.bf16.mxu0 %v5510_v41  ;;  %v634_v41 = vrot.slane %v6260_v27, 7  ;;  %v6464_v7 = vpack.c.bf16 %v703_v34, %v704_v30  ;;  %v5519_v27 = vld [vmem:[%s7075_s3 + $0x1c0] sm:$0xff]   ;;  %v6595_v55 = vpack.c.bf16 %v6353_v44, %v6344_v6  ;;  %v642_v34 = vrot.slane %v6344_v6, 7  ;;  %v5540_v6 = vld [vmem:[%s7075_s3 + $0x1f8] sm:$0xff]  }
  0xa1   : > { %5161 = vmatpush3.bf16.msra.mxu1 %v5499_v43  ;;  %5164 = vmatprep.mubr.msk.bf16.mxu1 %vm6005_vm5, %v6318_v25  ;;  %v691_v43 = vrot.slane %v6353_v44, 1  ;;  %v695_v26 = vsel %vm439_vm4, %v693_v40, %v694_v8  ;;  %v5530_v40 = vld [vmem:[%s7075_s3 + $0x50] sm:$0xff]   ;;  %v5543_v30 = vld [vmem:[%s7075_s3 + $0x20] sm:$0xff]  }
  0xa2   : > { %5162 = vmatprep.subr.bf16.mxu1 %v5501_v37  ;;  %4370 = vmatmul.mubr.msk.bf16.gmra.mrb[60].mxu0 %vm5781_vm3, %v5930_v24  ;;  %v5518_v24 = vld [vmem:[%s7075_s3 + $0x40] sm:$0xff]   ;;  %v6411_v28 = vpack.c.bf16 %v694_v8, %v695_v26  ;;  %v635_v17 = vsel %vm390_vm0, %v633_v1, %v634_v41  ;;  %v5529_v8 = vld [vmem:[%s7075_s3 + $0x198] sm:$0xff]   ;;  %v640_v26 = vrot.slane %v6311_v12, 7  ;;  %v5546_v41 = vld [vmem:[%s7075_s3 + $0x28] sm:$0xff]  }
  0xa3   : > { %1881 = vmatprep.mubr.bf16.mxu0 %v5935_v29  ;;  %4825 = vmatpush3.bf16.msra.mxu0 %v5512_v9  ;;  %v692_v29 = vsel %vm439_vm4, %v690_v56, %v691_v43  ;;  %v6480_v39 = vpack.c.bf16 %v635_v17, %v633_v1  ;;  %v5525_v9 = vld [vmem:[%s7075_s3 + $0x1d0] sm:$0xff]   ;;  %v5520_v56 = vld [vmem:[%s7075_s3] sm:$0xff]   ;;  %v5541_v17 = vld [vmem:[%s7075_s3 + $0x1b8] sm:$0xff]  }
  0xa4   : > { %4826 = vmatprep.subr.bf16.mxu0 %v5514_v21  ;;  %v6409_v33 = vpack.c.bf16 %v691_v43, %v692_v29  ;;  %v636_v21 = vrot.slane %v6298_v2, 7  ;;  %v637_v43 = vrot.slane %v6305_v36, 7  ;;  %v6552_v29 = vpack.c.bf16 %v6311_v12, %v6309_v57  ;;  %v5539_v1 = vld [vmem:[%s7075_s3 + $0x1b0] sm:$0xff]  }
  0xa5   : > { %5163 = vmatpush3.bf16.msra.mxu1 %v5501_v37  ;;  %v700_v37 = vrot.slane %v6113_v0, 1 }
  0xa6   : > { %5180 = vmatprep.subr.bf16.mxu1 %v5503_v18 }
  0xa7   : > { %4827 = vmatpush3.bf16.msra.mxu0 %v5516_v10  ;;  %v701_v0 = vsel %vm439_vm4, %v699_v54, %v700_v37  ;;  %v5538_v54 = vld [vmem:[%s7075_s3 + $0x18] sm:$0xff]  }
  0xa8   : > { %5165 = vmatmul.mubr.msk.bf16.vlgmr.msra.gmra.mrb[48].mxu1 %vm6005_vm5, %v6368_v61  ;;  %4892 = vmatprep.subr.bf16.mxu0 %v5518_v24  ;;  %v5531_v24 = vld [vmem:[%s7075_s3 + $0x1e0] sm:$0xff]  }
  0xa9   : > { %5181 = vmatpush3.bf16.msra.mxu1 %v5503_v18  ;;  %5168 = vmatprep.mubr.msk.bf16.mxu1 %vm6005_vm5, %v6374_v62  ;;  %v5521_v18 = vld [vmem:[%s7075_s3 + $0x180] sm:$0xff]  }
  0xaa   : > { %5182 = vmatprep.subr.bf16.mxu1 %v5505_v15  ;;  %4374 = vmatmul.mubr.msk.bf16.gmra.mrb[64].mxu0 %vm5781_vm3, %v5955_v42  ;;  %v698_v42 = vsel %vm439_vm4, %v696_v38, %v697_v23  ;;  %v5532_v38 = vld [vmem:[%s7075_s3 + $0x10] sm:$0xff]  }
  0xab   : > { %1889 = vmatprep.mubr.bf16.mxu0 %v5960_v45  ;;  %v6435_v48 = vpack.c.bf16 %v697_v23, %v698_v42  ;;  %v6437_v45 = vpack.c.bf16 %v700_v37, %v701_v0  ;;  %v5536_v23 = vld [vmem:[%s7075_s3 + $0x58] sm:$0xff]   ;;  %v5542_v37 = vld [vmem:[%s7075_s3 + $0x60] sm:$0xff]   ;;  %v5535_v42 = vld [vmem:[%s7075_s3 + $0x1a8] sm:$0xff]  }
  0xac   : > { %v5537_v0 = vld [vmem:[%s7075_s3 + $0x1f0] sm:$0xff]  }
  0xad   : > { %5183 = vmatpush3.bf16.msra.mxu1 %v5505_v15  ;;  %v5526_v15 = vld [vmem:[%s7075_s3 + $0x8] sm:$0xff]  }
  0xae   : > { %5184 = vmatprep.subr.bf16.mxu1 %v5507_v22 }
  0xb0   : > { %5169 = vmatmul.mubr.msk.bf16.gmra.mrb[52].mxu1 %vm6005_vm5, %v6409_v33 }
  0xb1   : > { %5185 = vmatpush3.bf16.msra.mxu1 %v5507_v22  ;;  %5172 = vmatprep.mubr.msk.bf16.mxu1 %vm6005_vm5, %v6411_v28  ;;  %v639_v22 = vrot.slane %v6309_v57, 7  ;;  %v5534_v57 = vld [vmem:[%s7075_s3 + $0x1e8] sm:$0xff]  }
  0xb2   : > { %5186 = vmatprep.subr.bf16.mxu1 %v5509_v53  ;;  %4378 = vmatmul.mubr.msk.bf16.gmra.mrb[68].mxu0 %vm5781_vm3, %v5979_v58  ;;  %v5515_v58 = vld [vmem:[%s7075_s3 + $0xb0] sm:$0xff]  }
  0xb3   : > { %1897 = vmatprep.mubr.bf16.mxu0 %v5983_v59  ;;  %v641_v12 = vsel %vm390_vm0, %v639_v22, %v640_v26 }
  0xb5   : > { %5187 = vmatpush3.bf16.msra.mxu1 %v5509_v53  ;;  %v5533_v53 = vld [vmem:[%s7075_s3 + $0x1a0] sm:$0xff]  }
  0xb6   : > { %5188 = vmatprep.subr.bf16.mxu1 %v5511_v63 }
  0xb8   : > { %5173 = vmatmul.mubr.msk.bf16.gmra.mrb[56].mxu1 %vm6005_vm5, %v6435_v48 }
  0xb9   : > { %5189 = vmatpush3.bf16.msra.mxu1 %v5511_v63  ;;  %5176 = vmatprep.mubr.msk.bf16.mxu1 %vm6005_vm5, %v6437_v45  ;;  %v6588_v63 = vpack.c.bf16 %v641_v12, %v639_v22 }
  0xba   : > { %5190 = vmatprep.subr.bf16.mxu1 %v5513_v14  ;;  %4382 = vmatmul.mubr.msk.bf16.gmra.mrb[72].mxu0 %vm5781_vm3, %v6000_v52 }
  0xbb   : > { %1905 = vmatprep.mubr.bf16.mxu0 %v6460_v31 }
  0xbd   : > { %5191 = vmatpush3.bf16.msra.mxu1 %v5513_v14  ;;  %v643_v14 = vrot.slane %v6353_v44, 7 }
  0xbe   : > { %5192 = vmatprep.subr.bf16.mxu1 %v5515_v58 }
  0xbf   : > { %v644_v44 = vsel %vm390_vm0, %v642_v34, %v643_v14 }
  0xc0   : > { %5177 = vmatmul.mubr.msk.bf16.gmra.mrb[60].mxu1 %vm6005_vm5, %v6464_v7 }
  0xc1   : > { %5193 = vmatpush3.bf16.msra.mxu1 %v5515_v58  ;;  %5196 = vmatprep.mubr.msk.bf16.mxu1 %vm6005_vm5, %v6169_v32  ;;  %v5522_v32 = vld [vmem:[%s7075_s3 + $0x1c8] sm:$0xff]  }
  0xc2   : > { %5194 = vmatprep.subr.bf16.mxu1 %v5517_v46  ;;  %4386 = vmatmul.mubr.msk.bf16.gmra.mrb[76].mxu0 %vm5781_vm3, %v6480_v39  ;;  %v5545_v58 = vld [vmem:[%s7075_s3 + $0x68] sm:$0xff]  }
  0xc3   : > { %2488 = vmatprep.mubr.bf16.mxu0 %v6460_v31 }
  0xc5   : > { %5195 = vmatpush3.bf16.msra.mxu1 %v5517_v46  ;;  %v5548_v46 = vld [vmem:[%s7075_s3 + $0x70] sm:$0xff]  }
  0xc6   : > { %4972 = vmatprep.subr.bf16.mxu1 %v5519_v27  ;;  %v6629_v27 = vpack.c.bf16 %v644_v44, %v642_v34 }
  0xc8   : > { %5197 = vmatmul.mubr.msk.bf16.vlgmr.msra.gmra.mrb[48].mxu1 %vm6005_vm5, %v6318_v25  ;;  %v6512_v25 = vpack.c.bf16 %v6305_v36, %v6298_v2  ;;  %v5528_v2 = vld [vmem:[%s7075_s3 + $0x1d8] sm:$0xff]   ;;  %v638_v36 = vsel %vm390_vm0, %v636_v21, %v637_v43 }
  0xc9   : > { %4973 = vmatpush3.bf16.msra.mxu1 %v5521_v18  ;;  %5200 = vmatprep.mubr.msk.bf16.mxu1 %vm6005_vm5, %v6368_v61  ;;  %v6545_v10 = vpack.c.bf16 %v638_v36, %v636_v21  ;;  %v5544_v18 = vld [vmem:[%s7075_s3 + $0x200] sm:$0xff]   ;;  %v5551_v21 = vld [vmem:[%s7075_s3 + $0x78] sm:$0xff]   ;;  %v648_v36 = vrot.slane %v6401_v19, 7 }
  0xca   : > { %4974 = vmatprep.subr.bf16.mxu1 %v5522_v32  ;;  %4414 = vmatmul.mubr.msk.bf16.vlgmr.msra.gmra.mrb[80].mxu0 %vm5781_vm3, %v6480_v39  ;;  %v6636_v32 = vpack.c.bf16 %v6363_v60, %v6361_v50  ;;  %v5552_v43 = vld [vmem:[%s7075_s3 + $0x38] sm:$0xff]  }
  0xcb   : > { %4893 = vmatpush3.bf16.msra.mxu0 %v5520_v56  ;;  %2496 = vmatprep.mubr.bf16.mxu0 %v6512_v25  ;;  %v5549_v56 = vld [vmem:[%s7075_s3 + $0x30] sm:$0xff]  }
  0xcc   : > { %4894 = vmatprep.subr.bf16.mxu0 %v5524_v51 }
  0xcd   : > { %4975 = vmatpush3.bf16.msra.mxu1 %v5523_v49  ;;  %v645_v49 = vrot.slane %v6361_v50, 7  ;;  %v5547_v50 = vld [vmem:[%s7075_s3 + $0x208] sm:$0xff]  }
  0xce   : > { %4976 = vmatprep.subr.bf16.mxu1 %v5525_v9  ;;  %v646_v9 = vrot.slane %v6363_v60, 7 }
  0xcf   : > { %4895 = vmatpush3.bf16.msra.mxu0 %v5526_v15  ;;  %v649_v15 = vrot.slane %v6403_v13, 7 }
  0xd0   : > { %5201 = vmatmul.mubr.msk.bf16.gmra.mrb[52].mxu1 %vm6005_vm5, %v6374_v62  ;;  %4896 = vmatprep.subr.bf16.mxu0 %v5530_v40  ;;  %v647_v60 = vsel %vm390_vm0, %v645_v49, %v646_v9  ;;  %v5553_v40 = vld [vmem:[%s7075_s3 + $0x218] sm:$0xff]  }
  0xd1   : > { %4977 = vmatpush3.bf16.msra.mxu1 %v5527_v47  ;;  %5204 = vmatprep.mubr.msk.bf16.mxu1 %vm6005_vm5, %v6409_v33  ;;  %v6661_v51 = vpack.c.bf16 %v647_v60, %v645_v49  ;;  %v5550_v47 = vld [vmem:[%s7075_s3 + $0x210] sm:$0xff]  }
  0xd2   : > { %4978 = vmatprep.subr.bf16.mxu1 %v5528_v2  ;;  %4418 = vmatmul.mubr.msk.bf16.gmra.mrb[84].mxu0 %vm5781_vm3, %v6545_v10  ;;  %v6668_v2 = vpack.c.bf16 %v6403_v13, %v6401_v19  ;;  %v5554_v13 = vld [vmem:[%s7075_s3 + $0x220] sm:$0xff]  }
  0xd3   : > { %2504 = vmatprep.mubr.bf16.mxu0 %v6552_v29  ;;  %4897 = vmatpush3.bf16.msra.mxu0 %v5532_v38 }
  0xd4   : > { %4898 = vmatprep.subr.bf16.mxu0 %v5536_v23 }
  0xd5   : > { %4979 = vmatpush3.bf16.msra.mxu1 %v5529_v8  ;;  %v650_v8 = vsel %vm390_vm0, %v648_v36, %v649_v15 }
  0xd6   : > { %4980 = vmatprep.subr.bf16.mxu1 %v5531_v24  ;;  %v6684_v19 = vpack.c.bf16 %v650_v8, %v648_v36  ;;  %v5555_v24 = vld [vmem:[%s7075_s3 + $0x228] sm:$0xff]  }
  0xd7   : > { %4899 = vmatpush3.bf16.msra.mxu0 %v5538_v54  ;;  %v5557_v54 = vld [vmem:[%s7075_s3 + $0x238] sm:$0xff]  }
  0xd8   : > { %5205 = vmatmul.mubr.msk.bf16.gmra.mrb[56].mxu1 %vm6005_vm5, %v6411_v28  ;;  %4900 = vmatprep.subr.bf16.mxu0 %v5542_v37 }
  0xd9   : > { %4981 = vmatpush3.bf16.msra.mxu1 %v5533_v53  ;;  %5208 = vmatprep.mubr.msk.bf16.mxu1 %vm6005_vm5, %v6435_v48 }
  0xda   : > { %4982 = vmatprep.subr.bf16.mxu1 %v5534_v57  ;;  %4422 = vmatmul.mubr.msk.bf16.gmra.mrb[88].mxu0 %vm5781_vm3, %v6588_v63  ;;  %v5556_v57 = vld [vmem:[%s7075_s3 + $0x230] sm:$0xff]  }
  0xdb   : > { %2512 = vmatprep.mubr.bf16.mxu0 %v6595_v55  ;;  %4901 = vmatpush3.bf16.msra.mxu0 %v5543_v30 }
  0xdc   : > { %4902 = vmatprep.subr.bf16.mxu0 %v5545_v58 }
  0xdd   : > { %4983 = vmatpush3.bf16.msra.mxu1 %v5535_v42 }
  0xde   : > { %4984 = vmatprep.subr.bf16.mxu1 %v5537_v0 }
  0xdf   : > { %4903 = vmatpush3.bf16.msra.mxu0 %v5546_v41 }
  0xe0   : > { %5209 = vmatmul.mubr.msk.bf16.gmra.mrb[60].mxu1 %vm6005_vm5, %v6437_v45  ;;  %4904 = vmatprep.subr.bf16.mxu0 %v5548_v46 }
  0xe1   : > { %4985 = vmatpush3.bf16.msra.mxu1 %v5539_v1  ;;  %3237 = vmatprep.mubr.bf16.mxu1 %v6512_v25 }
  0xe2   : > { %4986 = vmatprep.subr.bf16.mxu1 %v5540_v6  ;;  %4426 = vmatmul.mubr.msk.bf16.gmra.mrb[92].mxu0 %vm5781_vm3, %v6629_v27 }
  0xe3   : > { %2520 = vmatprep.mubr.bf16.mxu0 %v6636_v32  ;;  %4905 = vmatpush3.bf16.msra.mxu0 %v5549_v56 }
  0xe4   : > { %4906 = vmatprep.subr.bf16.mxu0 %v5551_v21 }
  0xe5   : > { %4987 = vmatpush3.bf16.msra.mxu1 %v5541_v17 }
  0xe6   : > { %5212 = vmatprep.subr.bf16.mxu1 %v5544_v18 }
  0xe7   : > { %4907 = vmatpush3.bf16.msra.mxu0 %v5552_v43 }
  0xe8   : > { %4526 = vmatmul.mubr.msk.bf16.vlgmr.msra.gmra.mrb[64].mxu1 %vm5781_vm3, %v6545_v10 }
  0xe9   : > { %5213 = vmatpush3.bf16.msra.mxu1 %v5544_v18  ;;  %3245 = vmatprep.mubr.bf16.mxu1 %v6552_v29 }
  0xea   : > { %5214 = vmatprep.subr.bf16.mxu1 %v5547_v50  ;;  %4430 = vmatmul.mubr.msk.bf16.gmra.mrb[96].mxu0 %vm5781_vm3, %v6661_v51 }
  0xeb   : > { %2528 = vmatprep.mubr.bf16.mxu0 %v6668_v2 }
  0xed   : > { %5215 = vmatpush3.bf16.msra.mxu1 %v5547_v50 }
  0xee   : > { %5216 = vmatprep.subr.bf16.mxu1 %v5550_v47 }
  0xf0   : > { %4530 = vmatmul.mubr.msk.bf16.gmra.mrb[68].mxu1 %vm5781_vm3, %v6588_v63 }
  0xf1   : > { %3253 = vmatprep.mubr.bf16.mxu1 %v6595_v55  ;;  %5217 = vmatpush3.bf16.msra.mxu1 %v5550_v47 }
  0xf2   : > { %5218 = vmatprep.subr.bf16.mxu1 %v5553_v40  ;;  %4434 = vmatmul.mubr.msk.bf16.gmra.mrb[100].mxu0 %vm5781_vm3, %v6684_v19 }
  0xf3   : > { %2536 = vmatprep.mubr.bf16.mxu0 %v6127_v16 }
  0xf5   : > { %5219 = vmatpush3.bf16.msra.mxu1 %v5553_v40 }
  0xf6   : > { %5220 = vmatprep.subr.bf16.mxu1 %v5554_v13 }
  0xf8   : > { %4534 = vmatmul.mubr.msk.bf16.gmra.mrb[72].mxu1 %vm5781_vm3, %v6629_v27 }
  0xf9   : > { %3261 = vmatprep.mubr.bf16.mxu1 %v6636_v32  ;;  %5221 = vmatpush3.bf16.msra.mxu1 %v5554_v13 }
  0xfa   : > { %5222 = vmatprep.subr.bf16.mxu1 %v5555_v24  ;;  %4438 = vmatmul.mubr.msk.bf16.gmra.mrb[104].mxu0 %vm5781_vm3, %v6219_v3  ;;  %v4588_v37 = vpop.f32.mrb[0].mxu0 }
  0xfb   : > { %v4668_v22 = vpop.f32.mrb[0].mxu1  ;;  %2544 = vmatprep.mubr.bf16.mxu0 %v6176_v35  ;;  %v4589_v0 = vpop.f32.mrb[1].mxu0 }
  0xfc   : > { %v4669_v26 = vpop.f32.mrb[1].mxu1  ;;  %v6718_v14 = vadd.f32 %v4589_v0, %v4588_v37  ;;  %v4591_v30 = vpop.f32.mrb[2].mxu0 }
  0xfd   : > { %v6699_v38 = vadd.f32 %v4669_v26, %v4668_v22  ;;  %v4671_v23 = vpop.f32.mrb[2].mxu1  ;;  %5223 = vmatpush3.bf16.msra.mxu1 %v5555_v24  ;;  %v4592_v6 = vpop.f32.mrb[3].mxu0 }
  0xfe   : > { %v4672_v53 = vpop.f32.mrb[3].mxu1  ;;  %5224 = vmatprep.subr.bf16.mxu1 %v5556_v57  ;;  %v6722_v41 = vadd.f32 %v4592_v6, %v4591_v30 }
  0xff   : > { %v6705_v12 = vadd.f32 %v4672_v53, %v4671_v23 }
 0x100   : > { %4538 = vmatmul.mubr.msk.bf16.gmra.mrb[76].mxu1 %vm5781_vm3, %v6661_v51 }
 0x101   : > { %3269 = vmatprep.mubr.bf16.mxu1 %v6668_v2  ;;  %5225 = vmatpush3.bf16.msra.mxu1 %v5556_v57 }
 0x102   : > { %5226 = vmatprep.subr.bf16.mxu1 %v5557_v54  ;;  %4442 = vmatmul.mubr.msk.bf16.gmra.mrb[108].mxu0 %vm5781_vm3, %v6232_v20  ;;  %v4594_v17 = vpop.f32.mrb[4].mxu0 }
 0x103   : > { %v4674_v42 = vpop.f32.mrb[4].mxu1  ;;  %2826 = vmatprep.mubr.bf16.mxu0 %v5983_v59  ;;  %v4595_v49 = vpop.f32.mrb[5].mxu0 }
 0x104   : > { %v4675_v34 = vpop.f32.mrb[5].mxu1  ;;  %v6734_v56 = vadd.f32 %v4595_v49, %v4594_v17  ;;  %v4597_v21 = vpop.f32.mrb[6].mxu0 }
 0x105   : > { %v6720_v58 = vadd.f32 %v4675_v34, %v4674_v42  ;;  %v4677_v1 = vpop.f32.mrb[6].mxu1  ;;  %5227 = vmatpush3.bf16.msra.mxu1 %v5557_v54  ;;  %v4598_v43 = vpop.f32.mrb[7].mxu0 }
 0x106   : > { %v4678_v44 = vpop.f32.mrb[7].mxu1  ;;  %v6738_v36 = vadd.f32 %v4598_v43, %v4597_v21 }
 0x107   : > { %v6724_v46 = vadd.f32 %v4678_v44, %v4677_v1 }
 0x108   : > { %4542 = vmatmul.mubr.msk.bf16.gmra.mrb[80].mxu1 %vm5781_vm3, %v6684_v19 }
 0x109   : > { %3277 = vmatprep.mubr.bf16.mxu1 %v6127_v16 }
 0x10a   : > { %4470 = vmatmul.mubr.msk.bf16.vlgmr.msra.gmra.mrb[112].mxu0 %vm5781_vm3, %v6000_v52  ;;  %v4600_v15 = vpop.f32.mrb[8].mxu0 }
 0x10b   : > { %v4680_v18 = vpop.f32.mrb[8].mxu1  ;;  %2834 = vmatprep.mubr.bf16.mxu0 %v6460_v31  ;;  %v4601_v8 = vpop.f32.mrb[9].mxu0 }
 0x10c   : > { %v4681_v9 = vpop.f32.mrb[9].mxu1  ;;  %v6750_v24 = vadd.f32 %v4601_v8, %v4600_v15  ;;  %v4603_v22 = vpop.f32.mrb[10].mxu0 }
 0x10d   : > { %v6736_v50 = vadd.f32 %v4681_v9, %v4680_v18  ;;  %v4683_v60 = vpop.f32.mrb[10].mxu1  ;;  %v4604_v53 = vpop.f32.mrb[11].mxu0 }
 0x10e   : > { %v4684_v47 = vpop.f32.mrb[11].mxu1  ;;  %v6754_v57 = vadd.f32 %v4604_v53, %v4603_v22 }
 0x10f   : > { %v6740_v59 = vadd.f32 %v4684_v47, %v4683_v60 }
 0x110   : > { %4546 = vmatmul.mubr.msk.bf16.gmra.mrb[84].mxu1 %vm5781_vm3, %v6219_v3 }
 0x111   : > { %3285 = vmatprep.mubr.bf16.mxu1 %v6176_v35 }
 0x112   : > { %4474 = vmatmul.mubr.msk.bf16.gmra.mrb[116].mxu0 %vm5781_vm3, %v6480_v39  ;;  %v4606_v35 = vpop.f32.mrb[12].mxu0 }
 0x113   : > { %v4686_v40 = vpop.f32.mrb[12].mxu1  ;;  %2842 = vmatprep.mubr.bf16.mxu0 %v6512_v25  ;;  %v4607_v37 = vpop.f32.mrb[13].mxu0 }
 0x114   : > { %v4687_v13 = vpop.f32.mrb[13].mxu1  ;;  %v6766_v0 = vadd.f32 %v4607_v37, %v4606_v35  ;;  %v4609_v34 = vpop.f32.mrb[14].mxu0 }
 0x115   : > { %v6752_v26 = vadd.f32 %v4687_v13, %v4686_v40  ;;  %v4689_v23 = vpop.f32.mrb[14].mxu1  ;;  %v4610_v6 = vpop.f32.mrb[15].mxu0 }
 0x116   : > { %v4690_v52 = vpop.f32.mrb[15].mxu1  ;;  %v6770_v44 = vadd.f32 %v4610_v6, %v4609_v34 }
 0x117   : > { %v6756_v31 = vadd.f32 %v4690_v52, %v4689_v23 }
 0x118   : > { %4550 = vmatmul.mubr.msk.bf16.gmra.mrb[88].mxu1 %vm5781_vm3, %v6232_v20 }
 0x119   : > { %3293 = vmatprep.mubr.bf16.mxu1 %v5568_v4 }
 0x11a   : > { %4478 = vmatmul.mubr.msk.bf16.gmra.mrb[120].mxu0 %vm5781_vm3, %v6545_v10  ;;  %v4612_v20 = vpop.f32.mrb[16].mxu0 }
 0x11b   : > { %v4692_v54 = vpop.f32.mrb[16].mxu1  ;;  %2850 = vmatprep.mubr.bf16.mxu0 %v6552_v29  ;;  %v4613_v18 = vpop.f32.mrb[17].mxu0 }
 0x11c   : > { %v4693_v42 = vpop.f32.mrb[17].mxu1  ;;  %v6782_v9 = vadd.f32 %v4613_v18, %v4612_v20  ;;  %v4615_v21 = vpop.f32.mrb[18].mxu0 }
 0x11d   : > { %v6768_v30 = vadd.f32 %v4693_v42, %v4692_v54  ;;  %v4695_v1 = vpop.f32.mrb[18].mxu1  ;;  %v4616_v47 = vpop.f32.mrb[19].mxu0 }
 0x11e   : > { %v4696_v39 = vpop.f32.mrb[19].mxu1  ;;  %v6786_v15 = vadd.f32 %v4616_v47, %v4615_v21 }
 0x11f   : > { %v6772_v25 = vadd.f32 %v4696_v39, %v4695_v1 }
 0x120   : > { %3294 = vmatmul.mubr.bf16.gmra.mrb[92].mxu1 %v5568_v4 }
 0x121   : > { %5228 = vmatprep.mubr.msk.bf16.mxu1 %vm6005_vm5, %v6368_v61 }
 0x122   : > { %4482 = vmatmul.mubr.msk.bf16.gmra.mrb[124].mxu0 %vm5781_vm3, %v6588_v63  ;;  %v4618_v61 = vpop.f32.mrb[20].mxu0 }
 0x123   : > { %v4698_v17 = vpop.f32.mrb[20].mxu1  ;;  %2858 = vmatprep.mubr.bf16.mxu0 %v6595_v55  ;;  %v4619_v8 = vpop.f32.mrb[21].mxu0 }
 0x124   : > { %v4699_v49 = vpop.f32.mrb[21].mxu1  ;;  %v6800_v22 = vadd.f32 %v4619_v8, %v4618_v61  ;;  %v4621_v23 = vpop.f32.mrb[22].mxu0 }
 0x125   : > { %v6784_v60 = vadd.f32 %v4699_v49, %v4698_v17  ;;  %v4701_v43 = vpop.f32.mrb[22].mxu1  ;;  %v4622_v52 = vpop.f32.mrb[23].mxu0 }
 0x126   : > { %v4702_v10 = vpop.f32.mrb[23].mxu1  ;;  %v4623_v35 = vadd.f32 %v4622_v52, %v4621_v23 }
 0x127   : > { %v6788_v29 = vadd.f32 %v4702_v10, %v4701_v43 }
 0x128   : > { %5229 = vmatmul.mubr.msk.bf16.vlgmr.msra.gmra.mrb[48].mxu1 %vm6005_vm5, %v6374_v62 }
 0x129   : > { %5232 = vmatprep.mubr.msk.bf16.mxu1 %vm6005_vm5, %v6409_v33 }
 0x12a   : > { %4486 = vmatmul.mubr.msk.bf16.gmra.mrb[128].mxu0 %vm5781_vm3, %v6629_v27  ;;  %v4624_v62 = vpop.f32.mrb[24].mxu0 }
 0x12b   : > { %v4704_v40 = vpop.f32.mrb[24].mxu1  ;;  %2866 = vmatprep.mubr.bf16.mxu0 %v6636_v32  ;;  %v4625_v37 = vpop.f32.mrb[25].mxu0 }
 0x12c   : > { %v4705_v13 = vpop.f32.mrb[25].mxu1  ;;  %v4626_v34 = vadd.f32 %v4625_v37, %v4624_v62  ;;  %v4627_v1 = vpop.f32.mrb[26].mxu0 }
 0x12d   : > { %v6802_v53 = vadd.f32 %v4705_v13, %v4704_v40  ;;  %v4707_v63 = vpop.f32.mrb[26].mxu1  ;;  %v4628_v20 = vpop.f32.mrb[27].mxu0 }
 0x12e   : > { %v4708_v55 = vpop.f32.mrb[27].mxu1  ;;  %v6816_v17 = vadd.f32 %v4628_v20, %v4627_v1 }
 0x12f   : > { %v6804_v54 = vadd.f32 %v4708_v55, %v4707_v63 }
 0x130   : > { %5233 = vmatmul.mubr.msk.bf16.gmra.mrb[52].mxu1 %vm6005_vm5, %v6411_v28 }
 0x131   : > { %5236 = vmatprep.mubr.msk.bf16.mxu1 %vm6005_vm5, %v6435_v48 }
 0x132   : > { %4490 = vmatmul.mubr.msk.bf16.gmra.mrb[132].mxu0 %vm5781_vm3, %v6661_v51  ;;  %v4630_v28 = vpop.f32.mrb[28].mxu0 }
 0x133   : > { %v4710_v33 = vpop.f32.mrb[28].mxu1  ;;  %2874 = vmatprep.mubr.bf16.mxu0 %v6668_v2  ;;  %v4631_v48 = vpop.f32.mrb[29].mxu0 }
 0x134   : > { %v4711_v42 = vpop.f32.mrb[29].mxu1  ;;  %v4632_v18 = vadd.f32 %v4631_v48, %v4630_v28  ;;  %v4633_v49 = vpop.f32.mrb[30].mxu0 }
 0x135   : > { %v4712_v6 = vadd.f32 %v4711_v42, %v4710_v33  ;;  %v4713_v39 = vpop.f32.mrb[30].mxu1  ;;  %v4634_v21 = vpop.f32.mrb[31].mxu0 }
 0x136   : > { %v4714_v27 = vpop.f32.mrb[31].mxu1  ;;  %v4635_v43 = vadd.f32 %v4634_v21, %v4633_v49 }
 0x137   : > { %v6818_v32 = vadd.f32 %v4714_v27, %v4713_v39 }
 0x138   : > { %5237 = vmatmul.mubr.msk.bf16.gmra.mrb[56].mxu1 %vm6005_vm5, %v6437_v45 }
 0x139   : > { %5240 = vmatprep.mubr.msk.bf16.mxu1 %vm6005_vm5, %v6464_v7 }
 0x13a   : > { %4494 = vmatmul.mubr.msk.bf16.gmra.mrb[136].mxu0 %vm5781_vm3, %v6684_v19  ;;  %v5070_v51 = vpop.f32.mrb[32].mxu0 }
 0x13b   : > { %2882 = vmatprep.mubr.bf16.mxu0 %v6127_v16  ;;  %v1207_v45 = vadd.f32 %v5070_v51, %v6734_v56  ;;  %v1198_v2 = vpop.f32.mrb[33].mxu0 }
 0x13c   : > { %v1199_v11 = vadd.f32 %v6718_v14, %v1198_v2  ;;  %v5071_v7 = vpop.f32.mrb[34].mxu0 }
 0x13d   : > { %v6838_v47 = vadd.f32 %v6720_v58, %v1207_v45  ;;  %v1210_v10 = vadd.f32 %v5071_v7, %v6738_v36  ;;  %v1201_v61 = vpop.f32.mrb[35].mxu0 }
 0x13e   : > { %v1440_v40 = vadd.f32 %v6699_v38, %v1199_v11  ;;  %v1202_v19 = vadd.f32 %v6722_v41, %v1201_v61 }
 0x13f   : > { %v6844_v16 = vadd.f32 %v6724_v46, %v1210_v10 }
 0x140   : > { %5241 = vmatmul.mubr.bf16.gmra.mrb[60].mxu1 %v5568_v4  ;;  %v1443_v4 = vadd.f32 %v6705_v12, %v1202_v19 }
 0x142   : > { %4498 = vmatmul.mubr.msk.bf16.gmra.mrb[140].mxu0 %vm5781_vm3, %v6219_v3  ;;  %v5074_v14 = vpop.f32.mrb[36].mxu0 }
 0x143   : > { %v1223_v58 = vadd.f32 %v5074_v14, %v6766_v0  ;;  %v1214_v56 = vpop.f32.mrb[37].mxu0 }
 0x144   : > { %v1215_v36 = vadd.f32 %v6750_v24, %v1214_v56  ;;  %v5075_v8 = vpop.f32.mrb[38].mxu0 }
 0x145   : > { %v6853_v38 = vadd.f32 %v6752_v26, %v1223_v58  ;;  %v1226_v41 = vadd.f32 %v5075_v8, %v6770_v44  ;;  %v1217_v46 = vpop.f32.mrb[39].mxu0 }
 0x146   : > { %v6857_v13 = vadd.f32 %v6736_v50, %v1215_v36  ;;  %v1218_v5 = vadd.f32 %v6754_v57, %v1217_v46 }
 0x147   : > { %v6861_v3 = vadd.f32 %v6756_v31, %v1226_v41 }
 0x148   : > { %v6864_v12 = vadd.f32 %v6740_v59, %v1218_v5 }
 0x14a   : > { %v5078_v0 = vpop.f32.mrb[40].mxu0 }
 0x14b   : > { %v1239_v24 = vadd.f32 %v5078_v0, %v6800_v22  ;;  %v1230_v23 = vpop.f32.mrb[41].mxu0 }
 0x14c   : > { %v1231_v26 = vadd.f32 %v6782_v9, %v1230_v23  ;;  %v5079_v63 = vpop.f32.mrb[42].mxu0 }
 0x14d   : > { %v6869_v44 = vadd.f32 %v6784_v60, %v1239_v24  ;;  %v1242_v50 = vadd.f32 %v5079_v63, %v4623_v35  ;;  %v1233_v52 = vpop.f32.mrb[43].mxu0 }
 0x14e   : > { %v6872_v57 = vadd.f32 %v6768_v30, %v1231_v26  ;;  %v1234_v31 = vadd.f32 %v6786_v15, %v1233_v52 }
 0x14f   : > { %v6876_v59 = vadd.f32 %v6788_v29, %v1242_v50 }
 0x150   : > { %v6879_v55 = vadd.f32 %v6772_v25, %v1234_v31 }
 0x152   : > { %v5082_v22 = vpop.f32.mrb[44].mxu0 }
 0x153   : > { %v1255_v62 = vadd.f32 %v5082_v22, %v4632_v18  ;;  %v1246_v9 = vpop.f32.mrb[45].mxu0 }
 0x154   : > { %v1247_v33 = vadd.f32 %v4626_v34, %v1246_v9  ;;  %v5083_v37 = vpop.f32.mrb[46].mxu0 }
 0x155   : > { %v6881_v42 = vadd.f32 %v4712_v6, %v1255_v62  ;;  %v1258_v35 = vadd.f32 %v5083_v37, %v4635_v43  ;;  %v1249_v1 = vpop.f32.mrb[47].mxu0 }
 0x156   : > { %v6884_v39 = vadd.f32 %v6802_v53, %v1247_v33  ;;  %v1250_v15 = vadd.f32 %v6816_v17, %v1249_v1 }
 0x157   : > { %v6888_v25 = vadd.f32 %v6818_v32, %v1258_v35 }
 0x158   : > { %v6891_v27 = vadd.f32 %v6804_v54, %v1250_v15 }
 0x15b   : > { %v5134_v60 = vpop.f32.mrb[32].mxu1 }
 0x15c   : > { %v1948_v30 = vpop.f32.mrb[33].mxu1 }
 0x15d   : > { %v5135_v29 = vpop.f32.mrb[34].mxu1  ;;  %v4748_v34 = vpop.f32.mrb[48].mxu0 }
 0x15e   : > { %v1951_v20 = vpop.f32.mrb[35].mxu1  ;;  %v4749_v6 = vpop.f32.mrb[49].mxu0 }
 0x15f   : > { %v4750_v28 = vadd.f32 %v4749_v6, %v4748_v34  ;;  %v4751_v48 = vpop.f32.mrb[50].mxu0 }
 0x160   : > { %v4752_v49 = vpop.f32.mrb[51].mxu0 }
 0x161   : > { %v5250_v21 = vadd.f32 %v4750_v28, %v1440_v40  ;;  %v4753_v43 = vadd.f32 %v4752_v49, %v4751_v48 }
 0x163   : > { %v6893_v18 = vpop.f32.mrb[36].mxu1  ;;  %v5251_v32 = vadd.f32 %v5250_v21, %v1948_v30  ;;  %v5258_v45 = vadd.f32 %v4753_v43, %v1443_v4 }
 0x164   : > { %v1964_v53 = vpop.f32.mrb[37].mxu1 }
 0x165   : > { %v6895_v17 = vpop.f32.mrb[38].mxu1  ;;  %v5259_v2 = vadd.f32 %v5258_v45, %v1951_v20  ;;  %v4754_v11 = vpop.f32.mrb[52].mxu0  ;;  %v2129_v54 = vmul.f32 %v5251_v32, %v5251_v32 }
 0x166   : > { %v1967_v51 = vpop.f32.mrb[39].mxu1  ;;  %v4755_v7 = vpop.f32.mrb[53].mxu0 }
 0x167   : > { %v4143_v10 = vpack.c.bf16 %v5259_v2, %v5251_v32  ;;  %v2107_v61 = vadd.f32 %v5259_v2, %v5251_v32  ;;  %v2130_v40 = vmul.f32 %v5259_v2, %v5259_v2  ;;  %v4756_v19 = vadd.f32 %v4755_v7, %v4754_v11  ;;  %v4757_v14 = vpop.f32.mrb[54].mxu0 }
 0x168   : > { %v4758_v56 = vpop.f32.mrb[55].mxu0 }
 0x169   : > { %4144 = vst [vmem:[%s6902_s27] sm:$0xff] %v4143_v10   ;;  %v2145_v36 = vadd.f32 %v2130_v40, %v2129_v54  ;;  %v5246_v8 = vadd.f32 %v4756_v19, %v6838_v47  ;;  %v4759_v41 = vadd.f32 %v4758_v56, %v4757_v14 }
 0x16b   : > { %v6904_v58 = vpop.f32.mrb[40].mxu1  ;;  %v5247_v0 = vadd.f32 %v5246_v8, %v5134_v60  ;;  %v5254_v24 = vadd.f32 %v4759_v41, %v6844_v16 }
 0x16c   : > { %v6906_v4 = vpop.f32.mrb[41].mxu1 }
 0x16d   : > { %v6910_v46 = vpop.f32.mrb[42].mxu1  ;;  %v2108_v23 = vadd.f32 %v5247_v0, %v2107_v61  ;;  %v2131_v26 = vmul.f32 %v5247_v0, %v5247_v0  ;;  %v5255_v63 = vadd.f32 %v5254_v24, %v5135_v29  ;;  %v4760_v50 = vpop.f32.mrb[56].mxu0 }
 0x16e   : > { %v1983_v5 = vpop.f32.mrb[43].mxu1  ;;  %v4761_v52 = vpop.f32.mrb[57].mxu0 }
 0x16f   : > { %v2146_v31 = vadd.f32 %v2145_v36, %v2131_v26  ;;  %v4148_v22 = vpack.c.bf16 %v5255_v63, %v5247_v0  ;;  %v2109_v62 = vadd.f32 %v5255_v63, %v2108_v23  ;;  %v2132_v9 = vmul.f32 %v5255_v63, %v5255_v63  ;;  %v4763_v33 = vpop.f32.mrb[58].mxu0 }
 0x170   : > { %v4762_v47 = vadd.f32 %v4761_v52, %v4760_v50  ;;  %v4764_v35 = vpop.f32.mrb[59].mxu0 }
 0x171   : > { %4235 = vst [vmem:[%s6902_s27 + $0x8] sm:$0xff] %v4148_v22   ;;  %v2147_v60 = vadd.f32 %v2146_v31, %v2132_v9  ;;  %v4765_v30 = vadd.f32 %v4764_v35, %v4763_v33 }
 0x172   : > { %v5266_v15 = vadd.f32 %v4762_v47, %v6857_v13 }
 0x173   : > { %v6913_v37 = vpop.f32.mrb[44].mxu1  ;;  %v5274_v20 = vadd.f32 %v4765_v30, %v6864_v12 }
 0x174   : > { %v6915_v1 = vpop.f32.mrb[45].mxu1  ;;  %v5267_v34 = vadd.f32 %v5266_v15, %v1964_v53 }
 0x175   : > { %v6918_v16 = vpop.f32.mrb[46].mxu1  ;;  %v5275_v6 = vadd.f32 %v5274_v20, %v1967_v51  ;;  %v4766_v28 = vpop.f32.mrb[60].mxu0 }
 0x176   : > { %v6921_v29 = vpop.f32.mrb[47].mxu1  ;;  %v2110_v48 = vadd.f32 %v5267_v34, %v2109_v62  ;;  %v2133_v49 = vmul.f32 %v5267_v34, %v5267_v34  ;;  %v4767_v21 = vpop.f32.mrb[61].mxu0 }
 0x177   : > { %v4153_v43 = vpack.c.bf16 %v5275_v6, %v5267_v34  ;;  %v2134_v32 = vmul.f32 %v5275_v6, %v5275_v6  ;;  %v4768_v45 = vadd.f32 %v4767_v21, %v4766_v28  ;;  %v4769_v2 = vpop.f32.mrb[62].mxu0 }
 0x178   : > { %v2148_v11 = vadd.f32 %v2147_v60, %v2133_v49  ;;  %v2111_v54 = vadd.f32 %v5275_v6, %v2110_v48  ;;  %v4770_v7 = vpop.f32.mrb[63].mxu0 }
 0x179   : > { %4236 = vst [vmem:[%s6902_s27 + $0x10] sm:$0xff] %v4153_v43   ;;  %v5262_v13 = vadd.f32 %v4768_v45, %v6853_v38  ;;  %v4771_v10 = vadd.f32 %v4770_v7, %v4769_v2 }
 0x17a   : > { %v2149_v61 = vadd.f32 %v2148_v11, %v2134_v32 }
 0x17b   : > { %v5263_v12 = vadd.f32 %v5262_v13, %v6893_v18  ;;  %v5270_v53 = vadd.f32 %v4771_v10, %v6861_v3 }
 0x17d   : > { %v2112_v51 = vadd.f32 %v5263_v12, %v2111_v54  ;;  %v2135_v40 = vmul.f32 %v5263_v12, %v5263_v12  ;;  %v5271_v19 = vadd.f32 %v5270_v53, %v6895_v17  ;;  %v4772_v14 = vpop.f32.mrb[64].mxu0 }
 0x17e   : > { %v4773_v56 = vpop.f32.mrb[65].mxu0 }
 0x17f   : > { %v2150_v36 = vadd.f32 %v2149_v61, %v2135_v40  ;;  %v4158_v8 = vpack.c.bf16 %v5271_v19, %v5263_v12  ;;  %v2113_v41 = vadd.f32 %v5271_v19, %v2112_v51  ;;  %v2136_v0 = vmul.f32 %v5271_v19, %v5271_v19  ;;  %v4775_v24 = vpop.f32.mrb[66].mxu0 }
 0x180   : > { %v4774_v23 = vadd.f32 %v4773_v56, %v4772_v14  ;;  %v4776_v38 = vpop.f32.mrb[67].mxu0 }
 0x181   : > { %4237 = vst [vmem:[%s6902_s27 + $0x18] sm:$0xff] %v4158_v8   ;;  %v2151_v26 = vadd.f32 %v2150_v36, %v2136_v0  ;;  %v4777_v63 = vadd.f32 %v4776_v38, %v4775_v24 }
 0x182   : > { %v5282_v18 = vadd.f32 %v4774_v23, %v6872_v57 }
 0x183   : > { %v5290_v3 = vadd.f32 %v4777_v63, %v6879_v55 }
 0x184   : > { %v5283_v50 = vadd.f32 %v5282_v18, %v6906_v4 }
 0x185   : > { %v5291_v17 = vadd.f32 %v5290_v3, %v1983_v5  ;;  %v4778_v52 = vpop.f32.mrb[68].mxu0 }
 0x186   : > { %v2114_v31 = vadd.f32 %v5283_v50, %v2113_v41  ;;  %v2137_v22 = vmul.f32 %v5283_v50, %v5283_v50  ;;  %v4779_v62 = vpop.f32.mrb[69].mxu0 }
 0x187   : > { %v4163_v9 = vpack.c.bf16 %v5291_v17, %v5283_v50  ;;  %v2138_v33 = vmul.f32 %v5291_v17, %v5291_v17  ;;  %v4780_v47 = vadd.f32 %v4779_v62, %v4778_v52  ;;  %v4781_v35 = vpop.f32.mrb[70].mxu0 }
 0x188   : > { %v2152_v60 = vadd.f32 %v2151_v26, %v2137_v22  ;;  %v2115_v30 = vadd.f32 %v5291_v17, %v2114_v31  ;;  %v4782_v15 = vpop.f32.mrb[71].mxu0 }
 0x189   : > { %4238 = vst [vmem:[%s6902_s27 + $0x20] sm:$0xff] %v4163_v9   ;;  %v5278_v20 = vadd.f32 %v4780_v47, %v6869_v44  ;;  %v4783_v57 = vadd.f32 %v4782_v15, %v4781_v35 }
 0x18a   : > { %v2153_v55 = vadd.f32 %v2152_v60, %v2138_v33 }
 0x18b   : > { %v5279_v4 = vadd.f32 %v5278_v20, %v6904_v58  ;;  %v5286_v5 = vadd.f32 %v4783_v57, %v6876_v59 }
 0x18d   : > { %v2116_v34 = vadd.f32 %v5279_v4, %v2115_v30  ;;  %v2139_v6 = vmul.f32 %v5279_v4, %v5279_v4  ;;  %v5287_v28 = vadd.f32 %v5286_v5, %v6910_v46  ;;  %v4784_v48 = vpop.f32.mrb[72].mxu0 }
 0x18e   : > { %v4785_v49 = vpop.f32.mrb[73].mxu0 }
 0x18f   : > { %v2154_v21 = vadd.f32 %v2153_v55, %v2139_v6  ;;  %v4168_v43 = vpack.c.bf16 %v5287_v28, %v5279_v4  ;;  %v2117_v32 = vadd.f32 %v5287_v28, %v2116_v34  ;;  %v2140_v45 = vmul.f32 %v5287_v28, %v5287_v28  ;;  %v4787_v2 = vpop.f32.mrb[74].mxu0 }
 0x190   : > { %v4786_v11 = vadd.f32 %v4785_v49, %v4784_v48  ;;  %v4788_v44 = vpop.f32.mrb[75].mxu0 }
 0x191   : > { %4239 = vst [vmem:[%s6902_s27 + $0x28] sm:$0xff] %v4168_v43   ;;  %v2155_v54 = vadd.f32 %v2154_v21, %v2140_v45  ;;  %v4789_v7 = vadd.f32 %v4788_v44, %v4787_v2 }
 0x192   : > { %v5298_v58 = vadd.f32 %v4786_v11, %v6884_v39 }
 0x193   : > { %v5306_v59 = vadd.f32 %v4789_v7, %v6891_v27 }
 0x194   : > { %v5299_v13 = vadd.f32 %v5298_v58, %v6915_v1 }
 0x195   : > { %v5307_v46 = vadd.f32 %v5306_v59, %v6921_v29  ;;  %v4790_v10 = vpop.f32.mrb[76].mxu0 }
 0x196   : > { %v2118_v61 = vadd.f32 %v5299_v13, %v2117_v32  ;;  %v2141_v12 = vmul.f32 %v5299_v13, %v5299_v13  ;;  %v4791_v53 = vpop.f32.mrb[77].mxu0 }
 0x197   : > { %v4173_v51 = vpack.c.bf16 %v5307_v46, %v5299_v13  ;;  %v2142_v40 = vmul.f32 %v5307_v46, %v5307_v46  ;;  %v4792_v19 = vadd.f32 %v4791_v53, %v4790_v10  ;;  %v4793_v14 = vpop.f32.mrb[78].mxu0 }
 0x198   : > { %v2156_v56 = vadd.f32 %v2155_v54, %v2141_v12  ;;  %v2119_v36 = vadd.f32 %v5307_v46, %v2118_v61  ;;  %v4794_v8 = vpop.f32.mrb[79].mxu0 }
 0x199   : > { %4240 = vst [vmem:[%s6902_s27 + $0x30] sm:$0xff] %v4173_v51   ;;  %v5294_v39 = vadd.f32 %v4792_v19, %v6881_v42  ;;  %v4795_v41 = vadd.f32 %v4794_v8, %v4793_v14 }
 0x19a   : > { %v2157_v27 = vadd.f32 %v2156_v56, %v2142_v40 }
 0x19b   : > { %v5295_v1 = vadd.f32 %v5294_v39, %v6913_v37  ;;  %v5302_v29 = vadd.f32 %v4795_v41, %v6888_v25 }
 0x19d   : > { %v2120_v0 = vadd.f32 %v5295_v1, %v2119_v36  ;;  %v2143_v24 = vmul.f32 %v5295_v1, %v5295_v1  ;;  %v5303_v23 = vadd.f32 %v5302_v29, %v6918_v16  ;;  %v4828_v38 = vpop.f32.mrb[80].mxu0 }
 0x19e   : > { %v4829_v26 = vpop.f32.mrb[81].mxu0 }
 0x19f   : > { %v2158_v63 = vadd.f32 %v2157_v27, %v2143_v24  ;;  %v4178_v18 = vpack.c.bf16 %v5303_v23, %v5295_v1  ;;  %v6948_v3 = vadd.f32 %v5303_v23, %v2120_v0  ;;  %v2144_v50 = vmul.f32 %v5303_v23, %v5303_v23  ;;  %v4831_v17 = vpop.f32.mrb[82].mxu0 }
 0x1a0   : > { %v6950_v42 = vadd.f32 %v4829_v26, %v4828_v38  ;;  %v4832_v52 = vpop.f32.mrb[83].mxu0 }
 0x1a1   : > { %4241 = vst [vmem:[%s6902_s27 + $0x38] sm:$0xff] %v4178_v18   ;;  %v6953_v31 = vadd.f32 %v2158_v63, %v2144_v50  ;;  %v6955_v37 = vadd.f32 %v4832_v52, %v4831_v17 }
 0x1a5   : > { %v4834_v25 = vpop.f32.mrb[84].mxu0 }
 0x1a6   : > { %v4835_v22 = vpop.f32.mrb[85].mxu0 }
 0x1a7   : > { %v6957_v62 = vadd.f32 %v4835_v22, %v4834_v25  ;;  %v4837_v16 = vpop.f32.mrb[86].mxu0 }
 0x1a8   : > { %v4838_v9 = vpop.f32.mrb[87].mxu0 }
 0x1a9   : > { %v6959_v33 = vadd.f32 %v4838_v9, %v4837_v16 }
 0x1ad   : > { %v4840_v47 = vpop.f32.mrb[88].mxu0 }
 0x1ae   : > { %v4841_v35 = vpop.f32.mrb[89].mxu0 }
 0x1af   : > { %v6961_v60 = vadd.f32 %v4841_v35, %v4840_v47  ;;  %v4843_v30 = vpop.f32.mrb[90].mxu0 }
 0x1b0   : > { %v4844_v15 = vpop.f32.mrb[91].mxu0 }
 0x1b1   : > { %v6963_v20 = vadd.f32 %v4844_v15, %v4843_v30 }
 0x1b5   : > { %v4846_v57 = vpop.f32.mrb[92].mxu0 }
 0x1b6   : > { %v4847_v55 = vpop.f32.mrb[93].mxu0 }
 0x1b7   : > { %v6965_v4 = vadd.f32 %v4847_v55, %v4846_v57  ;;  %v4849_v5 = vpop.f32.mrb[94].mxu0 }
 0x1b8   : > { %v4850_v6 = vpop.f32.mrb[95].mxu0 }
 0x1b9   : > { %v6967_v48 = vadd.f32 %v4850_v6, %v4849_v5 }
 0x1bb   : > { %v4988_v34 = vpop.f32.mrb[64].mxu1 }
 0x1bc   : > { %v4989_v28 = vpop.f32.mrb[65].mxu1 }
 0x1bd   : > { %v6969_v49 = vadd.f32 %v4989_v28, %v4988_v34  ;;  %v4991_v21 = vpop.f32.mrb[66].mxu1  ;;  %v4852_v45 = vpop.f32.mrb[96].mxu0 }
 0x1be   : > { %v4992_v43 = vpop.f32.mrb[67].mxu1  ;;  %v4853_v2 = vpop.f32.mrb[97].mxu0 }
 0x1bf   : > { %v6971_v32 = vadd.f32 %v4992_v43, %v4991_v21  ;;  %v6973_v11 = vadd.f32 %v4853_v2, %v4852_v45  ;;  %v4855_v44 = vpop.f32.mrb[98].mxu0 }
 0x1c0   : > { %v4856_v7 = vpop.f32.mrb[99].mxu0 }
 0x1c1   : > { %v6975_v59 = vadd.f32 %v4856_v7, %v4855_v44 }
 0x1c3   : > { %v4994_v54 = vpop.f32.mrb[68].mxu1 }
 0x1c4   : > { %v4995_v58 = vpop.f32.mrb[69].mxu1 }
 0x1c5   : > { %v6977_v13 = vadd.f32 %v4995_v58, %v4994_v54  ;;  %v4997_v46 = vpop.f32.mrb[70].mxu1  ;;  %v4858_v12 = vpop.f32.mrb[100].mxu0 }
 0x1c6   : > { %v4998_v10 = vpop.f32.mrb[71].mxu1  ;;  %v4859_v53 = vpop.f32.mrb[101].mxu0 }
 0x1c7   : > { %v6979_v61 = vadd.f32 %v4998_v10, %v4997_v46  ;;  %v6981_v51 = vadd.f32 %v4859_v53, %v4858_v12  ;;  %v4861_v40 = vpop.f32.mrb[102].mxu0 }
 0x1c8   : > { %v4862_v14 = vpop.f32.mrb[103].mxu0 }
 0x1c9   : > { %v6983_v36 = vadd.f32 %v4862_v14, %v4861_v40 }
 0x1cb   : > { %v5000_v19 = vpop.f32.mrb[72].mxu1 }
 0x1cc   : > { %v5001_v56 = vpop.f32.mrb[73].mxu1 }
 0x1cd   : > { %v6985_v8 = vadd.f32 %v5001_v56, %v5000_v19  ;;  %v5003_v39 = vpop.f32.mrb[74].mxu1  ;;  %v4864_v1 = vpop.f32.mrb[104].mxu0 }
 0x1ce   : > { %v5004_v41 = vpop.f32.mrb[75].mxu1  ;;  %v4865_v29 = vpop.f32.mrb[105].mxu0 }
 0x1cf   : > { %v6987_v27 = vadd.f32 %v5004_v41, %v5003_v39  ;;  %v6989_v0 = vadd.f32 %v4865_v29, %v4864_v1  ;;  %v4867_v24 = vpop.f32.mrb[106].mxu0 }
 0x1d0   : > { %v4868_v38 = vpop.f32.mrb[107].mxu0 }
 0x1d1   : > { %v6991_v63 = vadd.f32 %v4868_v38, %v4867_v24 }
 0x1d3   : > { %v5006_v23 = vpop.f32.mrb[76].mxu1 }
 0x1d4   : > { %v5007_v26 = vpop.f32.mrb[77].mxu1 }
 0x1d5   : > { %v6993_v18 = vadd.f32 %v5007_v26, %v5006_v23  ;;  %v5009_v50 = vpop.f32.mrb[78].mxu1  ;;  %v4870_v25 = vpop.f32.mrb[108].mxu0 }
 0x1d6   : > { %v5010_v17 = vpop.f32.mrb[79].mxu1  ;;  %v4871_v22 = vpop.f32.mrb[109].mxu0 }
 0x1d7   : > { %v6995_v52 = vadd.f32 %v5010_v17, %v5009_v50  ;;  %v6997_v16 = vadd.f32 %v4871_v22, %v4870_v25  ;;  %v4873_v9 = vpop.f32.mrb[110].mxu0 }
 0x1d8   : > { %v4874_v35 = vpop.f32.mrb[111].mxu0 }
 0x1d9   : > { %v6999_v15 = vadd.f32 %v4874_v35, %v4873_v9 }
 0x1db   : > { %v5012_v47 = vpop.f32.mrb[80].mxu1 }
 0x1dc   : > { %v5013_v30 = vpop.f32.mrb[81].mxu1 }
 0x1dd   : > { %v7001_v57 = vadd.f32 %v5013_v30, %v5012_v47  ;;  %v5015_v55 = vpop.f32.mrb[82].mxu1  ;;  %v4908_v6 = vpop.f32.mrb[112].mxu0 }
 0x1de   : > { %v5016_v5 = vpop.f32.mrb[83].mxu1  ;;  %v4909_v28 = vpop.f32.mrb[113].mxu0 }
 0x1df   : > { %v7003_v34 = vadd.f32 %v5016_v5, %v5015_v55  ;;  %v4910_v21 = vadd.f32 %v4909_v28, %v4908_v6  ;;  %v4911_v43 = vpop.f32.mrb[114].mxu0 }
 0x1e0   : > { %v4912_v2 = vpop.f32.mrb[115].mxu0 }
 0x1e1   : > { %v5311_v54 = vadd.f32 %v4910_v21, %v6950_v42  ;;  %v4913_v7 = vadd.f32 %v4912_v2, %v4911_v43 }
 0x1e3   : > { %v5018_v45 = vpop.f32.mrb[84].mxu1  ;;  %v5317_v12 = vadd.f32 %v4913_v7, %v6955_v37  ;;  %v5312_v40 = vadd.f32 %v5311_v54, %v6969_v49 }
 0x1e4   : > { %v5019_v44 = vpop.f32.mrb[85].mxu1 }
 0x1e5   : > { %v7006_v58 = vadd.f32 %v5019_v44, %v5018_v45  ;;  %v5021_v46 = vpop.f32.mrb[86].mxu1  ;;  %v4914_v19 = vpop.f32.mrb[116].mxu0  ;;  %v5318_v14 = vadd.f32 %v5317_v12, %v6971_v32 }
 0x1e6   : > { %v5022_v10 = vpop.f32.mrb[87].mxu1  ;;  %v4915_v56 = vpop.f32.mrb[117].mxu0 }
 0x1e7   : > { %v7009_v53 = vadd.f32 %v5022_v10, %v5021_v46  ;;  %v4916_v39 = vadd.f32 %v4915_v56, %v4914_v19  ;;  %v4917_v41 = vpop.f32.mrb[118].mxu0 }
 0x1e8   : > { %v4918_v29 = vpop.f32.mrb[119].mxu0 }
 0x1e9   : > { %v5308_v24 = vadd.f32 %v4916_v39, %v6957_v62  ;;  %v4919_v23 = vadd.f32 %v4918_v29, %v4917_v41 }
 0x1eb   : > { %v5024_v1 = vpop.f32.mrb[88].mxu1  ;;  %v5314_v50 = vadd.f32 %v4919_v23, %v6959_v33  ;;  %v5309_v49 = vadd.f32 %v5308_v24, %v6977_v13 }
 0x1ec   : > { %v5025_v42 = vpop.f32.mrb[89].mxu1 }
 0x1ed   : > { %v7014_v38 = vadd.f32 %v5025_v42, %v5024_v1  ;;  %v5027_v26 = vpop.f32.mrb[90].mxu1  ;;  %v4920_v32 = vpop.f32.mrb[120].mxu0  ;;  %v5315_v25 = vadd.f32 %v5314_v50, %v6979_v61 }
 0x1ee   : > { %v5028_v37 = vpop.f32.mrb[91].mxu1  ;;  %v4921_v22 = vpop.f32.mrb[121].mxu0 }
 0x1ef   : > { %v7017_v17 = vadd.f32 %v5028_v37, %v5027_v26  ;;  %v4922_v9 = vadd.f32 %v4921_v22, %v4920_v32  ;;  %v4923_v47 = vpop.f32.mrb[122].mxu0 }
 0x1f0   : > { %v4924_v30 = vpop.f32.mrb[123].mxu0 }
 0x1f1   : > { %v5323_v55 = vadd.f32 %v4922_v9, %v6961_v60  ;;  %v4925_v5 = vadd.f32 %v4924_v30, %v4923_v47 }
 0x1f3   : > { %v5030_v35 = vpop.f32.mrb[92].mxu1  ;;  %v5329_v21 = vadd.f32 %v4925_v5, %v6963_v20  ;;  %v5324_v13 = vadd.f32 %v5323_v55, %v6985_v8 }
 0x1f4   : > { %v5031_v62 = vpop.f32.mrb[93].mxu1 }
 0x1f5   : > { %v7022_v6 = vadd.f32 %v5031_v62, %v5030_v35  ;;  %v5033_v28 = vpop.f32.mrb[94].mxu1  ;;  %v4926_v61 = vpop.f32.mrb[124].mxu0  ;;  %v5330_v45 = vadd.f32 %v5329_v21, %v6987_v27 }
 0x1f6   : > { %v5034_v33 = vpop.f32.mrb[95].mxu1  ;;  %v4927_v2 = vpop.f32.mrb[125].mxu0 }
 0x1f7   : > { %v7025_v43 = vadd.f32 %v5034_v33, %v5033_v28  ;;  %v4928_v44 = vadd.f32 %v4927_v2, %v4926_v61  ;;  %v4929_v54 = vpop.f32.mrb[126].mxu0 }
 0x1f8   : > { %v4930_v46 = vpop.f32.mrb[127].mxu0 }
 0x1f9   : > { %v5320_v12 = vadd.f32 %v4928_v44, %v6965_v4  ;;  %v4931_v19 = vadd.f32 %v4930_v46, %v4929_v54 }
 0x1fb   : > { %v5230_v7 = vpop.f32.mrb[48].mxu1  ;;  %v5326_v8 = vadd.f32 %v4931_v19, %v6967_v48  ;;  %v5321_v27 = vadd.f32 %v5320_v12, %v6993_v18 }
 0x1fc   : > { %v5310_v60 = vadd.f32 %v5309_v49, %v5230_v7  ;;  %v3336_v10 = vpop.f32.mrb[49].mxu1 }
 0x1fd   : > { %v5313_v56 = vadd.f32 %v5312_v40, %v3336_v10  ;;  %v5231_v20 = vpop.f32.mrb[50].mxu1  ;;  %v4932_v24 = vpop.f32.mrb[128].mxu0  ;;  %v5327_v4 = vadd.f32 %v5326_v8, %v6995_v52 }
 0x1fe   : > { %v5316_v39 = vadd.f32 %v5315_v25, %v5231_v20  ;;  %v3339_v41 = vpop.f32.mrb[51].mxu1  ;;  %v4933_v50 = vpop.f32.mrb[129].mxu0  ;;  %v3519_v40 = vmul.f32 %v5310_v60, %v5310_v60 }
 0x1ff   : > { %v5319_v1 = vadd.f32 %v5318_v14, %v3339_v41  ;;  %v3517_v29 = vmul.f32 %v5313_v56, %v5313_v56  ;;  %v4934_v49 = vadd.f32 %v4933_v50, %v4932_v24  ;;  %v4935_v32 = vpop.f32.mrb[130].mxu0 }
 0x200   : > { %v4188_v42 = vpack.c.bf16 %v5316_v39, %v5310_v60  ;;  %v3520_v14 = vmul.f32 %v5316_v39, %v5316_v39  ;;  %v4936_v9 = vpop.f32.mrb[131].mxu0 }
 0x201   : > { %v4183_v23 = vpack.c.bf16 %v5319_v1, %v5313_v56  ;;  %v3495_v26 = vadd.f32 %v5319_v1, %v5313_v56  ;;  %v3518_v37 = vmul.f32 %v5319_v1, %v5319_v1  ;;  %v5335_v35 = vadd.f32 %v4934_v49, %v6973_v11 }
 0x202   : > { %4243 = vst [vmem:[%s6902_s27 + $0x48] sm:$0xff] %v4188_v42   ;;  %v4937_v30 = vadd.f32 %v4936_v9, %v4935_v32 }
 0x203   : > { %4242 = vst [vmem:[%s6902_s27 + $0x40] sm:$0xff] %v4183_v23   ;;  %v3496_v25 = vadd.f32 %v5310_v60, %v3495_v26  ;;  %v3533_v22 = vadd.f32 %v3518_v37, %v3517_v29  ;;  %v5234_v48 = vpop.f32.mrb[52].mxu1  ;;  %v5336_v46 = vadd.f32 %v5335_v35, %v7001_v57 }
 0x204   : > { %v5322_v18 = vadd.f32 %v5321_v27, %v5234_v48  ;;  %v3352_v47 = vpop.f32.mrb[53].mxu1  ;;  %v5341_v21 = vadd.f32 %v4937_v30, %v6975_v59 }
 0x205   : > { %v3534_v62 = vadd.f32 %v3533_v22, %v3519_v40  ;;  %v5325_v55 = vadd.f32 %v5324_v13, %v3352_v47  ;;  %v5235_v5 = vpop.f32.mrb[54].mxu1  ;;  %v3497_v52 = vadd.f32 %v5316_v39, %v3496_v25  ;;  %v4938_v60 = vpop.f32.mrb[132].mxu0 }
 0x206   : > { %v5328_v28 = vadd.f32 %v5327_v4, %v5235_v5  ;;  %v3355_v33 = vpop.f32.mrb[55].mxu1  ;;  %v5342_v13 = vadd.f32 %v5341_v21, %v7003_v34  ;;  %v4939_v19 = vpop.f32.mrb[133].mxu0  ;;  %v3523_v20 = vmul.f32 %v5322_v18, %v5322_v18 }
 0x207   : > { %v3521_v61 = vmul.f32 %v5325_v55, %v5325_v55  ;;  %v3535_v2 = vadd.f32 %v3534_v62, %v3520_v14  ;;  %v5331_v44 = vadd.f32 %v5330_v45, %v3355_v33  ;;  %v3498_v54 = vadd.f32 %v5325_v55, %v3497_v52  ;;  %v4941_v59 = vpop.f32.mrb[134].mxu0 }
 0x208   : > { %v4198_v7 = vpack.c.bf16 %v5328_v28, %v5322_v18  ;;  %v4940_v39 = vadd.f32 %v4939_v19, %v4938_v60  ;;  %v3524_v45 = vmul.f32 %v5328_v28, %v5328_v28  ;;  %v4942_v1 = vpop.f32.mrb[135].mxu0 }
 0x209   : > { %v3536_v11 = vadd.f32 %v3535_v2, %v3521_v61  ;;  %v4193_v10 = vpack.c.bf16 %v5331_v44, %v5325_v55  ;;  %v3522_v12 = vmul.f32 %v5331_v44, %v5331_v44  ;;  %v3499_v56 = vadd.f32 %v5331_v44, %v3498_v54 }
 0x20a   : > { %4245 = vst [vmem:[%s6902_s27 + $0x58] sm:$0xff] %v4198_v7   ;;  %v5332_v57 = vadd.f32 %v4940_v39, %v6981_v51  ;;  %v4943_v42 = vadd.f32 %v4942_v1, %v4941_v59 }
 0x20b   : > { %4244 = vst [vmem:[%s6902_s27 + $0x50] sm:$0xff] %v4193_v10   ;;  %v3537_v41 = vadd.f32 %v3536_v11, %v3522_v12  ;;  %v5238_v8 = vpop.f32.mrb[56].mxu1  ;;  %v3500_v27 = vadd.f32 %v5322_v18, %v3499_v56 }
 0x20c   : > { %v3368_v29 = vpop.f32.mrb[57].mxu1  ;;  %v5338_v4 = vadd.f32 %v4943_v42, %v6983_v36  ;;  %v5333_v50 = vadd.f32 %v5332_v57, %v7006_v58  ;;  %v2160_v42 = vrot.slane %v6953_v31, 4 }
 0x20d   : > { %v3538_v24 = vadd.f32 %v3537_v41, %v3523_v20  ;;  %v5337_v23 = vadd.f32 %v5336_v46, %v3368_v29  ;;  %v5239_v26 = vpop.f32.mrb[58].mxu1  ;;  %v3501_v34 = vadd.f32 %v5328_v28, %v3500_v27  ;;  %v4944_v22 = vpop.f32.mrb[136].mxu0 }
 0x20e   : > { %v3371_v37 = vpop.f32.mrb[59].mxu1  ;;  %v5334_v48 = vadd.f32 %v5333_v50, %v5238_v8  ;;  %v5339_v51 = vadd.f32 %v5338_v4, %v7009_v53  ;;  %v4945_v9 = vpop.f32.mrb[137].mxu0  ;;  %v2122_v8 = vrot.slane %v6948_v3, 4 }
 0x20f   : > { %v3525_v40 = vmul.f32 %v5337_v23, %v5337_v23  ;;  %v3539_v49 = vadd.f32 %v3538_v24, %v3524_v45  ;;  %v3502_v32 = vadd.f32 %v5337_v23, %v3501_v34  ;;  %v5343_v25 = vadd.f32 %v5342_v13, %v3371_v37  ;;  %v4947_v62 = vpop.f32.mrb[138].mxu0 }
 0x210   : > { %v4946_v30 = vadd.f32 %v4945_v9, %v4944_v22  ;;  %v5340_v55 = vadd.f32 %v5339_v51, %v5239_v26  ;;  %v3527_v58 = vmul.f32 %v5334_v48, %v5334_v48  ;;  %v4948_v5 = vpop.f32.mrb[139].mxu0 }
 0x211   : > { %v3540_v14 = vadd.f32 %v3539_v49, %v3525_v40  ;;  %v4203_v18 = vpack.c.bf16 %v5343_v25, %v5337_v23  ;;  %v3503_v47 = vadd.f32 %v5343_v25, %v3502_v32  ;;  %v3526_v35 = vmul.f32 %v5343_v25, %v5343_v25 }
 0x212   : > { %v5347_v21 = vadd.f32 %v4946_v30, %v6989_v0  ;;  %v4208_v61 = vpack.c.bf16 %v5340_v55, %v5334_v48  ;;  %v4949_v2 = vadd.f32 %v4948_v5, %v4947_v62  ;;  %v3528_v44 = vmul.f32 %v5340_v55, %v5340_v55 }
 0x213   : > { %v5242_v36 = vpop.f32.mrb[60].mxu1  ;;  %4246 = vst [vmem:[%s6902_s27 + $0x60] sm:$0xff] %v4203_v18   ;;  %v3504_v52 = vadd.f32 %v5334_v48, %v3503_v47  ;;  %v3541_v28 = vadd.f32 %v3540_v14, %v3526_v35  ;;  %v2123_v23 = vadd.f32 %v2122_v8, %v6948_v3 }
 0x214   : > { %v3384_v33 = vpop.f32.mrb[61].mxu1  ;;  %4247 = vst [vmem:[%s6902_s27 + $0x68] sm:$0xff] %v4208_v61   ;;  %v5353_v60 = vadd.f32 %v4949_v2, %v6991_v63  ;;  %v5348_v11 = vadd.f32 %v5347_v21, %v7014_v38 }
 0x215   : > { %v5243_v53 = vpop.f32.mrb[62].mxu1  ;;  %v3542_v54 = vadd.f32 %v3541_v28, %v3527_v58  ;;  %v3505_v7 = vadd.f32 %v5340_v55, %v3504_v52  ;;  %v4950_v12 = vpop.f32.mrb[140].mxu0  ;;  %v2124_v49 = vrot.slane %v2123_v23, 2 }
 0x216   : > { %v3387_v46 = vpop.f32.mrb[63].mxu1  ;;  %v5349_v13 = vadd.f32 %v5348_v11, %v3384_v33  ;;  %v5354_v19 = vadd.f32 %v5353_v60, %v7017_v17  ;;  %v4951_v56 = vpop.f32.mrb[141].mxu0 }
 0x217   : > { %v3543_v10 = vadd.f32 %v3542_v54, %v3528_v44  ;;  %v4952_v20 = vadd.f32 %v4951_v56, %v4950_v12  ;;  %v4953_v59 = vpop.f32.mrb[142].mxu0  ;;  %v2125_v14 = vadd.f32 %v2124_v49, %v2123_v23 }
 0x218   : > { %v3506_v0 = vadd.f32 %v5349_v13, %v3505_v7  ;;  %v3529_v39 = vmul.f32 %v5349_v13, %v5349_v13  ;;  %v5355_v41 = vadd.f32 %v5354_v19, %v3387_v46  ;;  %v4954_v45 = vpop.f32.mrb[143].mxu0 }
 0x219   : > { %v5344_v1 = vadd.f32 %v4952_v20, %v6997_v16  ;;  %v4955_v27 = vadd.f32 %v4954_v45, %v4953_v59  ;;  %v2161_v16 = vadd.f32 %v2160_v42, %v6953_v31  ;;  %v2126_v47 = vrot.slane %v2125_v14, 1 }
 0x21a   : > { %v3544_v63 = vadd.f32 %v3543_v10, %v3529_v39  ;;  %v4213_v38 = vpack.c.bf16 %v5355_v41, %v5349_v13  ;;  %v3507_v29 = vadd.f32 %v5355_v41, %v3506_v0  ;;  %v3530_v57 = vmul.f32 %v5355_v41, %v5355_v41 }
 0x21b   : > { %v5345_v17 = vadd.f32 %v5344_v1, %v7022_v6  ;;  %v5350_v24 = vadd.f32 %v4955_v27, %v6999_v15  ;;  %v2162_v22 = vrot.slane %v2161_v16, 2  ;;  %v2127_v58 = vadd.f32 %v2126_v47, %v2125_v14 }
 0x21c   : > { %4248 = vst [vmem:[%s6902_s27 + $0x70] sm:$0xff] %v4213_v38   ;;  %v3545_v26 = vadd.f32 %v3544_v63, %v3530_v57 }
 0x21d   : > { %v5346_v34 = vadd.f32 %v5345_v17, %v5242_v36  ;;  %v5351_v37 = vadd.f32 %v5350_v24, %v7025_v43  ;;  %v2163_v43 = vadd.f32 %v2162_v22, %v2161_v16 }
 0x21f   : > { %v5352_v4 = vadd.f32 %v5351_v37, %v5243_v53  ;;  %v3508_v50 = vadd.f32 %v5346_v34, %v3507_v29  ;;  %v3531_v40 = vmul.f32 %v5346_v34, %v5346_v34  ;;  %v2164_v62 = vrot.slane %v2163_v43, 1 }
 0x221   : > { %v4218_v32 = vpack.c.bf16 %v5352_v4, %v5346_v34  ;;  %v3532_v25 = vmul.f32 %v5352_v4, %v5352_v4  ;;  %v3509_v6 = vadd.f32 %v5352_v4, %v3508_v50  ;;  %v3546_v15 = vadd.f32 %v3545_v26, %v3531_v40 }
 0x222   : > { %v2165_v28 = vadd.f32 %v2164_v62, %v2163_v43 }
 0x223   : > { %4249 = vst [vmem:[%s6902_s27 + $0x78] sm:$0xff] %v4218_v32   ;;  %v3510_v48 = vrot.slane %v3509_v6, 4  ;;  %v3547_v3 = vadd.f32 %v3546_v15, %v3532_v25 }
 0x225   : > { %v3511_v51 = vadd.f32 %v3510_v48, %v3509_v6  ;;  %v3548_v9 = vrot.slane %v3547_v3, 4 }
 0x227   : > { %v3512_v31 = vrot.slane %v3511_v51, 2  ;;  %v3549_v18 = vadd.f32 %v3548_v9, %v3547_v3 }
 0x229   : > { %v3513_v35 = vadd.f32 %v3512_v31, %v3511_v51  ;;  %v3550_v30 = vrot.slane %v3549_v18, 2 }
 0x22b   : > { %v3514_v55 = vrot.slane %v3513_v35, 1  ;;  %v3551_v36 = vadd.f32 %v3550_v30, %v3549_v18 }
 0x22d   : > { %v3515_v5 = vadd.f32 %v3514_v55, %v3513_v35  ;;  %v3552_v52 = vrot.slane %v3551_v36, 1 }
 0x22f   : > { %v3516_v33 = vadd.f32 %v3515_v5, %v2127_v58  ;;  %v3553_v21 = vadd.f32 %v3552_v52, %v3551_v36 }
 0x231   : > { %v3554_v61 = vadd.f32 %v3553_v21, %v2165_v28  ;;  %3555 = vst [vmem:[%s268_s28] sm:$0x1] %v3516_v33 }
 0x233   : > { %3556 = vst [vmem:[%s271_s7] sm:$0x1] %v3554_v61 }
 0x234 PF: > { %s17_s21 = sadd.s32 1, %s5566_s21  }
 0x235   : > { %p14_p5 = scmp.ge.s32.totalorder %s17_s21, 4  }
 0x237   :  { %16 = sbr.rel (!%p14_p5) target bundleno = 1 (0x1), region = 98 }

</bundles_post_ra>
